<compile_context>
chip_gen: v5e
topology: v5e:2x2
jax: 0.10.0
libtpu: 0.0.40
codegen_flags: <defaults>
</compile_context>

<pallas_src>
import functools

import jax
import jax.numpy as jnp
from jax.experimental import pallas as pl
from jax.experimental.pallas import tpu as pltpu


# ----------------------------------------------------------------------------
# Kernel
# ----------------------------------------------------------------------------
def model_kernel(
    x_ref, xenv_ref,
    w1_ref, b1_ref,
    w2p_ref, w2n_ref, b2_ref,
    we_ref, be_ref,
    w3p_ref, w3n_ref, w3e_ref, b3_ref,
    out_ref,
):
    f32 = jnp.float32

    x = x_ref[...]
    # dense1 (BN1 affine + weight-norm already folded into w1 / b1)
    h1 = jnp.dot(x, w1_ref[...], preferred_element_type=f32) + b1_ref[...]

    # CReLU = cat(relu(h), -relu(-h)) = [max(h,0) | min(h,0)].
    # The concat is removed by splitting the downstream weight matrix.
    p1 = jnp.maximum(h1, 0.0)
    n1 = jnp.minimum(h1, 0.0)

    # dense2 with BN2 folded into the split halves w2p / w2n and b2
    h2 = (
        jnp.dot(p1, w2p_ref[...], preferred_element_type=f32)
        + jnp.dot(n1, w2n_ref[...], preferred_element_type=f32)
        + b2_ref[...]
    )
    p2 = jnp.maximum(h2, 0.0)
    n2 = jnp.minimum(h2, 0.0)

    # env branch: BN_env folded into we / be
    xe = jnp.dot(xenv_ref[...], we_ref[...], preferred_element_type=f32) + be_ref[...]

    # dense3 with BN3 folded; the [CReLU(h2) | xe] concat is replaced by three
    # accumulating matmuls on the split w3.
    out = (
        jnp.dot(p2, w3p_ref[...], preferred_element_type=f32)
        + jnp.dot(n2, w3n_ref[...], preferred_element_type=f32)
        + jnp.dot(xe, w3e_ref[...], preferred_element_type=f32)
        + b3_ref[...]
    )
    out_ref[...] = out.astype(out_ref.dtype)


# ----------------------------------------------------------------------------
# Parameter folding (plain JAX glue, runs once)
# ----------------------------------------------------------------------------
def bn_affine(gamma, beta, mean, var, eps=1e-5):
    """Eval-mode BatchNorm1d as per-feature scale/shift."""
    scale = gamma / jnp.sqrt(var + eps)
    shift = beta - mean * scale
    return scale, shift


def weight_norm(v, g):
    """PyTorch nn.utils.weight_norm (dim=0): W[o,i] = g[o] * v[o,i] / ||v[o,:]||."""
    return g[:, None] * v / jnp.sqrt(jnp.sum(v * v, axis=1, keepdims=True))


def fold_params(raw, hidden_size):
    """Fold every BN affine into the adjacent Linear and split the post-concat
    weight matrices so the kernel needs no concatenation at all."""
    H = hidden_size

    s1, t1 = bn_affine(*raw["bn1"])
    s2, t2 = bn_affine(*raw["bn2"])
    se, te = bn_affine(*raw["bn_env"])
    s3, t3 = bn_affine(*raw["bn3"])

    w1 = weight_norm(raw["v1"], raw["g1"]).T      # [F,  H]
    w2 = raw["w2"].T                              # [2H, H]
    we = weight_norm(raw["ve"], raw["ge"]).T      # [Fe, He]
    w3 = weight_norm(raw["v3"], raw["g3"]).T      # [2H+He, NT]

    # BN1 -> dense1
    w1f = s1[:, None] * w1
    b1f = raw["b1"] + t1 @ w1
    # BN2 -> dense2 (split over CReLU halves)
    w2f = s2[:, None] * w2
    b2f = raw["b2"] + t2 @ w2
    w2p, w2n = w2f[:H], w2f[H:]
    # BN_env -> dense_env
    wef = se[:, None] * we
    bef = raw["be"] + te @ we
    # BN3 -> dense3 (split over [CReLU(h2) | x_env])
    w3f = s3[:, None] * w3
    b3f = raw["b3"] + t3 @ w3
    w3p, w3n, w3e = w3f[:H], w3f[H:2 * H], w3f[2 * H:]

    return dict(
        w1=w1f, b1=b1f[None, :],
        w2p=w2p, w2n=w2n, b2=b2f[None, :],
        we=wef, be=bef[None, :],
        w3p=w3p, w3n=w3n, w3e=w3e, b3=b3f[None, :],
    )


PARAM_ORDER = ("w1", "b1", "w2p", "w2n", "b2", "we", "be", "w3p", "w3n", "w3e", "b3")


# ----------------------------------------------------------------------------
# Wrapper: batch-tiled pallas_call
# ----------------------------------------------------------------------------
@functools.partial(jax.jit, static_argnames=("tb",))
def model_forward(x, x_env, fp, *, tb=512):
    B, F = x.shape
    Fe = x_env.shape[1]
    NT = fp["b3"].shape[-1]

    # Pad batch to a multiple of the tile size (tb is a multiple of 8 sublanes).
    Bp = max(tb, ((B + tb - 1) // tb) * tb)
    if Bp != B:
        x = jnp.pad(x, ((0, Bp - B), (0, 0)))
        x_env = jnp.pad(x_env, ((0, Bp - B), (0, 0)))

    def batch_spec(feat):
        return pl.BlockSpec((tb, feat), lambda i: (i, 0))

    def resident_spec(shape):
        # Constant block index -> weights/biases stay VMEM-resident across the grid.
        return pl.BlockSpec(shape, lambda i: (0, 0))

    params = [fp[k] for k in PARAM_ORDER]
    in_specs = [batch_spec(F), batch_spec(Fe)] + [resident_spec(p.shape) for p in params]

    out = pl.pallas_call(
        model_kernel,
        out_shape=jax.ShapeDtypeStruct((Bp, NT), jnp.float32),
        grid=(Bp // tb,),
        in_specs=in_specs,
        out_specs=batch_spec(NT),
        compiler_params=pltpu.CompilerParams(
            dimension_semantics=("parallel",),      # megacore split on v7x
            vmem_limit_bytes=32 * 1024 * 1024,      # explicit; sized for v7x's 64 MiB VMEM
        ),
    )(x, x_env, *params)
    return out[:B]


# ----------------------------------------------------------------------------
# Pure-JAX reference (eval-mode PyTorch semantics, unfolded parameters)
# ----------------------------------------------------------------------------
def reference_forward(x, x_env, raw):
    def bn(v, p):
        s, t = bn_affine(*p)
        return v * s + t

    def crelu(v):
        # torch.cat((relu(v), -relu(-v)), dim=1) == [max(v,0) | min(v,0)]
        return jnp.concatenate([jnp.maximum(v, 0.0), jnp.minimum(v, 0.0)], axis=1)

    w1 = weight_norm(raw["v1"], raw["g1"])
    we = weight_norm(raw["ve"], raw["ge"])
    w3 = weight_norm(raw["v3"], raw["g3"])

    h = bn(x, raw["bn1"])
    h = crelu(h @ w1.T + raw["b1"])
    h = bn(h, raw["bn2"])                       # dropout2: identity in eval
    h = crelu(h @ raw["w2"].T + raw["b2"])
    e = bn(x_env, raw["bn_env"])
    e = e @ we.T + raw["be"]
    c = jnp.concatenate([h, e], axis=1)
    c = bn(c, raw["bn3"])                       # dropout3: identity in eval
    return c @ w3.T + raw["b3"]


# ----------------------------------------------------------------------------
if __name__ == "__main__":
    num_features = 32
    num_env_features = 16
    hidden_size = 32
    hidden_size_env = 16
    num_targets = 8
    B = 1024          # batch, tiled into TB-row blocks over the grid
    TB = 512

    key = jax.random.PRNGKey(0)
    ks = iter(jax.random.split(key, 40))

    def rnd(shape, scale=0.1):
        return scale * jax.random.normal(next(ks), shape, dtype=jnp.float32)

    def bn_raw(F):
        gamma = 1.0 + rnd((F,), 0.05)
        beta = rnd((F,), 0.05)
        mean = rnd((F,), 0.1)
        var = 1.0 + jnp.abs(rnd((F,), 0.1))
        return (gamma, beta, mean, var)

    raw = dict(
        bn1=bn_raw(num_features),
        bn_env=bn_raw(num_env_features),
        bn2=bn_raw(hidden_size * 2),
        bn3=bn_raw(hidden_size * 2 + hidden_size_env),
        v1=rnd((hidden_size, num_features)),
        g1=1.0 + rnd((hidden_size,), 0.05),
        b1=rnd((hidden_size,)),
        ve=rnd((hidden_size_env, num_env_features)),
        ge=1.0 + rnd((hidden_size_env,), 0.05),
        be=rnd((hidden_size_env,)),
        w2=rnd((hidden_size, hidden_size * 2)),
        b2=rnd((hidden_size,)),
        v3=rnd((num_targets, hidden_size * 2 + hidden_size_env)),
        g3=1.0 + rnd((num_targets,), 0.05),
        b3=rnd((num_targets,)),
    )

    fp = fold_params(raw, hidden_size)

    x = jax.random.normal(next(ks), (B, num_features), dtype=jnp.float32)
    x_env = jax.random.normal(next(ks), (B, num_env_features), dtype=jnp.float32)

    out = jax.block_until_ready(model_forward(x, x_env, fp, tb=TB))
    ref = reference_forward(x, x_env, raw)

    assert out.shape == (B, num_targets)
    assert jnp.allclose(out, ref, atol=1e-4, rtol=1e-4), float(jnp.max(jnp.abs(out - ref)))

    # TODO(synk): training-mode BatchNorm (batch statistics) and Dropout masks
    # are not implemented; kernel covers eval/inference semantics only.
    print("KERNEL_OK")
</pallas_src>

<mosaic_0001>
module attributes {stable_mosaic.version = 11 : i64} {
  func.func @model_kernel(%arg0: i32, %arg1: memref<512x32xf32, #tpu.memory_space<vmem>>, %arg2: memref<512x16xf32, #tpu.memory_space<vmem>>, %arg3: memref<32x32xf32, #tpu.memory_space<vmem>>, %arg4: memref<1x32xf32, #tpu.memory_space<vmem>>, %arg5: memref<32x32xf32, #tpu.memory_space<vmem>>, %arg6: memref<32x32xf32, #tpu.memory_space<vmem>>, %arg7: memref<1x32xf32, #tpu.memory_space<vmem>>, %arg8: memref<16x16xf32, #tpu.memory_space<vmem>>, %arg9: memref<1x16xf32, #tpu.memory_space<vmem>>, %arg10: memref<32x8xf32, #tpu.memory_space<vmem>>, %arg11: memref<32x8xf32, #tpu.memory_space<vmem>>, %arg12: memref<16x8xf32, #tpu.memory_space<vmem>>, %arg13: memref<1x8xf32, #tpu.memory_space<vmem>>, %arg14: memref<512x8xf32, #tpu.memory_space<vmem>>) attributes {dimension_semantics = [#tpu.dimension_semantics<parallel>], iteration_bounds = array<i64: 2>, scalar_prefetch = 0 : i64, scratch_operands = 0 : i64, tpu.core_type = #tpu.core_type<tc>, window_params = [{transform_indices = @transform_0, window_bounds = array<i64: 512, 32>}, {transform_indices = @transform_1, window_bounds = array<i64: 512, 16>}, {pipeline_mode = #tpu.pipeline_mode<synchronous>, transform_indices = @transform_2, window_bounds = array<i64: 32, 32>}, {pipeline_mode = #tpu.pipeline_mode<synchronous>, transform_indices = @transform_3, window_bounds = array<i64: 1, 32>}, {pipeline_mode = #tpu.pipeline_mode<synchronous>, transform_indices = @transform_4, window_bounds = array<i64: 32, 32>}, {pipeline_mode = #tpu.pipeline_mode<synchronous>, transform_indices = @transform_5, window_bounds = array<i64: 32, 32>}, {pipeline_mode = #tpu.pipeline_mode<synchronous>, transform_indices = @transform_6, window_bounds = array<i64: 1, 32>}, {pipeline_mode = #tpu.pipeline_mode<synchronous>, transform_indices = @transform_7, window_bounds = array<i64: 16, 16>}, {pipeline_mode = #tpu.pipeline_mode<synchronous>, transform_indices = @transform_8, window_bounds = array<i64: 1, 16>}, {pipeline_mode = #tpu.pipeline_mode<synchronous>, transform_indices = @transform_9, window_bounds = array<i64: 32, 8>}, {pipeline_mode = #tpu.pipeline_mode<synchronous>, transform_indices = @transform_10, window_bounds = array<i64: 32, 8>}, {pipeline_mode = #tpu.pipeline_mode<synchronous>, transform_indices = @transform_11, window_bounds = array<i64: 16, 8>}, {pipeline_mode = #tpu.pipeline_mode<synchronous>, transform_indices = @transform_12, window_bounds = array<i64: 1, 8>}, {transform_indices = @transform_13, window_bounds = array<i64: 512, 8>}]} {
    %c0 = arith.constant 0 : index
    %c0_0 = arith.constant 0 : index
    %0 = vector.load %arg1[%c0, %c0_0] : memref<512x32xf32, #tpu.memory_space<vmem>>, vector<512x32xf32>
    %c0_1 = arith.constant 0 : index
    %c0_2 = arith.constant 0 : index
    %1 = vector.load %arg3[%c0_1, %c0_2] : memref<32x32xf32, #tpu.memory_space<vmem>>, vector<32x32xf32>
    %cst = arith.constant dense<0.000000e+00> : vector<512x32xf32>
    %2 = tpu.matmul %0, %1, %cst {dimension_numbers = #tpu.dot_dimension_numbers<[1], [0], [0], [1], [0, 0, 1, 1], [], []>} : vector<512x32xf32>, vector<32x32xf32>, vector<512x32xf32> -> vector<512x32xf32>
    %c0_3 = arith.constant 0 : index
    %c0_4 = arith.constant 0 : index
    %3 = vector.load %arg4[%c0_3, %c0_4] : memref<1x32xf32, #tpu.memory_space<vmem>>, vector<1x32xf32>
    %4 = vector.broadcast %3 : vector<1x32xf32> to vector<512x32xf32>
    %5 = arith.addf %2, %4 : vector<512x32xf32>
    %cst_5 = arith.constant 0.000000e+00 : f32
    %6 = vector.broadcast %cst_5 : f32 to vector<512x32xf32>
    %7 = arith.maximumf %5, %6 : vector<512x32xf32>
    %cst_6 = arith.constant 0.000000e+00 : f32
    %8 = vector.broadcast %cst_6 : f32 to vector<512x32xf32>
    %9 = arith.minimumf %5, %8 : vector<512x32xf32>
    %c0_7 = arith.constant 0 : index
    %c0_8 = arith.constant 0 : index
    %10 = vector.load %arg5[%c0_7, %c0_8] : memref<32x32xf32, #tpu.memory_space<vmem>>, vector<32x32xf32>
    %cst_9 = arith.constant dense<0.000000e+00> : vector<512x32xf32>
    %11 = tpu.matmul %7, %10, %cst_9 {dimension_numbers = #tpu.dot_dimension_numbers<[1], [0], [0], [1], [0, 0, 1, 1], [], []>} : vector<512x32xf32>, vector<32x32xf32>, vector<512x32xf32> -> vector<512x32xf32>
    %c0_10 = arith.constant 0 : index
    %c0_11 = arith.constant 0 : index
    %12 = vector.load %arg6[%c0_10, %c0_11] : memref<32x32xf32, #tpu.memory_space<vmem>>, vector<32x32xf32>
    %cst_12 = arith.constant dense<0.000000e+00> : vector<512x32xf32>
    %13 = tpu.matmul %9, %12, %cst_12 {dimension_numbers = #tpu.dot_dimension_numbers<[1], [0], [0], [1], [0, 0, 1, 1], [], []>} : vector<512x32xf32>, vector<32x32xf32>, vector<512x32xf32> -> vector<512x32xf32>
    %14 = arith.addf %11, %13 : vector<512x32xf32>
    %c0_13 = arith.constant 0 : index
    %c0_14 = arith.constant 0 : index
    %15 = vector.load %arg7[%c0_13, %c0_14] : memref<1x32xf32, #tpu.memory_space<vmem>>, vector<1x32xf32>
    %16 = vector.broadcast %15 : vector<1x32xf32> to vector<512x32xf32>
    %17 = arith.addf %14, %16 : vector<512x32xf32>
    %cst_15 = arith.constant 0.000000e+00 : f32
    %18 = vector.broadcast %cst_15 : f32 to vector<512x32xf32>
    %19 = arith.maximumf %17, %18 : vector<512x32xf32>
    %cst_16 = arith.constant 0.000000e+00 : f32
    %20 = vector.broadcast %cst_16 : f32 to vector<512x32xf32>
    %21 = arith.minimumf %17, %20 : vector<512x32xf32>
    %c0_17 = arith.constant 0 : index
    %c0_18 = arith.constant 0 : index
    %22 = vector.load %arg2[%c0_17, %c0_18] : memref<512x16xf32, #tpu.memory_space<vmem>>, vector<512x16xf32>
    %c0_19 = arith.constant 0 : index
    %c0_20 = arith.constant 0 : index
    %23 = vector.load %arg8[%c0_19, %c0_20] : memref<16x16xf32, #tpu.memory_space<vmem>>, vector<16x16xf32>
    %cst_21 = arith.constant dense<0.000000e+00> : vector<512x16xf32>
    %24 = tpu.matmul %22, %23, %cst_21 {dimension_numbers = #tpu.dot_dimension_numbers<[1], [0], [0], [1], [0, 0, 1, 1], [], []>} : vector<512x16xf32>, vector<16x16xf32>, vector<512x16xf32> -> vector<512x16xf32>
    %c0_22 = arith.constant 0 : index
    %c0_23 = arith.constant 0 : index
    %25 = vector.load %arg9[%c0_22, %c0_23] : memref<1x16xf32, #tpu.memory_space<vmem>>, vector<1x16xf32>
    %26 = vector.broadcast %25 : vector<1x16xf32> to vector<512x16xf32>
    %27 = arith.addf %24, %26 : vector<512x16xf32>
    %c0_24 = arith.constant 0 : index
    %c0_25 = arith.constant 0 : index
    %28 = vector.load %arg10[%c0_24, %c0_25] : memref<32x8xf32, #tpu.memory_space<vmem>>, vector<32x8xf32>
    %cst_26 = arith.constant dense<0.000000e+00> : vector<512x8xf32>
    %29 = tpu.matmul %19, %28, %cst_26 {dimension_numbers = #tpu.dot_dimension_numbers<[1], [0], [0], [1], [0, 0, 1, 1], [], []>} : vector<512x32xf32>, vector<32x8xf32>, vector<512x8xf32> -> vector<512x8xf32>
    %c0_27 = arith.constant 0 : index
    %c0_28 = arith.constant 0 : index
    %30 = vector.load %arg11[%c0_27, %c0_28] : memref<32x8xf32, #tpu.memory_space<vmem>>, vector<32x8xf32>
    %cst_29 = arith.constant dense<0.000000e+00> : vector<512x8xf32>
    %31 = tpu.matmul %21, %30, %cst_29 {dimension_numbers = #tpu.dot_dimension_numbers<[1], [0], [0], [1], [0, 0, 1, 1], [], []>} : vector<512x32xf32>, vector<32x8xf32>, vector<512x8xf32> -> vector<512x8xf32>
    %32 = arith.addf %29, %31 : vector<512x8xf32>
    %c0_30 = arith.constant 0 : index
    %c0_31 = arith.constant 0 : index
    %33 = vector.load %arg12[%c0_30, %c0_31] : memref<16x8xf32, #tpu.memory_space<vmem>>, vector<16x8xf32>
    %cst_32 = arith.constant dense<0.000000e+00> : vector<512x8xf32>
    %34 = tpu.matmul %27, %33, %cst_32 {dimension_numbers = #tpu.dot_dimension_numbers<[1], [0], [0], [1], [0, 0, 1, 1], [], []>} : vector<512x16xf32>, vector<16x8xf32>, vector<512x8xf32> -> vector<512x8xf32>
    %35 = arith.addf %32, %34 : vector<512x8xf32>
    %c0_33 = arith.constant 0 : index
    %c0_34 = arith.constant 0 : index
    %36 = vector.load %arg13[%c0_33, %c0_34] : memref<1x8xf32, #tpu.memory_space<vmem>>, vector<1x8xf32>
    %37 = vector.broadcast %36 : vector<1x8xf32> to vector<512x8xf32>
    %38 = arith.addf %35, %37 : vector<512x8xf32>
    %c0_35 = arith.constant 0 : index
    %c0_36 = arith.constant 0 : index
    %39 = vector.load %arg14[%c0_35, %c0_36] : memref<512x8xf32, #tpu.memory_space<vmem>>, vector<512x8xf32>
    tpu.vector_store %arg14[%c0_35, %c0_36], %38 {strides = array<i32>} : memref<512x8xf32, #tpu.memory_space<vmem>>, vector<512x8xf32>,
    return
  }
  func.func @transform_0(%arg0: i32) -> (i32, i32) {
    %c0_i32 = arith.constant 0 : i32
    %c0_i32_0 = arith.constant 0 : i32
    return %arg0, %c0_i32 : i32, i32
  }
  func.func @transform_1(%arg0: i32) -> (i32, i32) {
    %c0_i32 = arith.constant 0 : i32
    %c0_i32_0 = arith.constant 0 : i32
    return %arg0, %c0_i32 : i32, i32
  }
  func.func @transform_2(%arg0: i32) -> (i32, i32) {
    %c0_i32 = arith.constant 0 : i32
    %c0_i32_0 = arith.constant 0 : i32
    %c0_i32_1 = arith.constant 0 : i32
    return %c0_i32, %c0_i32_0 : i32, i32
  }
  func.func @transform_3(%arg0: i32) -> (i32, i32) {
    %c0_i32 = arith.constant 0 : i32
    %c0_i32_0 = arith.constant 0 : i32
    %c0_i32_1 = arith.constant 0 : i32
    return %c0_i32, %c0_i32_0 : i32, i32
  }
  func.func @transform_4(%arg0: i32) -> (i32, i32) {
    %c0_i32 = arith.constant 0 : i32
    %c0_i32_0 = arith.constant 0 : i32
    %c0_i32_1 = arith.constant 0 : i32
    return %c0_i32, %c0_i32_0 : i32, i32
  }
  func.func @transform_5(%arg0: i32) -> (i32, i32) {
    %c0_i32 = arith.constant 0 : i32
    %c0_i32_0 = arith.constant 0 : i32
    %c0_i32_1 = arith.constant 0 : i32
    return %c0_i32, %c0_i32_0 : i32, i32
  }
  func.func @transform_6(%arg0: i32) -> (i32, i32) {
    %c0_i32 = arith.constant 0 : i32
    %c0_i32_0 = arith.constant 0 : i32
    %c0_i32_1 = arith.constant 0 : i32
    return %c0_i32, %c0_i32_0 : i32, i32
  }
  func.func @transform_7(%arg0: i32) -> (i32, i32) {
    %c0_i32 = arith.constant 0 : i32
    %c0_i32_0 = arith.constant 0 : i32
    %c0_i32_1 = arith.constant 0 : i32
    return %c0_i32, %c0_i32_0 : i32, i32
  }
  func.func @transform_8(%arg0: i32) -> (i32, i32) {
    %c0_i32 = arith.constant 0 : i32
    %c0_i32_0 = arith.constant 0 : i32
    %c0_i32_1 = arith.constant 0 : i32
    return %c0_i32, %c0_i32_0 : i32, i32
  }
  func.func @transform_9(%arg0: i32) -> (i32, i32) {
    %c0_i32 = arith.constant 0 : i32
    %c0_i32_0 = arith.constant 0 : i32
    %c0_i32_1 = arith.constant 0 : i32
    return %c0_i32, %c0_i32_0 : i32, i32
  }
  func.func @transform_10(%arg0: i32) -> (i32, i32) {
    %c0_i32 = arith.constant 0 : i32
    %c0_i32_0 = arith.constant 0 : i32
    %c0_i32_1 = arith.constant 0 : i32
    return %c0_i32, %c0_i32_0 : i32, i32
  }
  func.func @transform_11(%arg0: i32) -> (i32, i32) {
    %c0_i32 = arith.constant 0 : i32
    %c0_i32_0 = arith.constant 0 : i32
    %c0_i32_1 = arith.constant 0 : i32
    return %c0_i32, %c0_i32_0 : i32, i32
  }
  func.func @transform_12(%arg0: i32) -> (i32, i32) {
    %c0_i32 = arith.constant 0 : i32
    %c0_i32_0 = arith.constant 0 : i32
    %c0_i32_1 = arith.constant 0 : i32
    return %c0_i32, %c0_i32_0 : i32, i32
  }
  func.func @transform_13(%arg0: i32) -> (i32, i32) {
    %c0_i32 = arith.constant 0 : i32
    %c0_i32_0 = arith.constant 0 : i32
    return %arg0, %c0_i32 : i32, i32
  }
}

</mosaic_0001>

<bundles_post_ra>
// kernel: model_forward.1
= control target key start
LH: loop header
LB: loop body
LE: loop exit
PB: predicated region body
PF: predicated region fallthrough
CT: control target
= control target key end

     0   :  { %s4587_s25 = smov 0   ;;  %s6352_s0 = inlined_call_operand.vmem [shape: f32[1024,32], index: 0, kind: input, shape index: {}]   ;;  %s6353_s1 = inlined_call_operand.vmem [shape: f32[1024,16], index: 1, kind: input, shape index: {}]   ;;  %s6354_s2 = inlined_call_operand.vmem [shape: f32[32,32], index: 2, kind: input, shape index: {}]   ;;  %s6355_s3 = inlined_call_operand.vmem [shape: f32[1,32], index: 3, kind: input, shape index: {}]   ;;  %s6356_s4 = inlined_call_operand.vmem [shape: f32[32,32], index: 4, kind: input, shape index: {}]   ;;  %s6357_s5 = inlined_call_operand.vmem [shape: f32[32,32], index: 5, kind: input, shape index: {}]   ;;  %s6358_s6 = inlined_call_operand.vmem [shape: f32[1,32], index: 6, kind: input, shape index: {}]   ;;  %s6359_s7 = inlined_call_operand.vmem [shape: f32[16,16], index: 7, kind: input, shape index: {}]   ;;  %s6360_s8 = inlined_call_operand.vmem [shape: f32[1,16], index: 8, kind: input, shape index: {}]   ;;  %s6361_s9 = inlined_call_operand.vmem [shape: f32[32,8], index: 9, kind: input, shape index: {}]   ;;  %s6362_s10 = inlined_call_operand.vmem [shape: f32[32,8], index: 10, kind: input, shape index: {}]   ;;  %s6363_s11 = inlined_call_operand.vmem [shape: f32[16,8], index: 11, kind: input, shape index: {}]   ;;  %s6364_s12 = inlined_call_operand.vmem [shape: f32[1,8], index: 12, kind: input, shape index: {}]   ;;  %s6365_s13 = inlined_call_operand.vmem [shape: f32[1024,8], index: 13, kind: output, shape index: {}]  }
   0x1 LB: > { %s4024_s26 = sadd.s32 4294967295, %s4515_s25   ;;  %p4028_p0 = scmp.ge.s32.totalorder %s4515_s25, 1  ;;  %s4515_s25 = sphi %s4587_s25, %s23_s25  }
   0x2   : > { %p399_p1 = scmp.lt.s32.totalorder %s4515_s25, 3 }
   0x4   : > { %p400_p2 = pnand %p4028_p0, %p399_p1 }
   0x6   : > { %403 = sbr.rel (%p400_p2) target bundleno = 1564 (0x61c), region = 72 }
   0xb   : > { %v533_v0 = vld [vmem:[%s6354_s2 + $0x18] sm:$0xff]  ;;  %v532_v1 = vld [vmem:[%s6354_s2 + $0x10] sm:$0xff]  ;;  %s4029_s14 = sshll.u32 %s4024_s26, 6  ;;  %v531_v2 = vld [vmem:[%s6354_s2 + $0x8] sm:$0xff]  ;;  %vm538_vm0 = vcmask 261120   ;;  %vm2144_vm1 = vcmask 130048  }
   0xc   : > { %4485 = vmatpush.msra.mxu2 %v533_v0  ;;  %p449_p3 = scmp.lt.s32.totalorder %s4029_s14, 127  ;;  %v4607_v3 = vld [vmem:[%s6359_s7 + $0x8] sm:$0xff]  ;;  %v1075_v4 = vld [vmem:[%s6357_s5 + $0x18] sm:$0xff]  ;;  %743 = vmatpush.msra.mxu0 %v533_v0  ;;  %v4616_v5 = vld [vmem:[%s6359_s7] sm:$0xff]  ;;  %vm3891_vm2 = vcmask 64512  }
   0xd   : > { %4493 = vmatpush.msra.mxu3 %v4607_v3  ;;  %1280 = vmatpush.msra.mxu1 %v1075_v4  ;;  %v530_v6 = vld [vmem:[%s6354_s2] sm:$0xff]  ;;  %v1074_v13 = vld [vmem:[%s6357_s5 + $0x10] sm:$0xff]  ;;  %v1073_v26 = vld [vmem:[%s6357_s5 + $0x8] sm:$0xff] }
   0xe   : > { %4486 = vmatpush.msra.mxu2 %v532_v1  ;;  %s6469_s14 = smov (!%p449_p3, %s4029_s14), 127  ;;  %744 = vmatpush.msra.mxu0 %v532_v1  ;;  %v1072_v39 = vld [vmem:[%s6357_s5] sm:$0xff]  ;;  %v1071_v52 = vld [vmem:[%s6356_s4 + $0x18] sm:$0xff] }
   0xf   : > { %4494 = vmatpush.msra.mxu3 %v4616_v5  ;;  %s4622_s26 = sshll.u32 %s6469_s14, 3  ;;  %1281 = vmatpush.msra.mxu1 %v1074_v13  ;;  %v4747_v59 = vld [vmem:[%s6355_s3] ss:$0 sm:$0xff] }
  0x10   : > { %4487 = vmatpush.msra.mxu2 %v531_v2  ;;  %745 = vmatpush.msra.mxu0 %v531_v2  ;;  %s4628_s29 = scalar_lea.vmem %s6352_s0, %s4622_s26  ;;  %s4634_s16 = scalar_lea.vmem %s6353_s1, %s4622_s26 }
  0x11   : > { %v514_v7 = vld [vmem:[%s4628_s29 + $0x180] sm:$0xff]  ;;  %v2089_v8 = vld [vmem:[%s4634_s16 + $0x78] sm:$0xff]  ;;  %v515_v10 = vld [vmem:[%s4628_s29 + $0x188] sm:$0xff]  ;;  %1282 = vmatpush.msra.mxu1 %v1073_v26  ;;  %s5974_s22 = scalar_lea.vmem %s6365_s13, %s4622_s26 }
  0x12   : > { %4488 = vmatpush.msra.mxu2 %v530_v6  ;;  %746 = vmatpush.msra.mxu0 %v530_v6  ;;  %v466_v9 = vld [vmem:[%s4628_s29] sm:$0xff]  ;;  %v467_v12 = vld [vmem:[%s4628_s29 + $0x8] sm:$0xff]  ;;  %v516_v14 = vld [vmem:[%s4628_s29 + $0x190] sm:$0xff] }
  0x13   : > { %4083 = vmatmul.msk.f32.vlgmr.msra.gmra.mxu2 %vm538_vm0, %v514_v7  ;;  %4242 = vmatmul.msk.f32.vlgmr.msra.gmra.mxu3 %vm2144_vm1, %v2089_v8  ;;  %v2090_v11 = vld [vmem:[%s4634_s16 + $0x80] sm:$0xff]  ;;  %v2091_v15 = vld [vmem:[%s4634_s16 + $0x88] sm:$0xff]  ;;  %v468_v16 = vld [vmem:[%s4628_s29 + $0x10] sm:$0xff] }
  0x14   : > { %4489 = vmatpush.msrb.mxu2 %v1075_v4  ;;  %4035 = vmatmul.msk.f32.vlgmr.msra.gmra.mxu0 %vm538_vm0, %v466_v9  ;;  %v517_v17 = vld [vmem:[%s4628_s29 + $0x198] sm:$0xff]  ;;  %v2092_v18 = vld [vmem:[%s4634_s16 + $0x90] sm:$0xff]  ;;  %v518_v20 = vld [vmem:[%s4628_s29 + $0x1a0] sm:$0xff] }
  0x15   : > { %v469_v19 = vld [vmem:[%s4628_s29 + $0x18] sm:$0xff]  ;;  %v470_v22 = vld [vmem:[%s4628_s29 + $0x20] sm:$0xff]  ;;  %v519_v23 = vld [vmem:[%s4628_s29 + $0x1a8] sm:$0xff]  ;;  %1283 = vmatpush.msra.mxu1 %v1072_v39 }
  0x16   : > { %4490 = vmatpush.msrb.mxu2 %v1074_v13  ;;  %v2093_v21 = vld [vmem:[%s4634_s16 + $0x98] sm:$0xff]  ;;  %v2094_v24 = vld [vmem:[%s4634_s16 + $0xa0] sm:$0xff]  ;;  %v471_v25 = vld [vmem:[%s4628_s29 + $0x28] sm:$0xff] }
  0x17   : > { %v520_v27 = vld [vmem:[%s4628_s29 + $0x1b0] sm:$0xff]  ;;  %v2095_v28 = vld [vmem:[%s4634_s16 + $0xa8] sm:$0xff]  ;;  %v521_v30 = vld [vmem:[%s4628_s29 + $0x1b8] sm:$0xff] }
  0x18   : > { %4491 = vmatpush.msrb.mxu2 %v1073_v26  ;;  %v472_v29 = vld [vmem:[%s4628_s29 + $0x30] sm:$0xff]  ;;  %v473_v32 = vld [vmem:[%s4628_s29 + $0x38] sm:$0xff]  ;;  %v522_v33 = vld [vmem:[%s4628_s29 + $0x1c0] sm:$0xff] }
  0x19   : > { %v2096_v31 = vld [vmem:[%s4634_s16 + $0xb0] sm:$0xff]  ;;  %v2097_v34 = vld [vmem:[%s4634_s16 + $0xb8] sm:$0xff]  ;;  %v474_v35 = vld [vmem:[%s4628_s29 + $0x40] sm:$0xff] }
  0x1a   : > { %v523_v36 = vld [vmem:[%s4628_s29 + $0x1c8] sm:$0xff]  ;;  %v2098_v37 = vld [vmem:[%s4634_s16 + $0xc0] sm:$0xff]  ;;  %4492 = vmatpush.msrb.mxu2 %v1072_v39  ;;  %v524_v40 = vld [vmem:[%s4628_s29 + $0x1d0] sm:$0xff] }
  0x1b   : > { %4084 = vmatmul.msk.f32.gmra.mxu2 %vm538_vm0, %v515_v10  ;;  %4243 = vmatmul.msk.f32.gmra.mxu3 %vm2144_vm1, %v2090_v11  ;;  %v475_v38 = vld [vmem:[%s4628_s29 + $0x48] sm:$0xff]  ;;  %v476_v42 = vld [vmem:[%s4628_s29 + $0x50] sm:$0xff]  ;;  %v525_v43 = vld [vmem:[%s4628_s29 + $0x1d8] sm:$0xff] }
  0x1c   : > { %4036 = vmatmul.msk.f32.gmra.mxu0 %vm538_vm0, %v467_v12  ;;  %v2099_v41 = vld [vmem:[%s4634_s16 + $0xc8] sm:$0xff]  ;;  %v2100_v44 = vld [vmem:[%s4634_s16 + $0xd0] sm:$0xff]  ;;  %v477_v45 = vld [vmem:[%s4628_s29 + $0x58] sm:$0xff]  ;;  %1681 = vmatpush.msra.mxu2 %v1071_v52 }
  0x1d   : > { %v526_v46 = vld [vmem:[%s4628_s29 + $0x1e0] sm:$0xff]  ;;  %v2101_v47 = vld [vmem:[%s4634_s16 + $0xd8] sm:$0xff]  ;;  %v527_v49 = vld [vmem:[%s4628_s29 + $0x1e8] sm:$0xff] }
  0x1e   : > { %v478_v48 = vld [vmem:[%s4628_s29 + $0x60] sm:$0xff]  ;;  %v479_v51 = vld [vmem:[%s4628_s29 + $0x68] sm:$0xff]  ;;  %v528_v53 = vld [vmem:[%s4628_s29 + $0x1f0] sm:$0xff] }
  0x1f   : > { %v2102_v50 = vld [vmem:[%s4634_s16 + $0xe0] sm:$0xff]  ;;  %v2103_v54 = vld [vmem:[%s4634_s16 + $0xe8] sm:$0xff]  ;;  %v480_v55 = vld [vmem:[%s4628_s29 + $0x70] sm:$0xff] }
  0x20   : > { %v529_v56 = vld [vmem:[%s4628_s29 + $0x1f8] sm:$0xff]  ;;  %v2104_v57 = vld [vmem:[%s4634_s16 + $0xf0] sm:$0xff]  ;;  %v482_v62 = vld [vmem:[%s4628_s29 + $0x80] sm:$0xff] }
  0x21   : > { %v481_v58 = vld [vmem:[%s4628_s29 + $0x78] sm:$0xff]  ;;  %v2106_v6 = vld [vmem:[%s4634_s16 + $0x100] sm:$0xff]  ;;  %v483_v9 = vld [vmem:[%s4628_s29 + $0x88] sm:$0xff] }
  0x22   : > { %v2105_v60 = vld [vmem:[%s4634_s16 + $0xf8] sm:$0xff]  ;;  %v1070_v11 = vld [vmem:[%s6356_s4 + $0x10] sm:$0xff] }
  0x23   : > { %4085 = vmatmul.msk.f32.gmra.mxu2 %vm538_vm0, %v516_v14  ;;  %4244 = vmatmul.msk.f32.gmra.mxu3 %vm2144_vm1, %v2091_v15 }
  0x24   : > { %4037 = vmatmul.msk.f32.gmra.mxu0 %vm538_vm0, %v468_v16  ;;  %1682 = vmatpush.msra.mxu2 %v1070_v11  ;;  %v2107_v16 = vld [vmem:[%s4634_s16 + $0x108] sm:$0xff] }
  0x2b   : > { %4086 = vmatmul.msk.f32.gmra.mxu2 %vm538_vm0, %v517_v17  ;;  %4245 = vmatmul.msk.f32.gmra.mxu3 %vm2144_vm1, %v2092_v18 }
  0x2c   : > { %4038 = vmatmul.msk.f32.gmra.mxu0 %vm538_vm0, %v469_v19  ;;  %v484_v19 = vld [vmem:[%s4628_s29 + $0x90] sm:$0xff] }
  0x33   : > { %4087 = vmatmul.msk.f32.gmra.mxu2 %vm538_vm0, %v518_v20  ;;  %4246 = vmatmul.msk.f32.gmra.mxu3 %vm2144_vm1, %v2093_v21 }
  0x34   : > { %4039 = vmatmul.msk.f32.gmra.mxu0 %vm538_vm0, %v470_v22 }
  0x3b   : > { %4088 = vmatmul.msk.f32.gmra.mxu2 %vm538_vm0, %v519_v23  ;;  %4247 = vmatmul.msk.f32.gmra.mxu3 %vm2144_vm1, %v2094_v24 }
  0x3c   : > { %4040 = vmatmul.msk.f32.gmra.mxu0 %vm538_vm0, %v471_v25  ;;  %v2108_v25 = vld [vmem:[%s4634_s16 + $0x110] sm:$0xff] }
  0x43   : > { %4089 = vmatmul.msk.f32.gmra.mxu2 %vm538_vm0, %v520_v27  ;;  %4248 = vmatmul.msk.f32.gmra.mxu3 %vm2144_vm1, %v2095_v28  ;;  %v485_v28 = vld [vmem:[%s4628_s29 + $0x98] sm:$0xff] }
  0x44   : > { %4041 = vmatmul.msk.f32.gmra.mxu0 %vm538_vm0, %v472_v29 }
  0x4b   : > { %4090 = vmatmul.msk.f32.gmra.mxu2 %vm538_vm0, %v521_v30  ;;  %4249 = vmatmul.msk.f32.gmra.mxu3 %vm2144_vm1, %v2096_v31 }
  0x4c   : > { %4042 = vmatmul.msk.f32.gmra.mxu0 %vm538_vm0, %v473_v32 }
  0x53   : > { %4091 = vmatmul.msk.f32.gmra.mxu2 %vm538_vm0, %v522_v33  ;;  %4250 = vmatmul.msk.f32.gmra.mxu3 %vm2144_vm1, %v2097_v34  ;;  %v2109_v34 = vld [vmem:[%s4634_s16 + $0x118] sm:$0xff] }
  0x54   : > { %4043 = vmatmul.msk.f32.gmra.mxu0 %vm538_vm0, %v474_v35 }
  0x5b   : > { %4092 = vmatmul.msk.f32.gmra.mxu2 %vm538_vm0, %v523_v36  ;;  %4251 = vmatmul.msk.f32.gmra.mxu3 %vm2144_vm1, %v2098_v37  ;;  %v486_v37 = vld [vmem:[%s4628_s29 + $0xa0] sm:$0xff] }
  0x5c   : > { %4044 = vmatmul.msk.f32.gmra.mxu0 %vm538_vm0, %v475_v38 }
  0x63   : > { %4093 = vmatmul.msk.f32.gmra.mxu2 %vm538_vm0, %v524_v40  ;;  %4252 = vmatmul.msk.f32.gmra.mxu3 %vm2144_vm1, %v2099_v41 }
  0x64   : > { %4045 = vmatmul.msk.f32.gmra.mxu0 %vm538_vm0, %v476_v42 }
  0x6b   : > { %4094 = vmatmul.msk.f32.gmra.mxu2 %vm538_vm0, %v525_v43  ;;  %4253 = vmatmul.msk.f32.gmra.mxu3 %vm2144_vm1, %v2100_v44  ;;  %v2110_v43 = vld [vmem:[%s4634_s16 + $0x120] sm:$0xff] }
  0x6c   : > { %4046 = vmatmul.msk.f32.gmra.mxu0 %vm538_vm0, %v477_v45 }
  0x73   : > { %4095 = vmatmul.msk.f32.gmra.mxu2 %vm538_vm0, %v526_v46  ;;  %4254 = vmatmul.msk.f32.gmra.mxu3 %vm2144_vm1, %v2101_v47  ;;  %v487_v46 = vld [vmem:[%s4628_s29 + $0xa8] sm:$0xff] }
  0x74   : > { %4047 = vmatmul.msk.f32.gmra.mxu0 %vm538_vm0, %v478_v48  ;;  %v1069_v48 = vld [vmem:[%s6356_s4 + $0x8] sm:$0xff] }
  0x75   : > { %1683 = vmatpush.msra.mxu2 %v1069_v48  ;;  %v492_v48 = vld [vmem:[%s4628_s29 + $0xd0] sm:$0xff] }
  0x7b   : > { %4096 = vmatmul.msk.f32.gmra.mxu2 %vm538_vm0, %v527_v49  ;;  %4255 = vmatmul.msk.f32.gmra.mxu3 %vm2144_vm1, %v2102_v50 }
  0x7c   : > { %4048 = vmatmul.msk.f32.gmra.mxu0 %vm538_vm0, %v479_v51 }
  0x83   : > { %4097 = vmatmul.msk.f32.gmra.mxu2 %vm538_vm0, %v528_v53  ;;  %4256 = vmatmul.msk.f32.gmra.mxu3 %vm2144_vm1, %v2103_v54  ;;  %v2111_v53 = vld [vmem:[%s4634_s16 + $0x128] sm:$0xff] }
  0x84   : > { %4049 = vmatmul.msk.f32.gmra.mxu0 %vm538_vm0, %v480_v55 }
  0x8b   : > { %4098 = vmatmul.msk.f32.gmra.mxu2 %vm538_vm0, %v529_v56  ;;  %4257 = vmatmul.msk.f32.gmra.mxu3 %vm2144_vm1, %v2104_v57  ;;  %v488_v56 = vld [vmem:[%s4628_s29 + $0xb0] sm:$0xff] }
  0x8c   : > { %4050 = vmatmul.msk.f32.gmra.mxu0 %vm538_vm0, %v481_v58 }
  0x91   : > { %v748_v61 = vpop.f32.mrf.mxu0 }
  0x92   : > { %v4752_v63 = vadd.f32 %v4747_v59, %v748_v61 }
  0x93   : > { %4258 = vmatmul.msk.f32.gmra.mxu3 %vm2144_vm1, %v2105_v60 }
  0x94   : > { %v1004_v0 = vmin.f32 %v4752_v63, 0.0  ;;  %4051 = vmatmul.msk.f32.gmra.mxu0 %vm538_vm0, %v482_v62 }
  0x96   : > { %v892_v1 = vpop.f32.mrf.mxu2  ;;  %v4757_v2 = vpop.f32.mrf.mxu3  ;;  %4099 = vmatmul.msk.f32.vlgmr.msra.gmra.mxu1 %vm538_vm0, %v1004_v0  ;;  %v2112_v0 = vld [vmem:[%s4634_s16 + $0x130] sm:$0xff] }
  0x97   : > { %6366 = vst [vmem:[#allocation2_spill] sm:$0xff] %v4757_v2  ;;  %v4761_v4 = vadd.f32 %v4747_v59, %v892_v1 }
  0x99   : > { %v1052_v7 = vmin.f32 %v4761_v4, 0.0  ;;  %v751_v8 = vpop.f32.mrf.mxu0 }
  0x9a   : > { %v4767_v10 = vadd.f32 %v4747_v59, %v751_v8 }
  0x9b   : > { %4147 = vmatmul.msk.f32.vlgmr.msrb.gmra.mxu2 %vm538_vm0, %v1052_v7  ;;  %4259 = vmatmul.msk.f32.gmra.mxu3 %vm2144_vm1, %v2106_v6  ;;  %v489_v7 = vld [vmem:[%s4628_s29 + $0xb8] sm:$0xff] }
  0x9c   : > { %v1005_v12 = vmin.f32 %v4767_v10, 0.0  ;;  %4052 = vmatmul.msk.f32.gmra.mxu0 %vm538_vm0, %v483_v9 }
  0x9e   : > { %v895_v13 = vpop.f32.mrf.mxu2  ;;  %v4776_v14 = vpop.f32.mrf.mxu3  ;;  %4100 = vmatmul.msk.f32.gmra.mxu1 %vm538_vm0, %v1005_v12 }
  0x9f   : > { %6367 = vst [vmem:[#allocation3_spill] sm:$0xff] %v4776_v14  ;;  %v4780_v15 = vadd.f32 %v4747_v59, %v895_v13 }
  0xa1   : > { %v1053_v17 = vmin.f32 %v4780_v15, 0.0  ;;  %v754_v18 = vpop.f32.mrf.mxu0 }
  0xa2   : > { %v4786_v20 = vadd.f32 %v4747_v59, %v754_v18 }
  0xa3   : > { %4148 = vmatmul.msk.f32.gmra.mxu2 %vm538_vm0, %v1053_v17  ;;  %4260 = vmatmul.msk.f32.gmra.mxu3 %vm2144_vm1, %v2107_v16  ;;  %v2113_v16 = vld [vmem:[%s4634_s16 + $0x138] sm:$0xff] }
  0xa4   : > { %v1006_v21 = vmin.f32 %v4786_v20, 0.0  ;;  %4053 = vmatmul.msk.f32.gmra.mxu0 %vm538_vm0, %v484_v19  ;;  %v490_v19 = vld [vmem:[%s4628_s29 + $0xc0] sm:$0xff] }
  0xa6   : > { %v898_v22 = vpop.f32.mrf.mxu2  ;;  %v4792_v23 = vpop.f32.mrf.mxu3  ;;  %4101 = vmatmul.msk.f32.gmra.mxu1 %vm538_vm0, %v1006_v21 }
  0xa7   : > { %6368 = vst [vmem:[#allocation4_spill] sm:$0xff] %v4792_v23  ;;  %v4796_v24 = vadd.f32 %v4747_v59, %v898_v22 }
  0xa9   : > { %v1054_v26 = vmin.f32 %v4796_v24, 0.0  ;;  %v757_v27 = vpop.f32.mrf.mxu0 }
  0xaa   : > { %v4802_v29 = vadd.f32 %v4747_v59, %v757_v27 }
  0xab   : > { %4149 = vmatmul.msk.f32.gmra.mxu2 %vm538_vm0, %v1054_v26  ;;  %4261 = vmatmul.msk.f32.gmra.mxu3 %vm2144_vm1, %v2108_v25 }
  0xac   : > { %v1007_v30 = vmin.f32 %v4802_v29, 0.0  ;;  %4054 = vmatmul.msk.f32.gmra.mxu0 %vm538_vm0, %v485_v28  ;;  %v2114_v28 = vld [vmem:[%s4634_s16 + $0x140] sm:$0xff] }
  0xae   : > { %v901_v31 = vpop.f32.mrf.mxu2  ;;  %v4808_v32 = vpop.f32.mrf.mxu3  ;;  %4102 = vmatmul.msk.f32.gmra.mxu1 %vm538_vm0, %v1007_v30 }
  0xaf   : > { %6369 = vst [vmem:[#allocation5_spill] sm:$0xff] %v4808_v32  ;;  %v4812_v33 = vadd.f32 %v4747_v59, %v901_v31 }
  0xb1   : > { %v1055_v35 = vmin.f32 %v4812_v33, 0.0  ;;  %v760_v36 = vpop.f32.mrf.mxu0 }
  0xb2   : > { %v4818_v38 = vadd.f32 %v4747_v59, %v760_v36  ;;  %v1068_v36 = vld [vmem:[%s6356_s4] sm:$0xff] }
  0xb3   : > { %4150 = vmatmul.msk.f32.gmra.mxu2 %vm538_vm0, %v1055_v35  ;;  %4262 = vmatmul.msk.f32.gmra.mxu3 %vm2144_vm1, %v2109_v34  ;;  %v491_v34 = vld [vmem:[%s4628_s29 + $0xc8] sm:$0xff] }
  0xb4   : > { %v1008_v39 = vmin.f32 %v4818_v38, 0.0  ;;  %4055 = vmatmul.msk.f32.gmra.mxu0 %vm538_vm0, %v486_v37  ;;  %1684 = vmatpush.msra.mxu2 %v1068_v36  ;;  %v495_v36 = vld [vmem:[%s4628_s29 + $0xe8] sm:$0xff] }
  0xb6   : > { %v904_v40 = vpop.f32.mrf.mxu2  ;;  %v4824_v41 = vpop.f32.mrf.mxu3  ;;  %4103 = vmatmul.msk.f32.gmra.mxu1 %vm538_vm0, %v1008_v39  ;;  %2351 = vmatpush.msrb.mxu2 %v4607_v3 }
  0xb7   : > { %6370 = vst [vmem:[#allocation6_spill] sm:$0xff] %v4824_v41  ;;  %v4828_v42 = vadd.f32 %v4747_v59, %v904_v40 }
  0xb8   : > { %2352 = vmatpush.msrb.mxu2 %v4616_v5 }
  0xb9   : > { %v1056_v44 = vmin.f32 %v4828_v42, 0.0  ;;  %v763_v45 = vpop.f32.mrf.mxu0 }
  0xba   : > { %v4834_v47 = vadd.f32 %v4747_v59, %v763_v45 }
  0xbb   : > { %4151 = vmatmul.msk.f32.gmra.mxu2 %vm538_vm0, %v1056_v44  ;;  %4263 = vmatmul.msk.f32.gmra.mxu3 %vm2144_vm1, %v2110_v43  ;;  %v2115_v44 = vld [vmem:[%s4634_s16 + $0x148] sm:$0xff] }
  0xbc   : > { %v1009_v49 = vmin.f32 %v4834_v47, 0.0  ;;  %4056 = vmatmul.msk.f32.gmra.mxu0 %vm538_vm0, %v487_v46 }
  0xbe   : > { %v907_v50 = vpop.f32.mrf.mxu2  ;;  %v4843_v51 = vpop.f32.mrf.mxu3  ;;  %4104 = vmatmul.msk.f32.gmra.mxu1 %vm538_vm0, %v1009_v49 }
  0xbf   : > { %6371 = vst [vmem:[#allocation7_spill] sm:$0xff] %v4843_v51  ;;  %v4847_v52 = vadd.f32 %v4747_v59, %v907_v50 }
  0xc1   : > { %v1057_v54 = vmin.f32 %v4847_v52, 0.0  ;;  %v766_v55 = vpop.f32.mrf.mxu0 }
  0xc2   : > { %v4853_v57 = vadd.f32 %v4747_v59, %v766_v55 }
  0xc3   : > { %4152 = vmatmul.msk.f32.gmra.mxu2 %vm538_vm0, %v1057_v54  ;;  %4264 = vmatmul.msk.f32.gmra.mxu3 %vm2144_vm1, %v2111_v53  ;;  %v2116_v54 = vld [vmem:[%s4634_s16 + $0x150] sm:$0xff] }
  0xc4   : > { %v1010_v58 = vmin.f32 %v4853_v57, 0.0  ;;  %4057 = vmatmul.msk.f32.gmra.mxu0 %vm538_vm0, %v488_v56 }
  0xc6   : > { %v910_v60 = vpop.f32.mrf.mxu2  ;;  %v4859_v61 = vpop.f32.mrf.mxu3  ;;  %4105 = vmatmul.msk.f32.gmra.mxu1 %vm538_vm0, %v1010_v58  ;;  %v493_v58 = vld [vmem:[%s4628_s29 + $0xd8] sm:$0xff] }
  0xc7   : > { %6372 = vst [vmem:[#allocation8_spill] sm:$0xff] %v4859_v61  ;;  %v4863_v62 = vadd.f32 %v4747_v59, %v910_v60 }
  0xc9   : > { %v1058_v1 = vmin.f32 %v4863_v62, 0.0  ;;  %v769_v6 = vpop.f32.mrf.mxu0 }
  0xca   : > { %v4869_v8 = vadd.f32 %v4747_v59, %v769_v6 }
  0xcb   : > { %4153 = vmatmul.msk.f32.gmra.mxu2 %vm538_vm0, %v1058_v1  ;;  %4265 = vmatmul.msk.f32.gmra.mxu3 %vm2144_vm1, %v2112_v0 }
  0xcc   : > { %v1011_v9 = vmin.f32 %v4869_v8, 0.0  ;;  %4058 = vmatmul.msk.f32.gmra.mxu0 %vm538_vm0, %v489_v7 }
  0xce   : > { %v913_v11 = vpop.f32.mrf.mxu2  ;;  %v4875_v12 = vpop.f32.mrf.mxu3  ;;  %4106 = vmatmul.msk.f32.gmra.mxu1 %vm538_vm0, %v1011_v9  ;;  %v2117_v9 = vld [vmem:[%s4634_s16 + $0x158] sm:$0xff] }
  0xcf   : > { %6373 = vst [vmem:[#allocation9_spill] sm:$0xff] %v4875_v12  ;;  %v4879_v13 = vadd.f32 %v4747_v59, %v913_v11 }
  0xd1   : > { %v1059_v17 = vmin.f32 %v4879_v13, 0.0  ;;  %v772_v18 = vpop.f32.mrf.mxu0 }
  0xd2   : > { %v4885_v21 = vadd.f32 %v4747_v59, %v772_v18 }
  0xd3   : > { %4154 = vmatmul.msk.f32.gmra.mxu2 %vm538_vm0, %v1059_v17  ;;  %4266 = vmatmul.msk.f32.gmra.mxu3 %vm2144_vm1, %v2113_v16  ;;  %v494_v17 = vld [vmem:[%s4628_s29 + $0xe0] sm:$0xff] }
  0xd4   : > { %v1012_v22 = vmin.f32 %v4885_v21, 0.0  ;;  %4059 = vmatmul.msk.f32.gmra.mxu0 %vm538_vm0, %v490_v19 }
  0xd6   : > { %v916_v25 = vpop.f32.mrf.mxu2  ;;  %v4891_v26 = vpop.f32.mrf.mxu3  ;;  %4107 = vmatmul.msk.f32.gmra.mxu1 %vm538_vm0, %v1012_v22 }
  0xd7   : > { %6374 = vst [vmem:[#allocation10_spill] sm:$0xff] %v4891_v26  ;;  %v4895_v27 = vadd.f32 %v4747_v59, %v916_v25  ;;  %v2135_v26 = vld [vmem:[%s4634_s16 + $0x1e8] sm:$0xff] }
  0xd9   : > { %v1060_v30 = vmin.f32 %v4895_v27, 0.0  ;;  %v775_v31 = vpop.f32.mrf.mxu0 }
  0xda   : > { %v4901_v35 = vadd.f32 %v4747_v59, %v775_v31 }
  0xdb   : > { %4155 = vmatmul.msk.f32.gmra.mxu2 %vm538_vm0, %v1060_v30  ;;  %4267 = vmatmul.msk.f32.gmra.mxu3 %vm2144_vm1, %v2114_v28  ;;  %v2118_v30 = vld [vmem:[%s4634_s16 + $0x160] sm:$0xff] }
  0xdc   : > { %v1013_v37 = vmin.f32 %v4901_v35, 0.0  ;;  %4060 = vmatmul.msk.f32.gmra.mxu0 %vm538_vm0, %v491_v34 }
  0xde   : > { %v919_v39 = vpop.f32.mrf.mxu2  ;;  %v4911_v40 = vpop.f32.mrf.mxu3  ;;  %4108 = vmatmul.msk.f32.gmra.mxu1 %vm538_vm0, %v1013_v37 }
  0xdf   : > { %6375 = vst [vmem:[#allocation11_spill] sm:$0xff] %v4911_v40  ;;  %v4915_v43 = vadd.f32 %v4747_v59, %v919_v39 }
  0xe1   : > { %v1061_v45 = vmin.f32 %v4915_v43, 0.0  ;;  %v778_v46 = vpop.f32.mrf.mxu0 }
  0xe2   : > { %v4922_v49 = vadd.f32 %v4747_v59, %v778_v46 }
  0xe3   : > { %4156 = vmatmul.msk.f32.gmra.mxu2 %vm538_vm0, %v1061_v45  ;;  %4268 = vmatmul.msk.f32.gmra.mxu3 %vm2144_vm1, %v2115_v44 }
  0xe4   : > { %v1014_v3 = vmin.f32 %v4922_v49, 0.0  ;;  %4061 = vmatmul.msk.f32.gmra.mxu0 %vm538_vm0, %v492_v48  ;;  %v2119_v48 = vld [vmem:[%s4634_s16 + $0x168] sm:$0xff] }
  0xe6   : > { %v922_v50 = vpop.f32.mrf.mxu2  ;;  %v4928_v53 = vpop.f32.mrf.mxu3  ;;  %4109 = vmatmul.msk.f32.gmra.mxu1 %vm538_vm0, %v1014_v3 }
  0xe7   : > { %6376 = vst [vmem:[#allocation12_spill] sm:$0xff] %v4928_v53  ;;  %v4932_v5 = vadd.f32 %v4747_v59, %v922_v50  ;;  %v510_v53 = vld [vmem:[%s4628_s29 + $0x160] sm:$0xff] }
  0xe9   : > { %v1062_v55 = vmin.f32 %v4932_v5, 0.0  ;;  %v781_v56 = vpop.f32.mrf.mxu0 }
  0xea   : > { %v4938_v60 = vadd.f32 %v4747_v59, %v781_v56 }
  0xeb   : > { %4157 = vmatmul.msk.f32.gmra.mxu2 %vm538_vm0, %v1062_v55  ;;  %4269 = vmatmul.msk.f32.gmra.mxu3 %vm2144_vm1, %v2116_v54  ;;  %v496_v54 = vld [vmem:[%s4628_s29 + $0xf0] sm:$0xff] }
  0xec   : > { %v1015_v0 = vmin.f32 %v4938_v60, 0.0  ;;  %4062 = vmatmul.msk.f32.gmra.mxu0 %vm538_vm0, %v493_v58 }
  0xee   : > { %v925_v1 = vpop.f32.mrf.mxu2  ;;  %v4944_v6 = vpop.f32.mrf.mxu3  ;;  %4110 = vmatmul.msk.f32.gmra.mxu1 %vm538_vm0, %v1015_v0 }
  0xef   : > { %6377 = vst [vmem:[#allocation13_spill] sm:$0xff] %v4944_v6  ;;  %v4948_v7 = vadd.f32 %v4747_v59, %v925_v1 }
  0xf1   : > { %v1063_v11 = vmin.f32 %v4948_v7, 0.0  ;;  %v784_v16 = vpop.f32.mrf.mxu0 }
  0xf2   : > { %v4954_v18 = vadd.f32 %v4747_v59, %v784_v16 }
  0xf3   : > { %4158 = vmatmul.msk.f32.gmra.mxu2 %vm538_vm0, %v1063_v11  ;;  %4270 = vmatmul.msk.f32.gmra.mxu3 %vm2144_vm1, %v2117_v9  ;;  %v2120_v9 = vld [vmem:[%s4634_s16 + $0x170] sm:$0xff] }
  0xf4   : > { %v1016_v19 = vmin.f32 %v4954_v18, 0.0  ;;  %4063 = vmatmul.msk.f32.gmra.mxu0 %vm538_vm0, %v494_v17  ;;  %v497_v17 = vld [vmem:[%s4628_s29 + $0xf8] sm:$0xff] }
  0xf6   : > { %v928_v22 = vpop.f32.mrf.mxu2  ;;  %v4960_v25 = vpop.f32.mrf.mxu3  ;;  %4111 = vmatmul.msk.f32.gmra.mxu1 %vm538_vm0, %v1016_v19 }
  0xf7   : > { %6378 = vst [vmem:[#allocation14_spill] sm:$0xff] %v4960_v25  ;;  %v4964_v28 = vadd.f32 %v4747_v59, %v928_v22 }
  0xf9   : > { %v1064_v31 = vmin.f32 %v4964_v28, 0.0  ;;  %v787_v34 = vpop.f32.mrf.mxu0 }
  0xfa   : > { %v4970_v37 = vadd.f32 %v4747_v59, %v787_v34 }
  0xfb   : > { %4159 = vmatmul.msk.f32.gmra.mxu2 %vm538_vm0, %v1064_v31  ;;  %4271 = vmatmul.msk.f32.gmra.mxu3 %vm2144_vm1, %v2118_v30 }
  0xfc   : > { %v1017_v39 = vmin.f32 %v4970_v37, 0.0  ;;  %4064 = vmatmul.msk.f32.gmra.mxu0 %vm538_vm0, %v495_v36  ;;  %v2121_v36 = vld [vmem:[%s4634_s16 + $0x178] sm:$0xff] }
  0xfe   : > { %v931_v44 = vpop.f32.mrf.mxu2  ;;  %v4976_v45 = vpop.f32.mrf.mxu3  ;;  %4112 = vmatmul.msk.f32.gmra.mxu1 %vm538_vm0, %v1017_v39 }
  0xff   : > { %6379 = vst [vmem:[#allocation15_spill] sm:$0xff] %v4976_v45  ;;  %v4980_v46 = vadd.f32 %v4747_v59, %v931_v44 }
 0x101   : > { %v1065_v3 = vmin.f32 %v4980_v46, 0.0  ;;  %v790_v50 = vpop.f32.mrf.mxu0 }
 0x102   : > { %v4986_v55 = vadd.f32 %v4747_v59, %v790_v50 }
 0x103   : > { %4160 = vmatmul.msk.f32.gmra.mxu2 %vm538_vm0, %v1065_v3  ;;  %4272 = vmatmul.msk.f32.gmra.mxu3 %vm2144_vm1, %v2119_v48  ;;  %v498_v48 = vld [vmem:[%s4628_s29 + $0x100] sm:$0xff] }
 0x104   : > { %v1018_v56 = vmin.f32 %v4986_v55, 0.0  ;;  %4065 = vmatmul.msk.f32.gmra.mxu0 %vm538_vm0, %v496_v54 }
 0x106   : > { %v934_v58 = vpop.f32.mrf.mxu2  ;;  %v4992_v0 = vpop.f32.mrf.mxu3  ;;  %4113 = vmatmul.msk.f32.gmra.mxu1 %vm538_vm0, %v1018_v56  ;;  %v940_v56 = vmax.f32 %v4752_v63, 0.0  ;;  %v941_v63 = vmax.f32 %v4767_v10, 0.0  ;;  %v942_v10 = vmax.f32 %v4786_v20, 0.0  ;;  %v943_v20 = vmax.f32 %v4802_v29, 0.0 }
 0x107   : > { %6380 = vst [vmem:[#allocation16_spill] sm:$0xff] %v4992_v0  ;;  %v4996_v1 = vadd.f32 %v4747_v59, %v934_v58  ;;  %v2122_v58 = vld [vmem:[%s4634_s16 + $0x180] sm:$0xff]  ;;  %v944_v29 = vmax.f32 %v4818_v38, 0.0  ;;  %v945_v38 = vmax.f32 %v4834_v47, 0.0  ;;  %v946_v47 = vmax.f32 %v4853_v57, 0.0 }
 0x108   : > { %v947_v57 = vmax.f32 %v4869_v8, 0.0  ;;  %v506_v0 = vld [vmem:[%s4628_s29 + $0x140] sm:$0xff]  ;;  %v507_v8 = vld [vmem:[%s4628_s29 + $0x148] sm:$0xff] }
 0x109   : > { %v1066_v11 = vmin.f32 %v4996_v1, 0.0  ;;  %v793_v16 = vpop.f32.mrf.mxu0 }
 0x10a   : > { %v5002_v19 = vadd.f32 %v4747_v59, %v793_v16 }
 0x10b   : > { %4161 = vmatmul.msk.f32.gmra.mxu2 %vm538_vm0, %v1066_v11  ;;  %4273 = vmatmul.msk.f32.gmra.mxu3 %vm2144_vm1, %v2120_v9  ;;  %v499_v11 = vld [vmem:[%s4628_s29 + $0x108] sm:$0xff] }
 0x10c   : > { %v1019_v22 = vmin.f32 %v5002_v19, 0.0  ;;  %4066 = vmatmul.msk.f32.gmra.mxu0 %vm538_vm0, %v497_v17 }
 0x10e   : > { %v937_v30 = vpop.f32.mrf.mxu2  ;;  %v5008_v31 = vpop.f32.mrf.mxu3  ;;  %4114 = vmatmul.msk.f32.gmra.mxu1 %vm538_vm0, %v1019_v22 }
 0x10f   : > { %6381 = vst [vmem:[#allocation17_spill] sm:$0xff] %v5008_v31  ;;  %v5012_v34 = vadd.f32 %v4747_v59, %v937_v30  ;;  %v505_v31 = vld [vmem:[%s4628_s29 + $0x138] sm:$0xff] }
 0x111   : > { %v1067_v39 = vmin.f32 %v5012_v34, 0.0  ;;  %v796_v44 = vpop.f32.mrf.mxu0 }
 0x112   : > { %v5018_v3 = vadd.f32 %v4747_v59, %v796_v44  ;;  %v500_v44 = vld [vmem:[%s4628_s29 + $0x110] sm:$0xff] }
 0x113   : > { %4162 = vmatmul.msk.f32.gmra.mxu2 %vm538_vm0, %v1067_v39  ;;  %4274 = vmatmul.msk.f32.gmra.mxu3 %vm2144_vm1, %v2121_v36  ;;  %v2123_v36 = vld [vmem:[%s4634_s16 + $0x188] sm:$0xff] }
 0x114   : > { %v1020_v50 = vmin.f32 %v5018_v3, 0.0  ;;  %4067 = vmatmul.msk.f32.gmra.mxu0 %vm538_vm0, %v498_v48 }
 0x116   : > { %v5024_v54 = vpop.f32.mrf.mxu3  ;;  %4115 = vmatmul.msk.f32.gmra.mxu1 %vm538_vm0, %v1020_v50 }
 0x117   : > { %6382 = vst [vmem:[#allocation18_spill] sm:$0xff] %v5024_v54  ;;  %v504_v54 = vld [vmem:[%s4628_s29 + $0x130] sm:$0xff] }
 0x119   : > { %v799_v9 = vpop.f32.mrf.mxu0 }
 0x11a   : > { %v5031_v16 = vadd.f32 %v4747_v59, %v799_v9  ;;  %v2124_v9 = vld [vmem:[%s4634_s16 + $0x190] sm:$0xff] }
 0x11b   : > { %4163 = vmatmul.msk.f32.vlgmr.msra.gmra.mxu2 %vm538_vm0, %v940_v56  ;;  %4275 = vmatmul.msk.f32.gmra.mxu3 %vm2144_vm1, %v2122_v58 }
 0x11c   : > { %v1021_v17 = vmin.f32 %v5031_v16, 0.0  ;;  %4068 = vmatmul.msk.f32.gmra.mxu0 %vm538_vm0, %v499_v11 }
 0x11e   : > { %v5037_v22 = vpop.f32.mrf.mxu2  ;;  %v5039_v30 = vpop.f32.mrf.mxu3  ;;  %4116 = vmatmul.msk.f32.gmra.mxu1 %vm538_vm0, %v1021_v17  ;;  %v501_v17 = vld [vmem:[%s4628_s29 + $0x118] sm:$0xff] }
 0x11f   : > { %6383 = vst [vmem:[#allocation19_spill] sm:$0xff] %v5039_v30  ;;  %v503_v30 = vld [vmem:[%s4628_s29 + $0x128] sm:$0xff] }
 0x121   : > { %v802_v39 = vpop.f32.mrf.mxu0 }
 0x122   : > { %v5046_v48 = vadd.f32 %v4747_v59, %v802_v39 }
 0x123   : > { %4164 = vmatmul.msk.f32.gmra.mxu2 %vm538_vm0, %v941_v63  ;;  %4276 = vmatmul.msk.f32.gmra.mxu3 %vm2144_vm1, %v2123_v36 }
 0x124   : > { %v1022_v50 = vmin.f32 %v5046_v48, 0.0  ;;  %4069 = vmatmul.msk.f32.gmra.mxu0 %vm538_vm0, %v500_v44 }
 0x126   : > { %v5052_v56 = vpop.f32.mrf.mxu2  ;;  %v5054_v58 = vpop.f32.mrf.mxu3  ;;  %4117 = vmatmul.msk.f32.gmra.mxu1 %vm538_vm0, %v1022_v50  ;;  %v2125_v50 = vld [vmem:[%s4634_s16 + $0x198] sm:$0xff] }
 0x127   : > { %6384 = vst [vmem:[#allocation20_spill] sm:$0xff] %v5054_v58  ;;  %v502_v58 = vld [vmem:[%s4628_s29 + $0x120] sm:$0xff] }
 0x129   : > { %v805_v11 = vpop.f32.mrf.mxu0 }
 0x12a   : > { %v5061_v63 = vadd.f32 %v4747_v59, %v805_v11 }
 0x12b   : > { %4165 = vmatmul.msk.f32.gmra.mxu2 %vm538_vm0, %v942_v10  ;;  %4277 = vmatmul.msk.f32.gmra.mxu3 %vm2144_vm1, %v2124_v9 }
 0x12c   : > { %v1023_v36 = vmin.f32 %v5061_v63, 0.0  ;;  %4070 = vmatmul.msk.f32.gmra.mxu0 %vm538_vm0, %v501_v17 }
 0x12e   : > { %v5067_v39 = vpop.f32.mrf.mxu2  ;;  %v5069_v44 = vpop.f32.mrf.mxu3  ;;  %4118 = vmatmul.msk.f32.gmra.mxu1 %vm538_vm0, %v1023_v36 }
 0x12f   : > { %6385 = vst [vmem:[#allocation21_spill] sm:$0xff] %v5069_v44 }
 0x131   : > { %v808_v11 = vpop.f32.mrf.mxu0 }
 0x132   : > { %v5076_v10 = vadd.f32 %v4747_v59, %v808_v11  ;;  %v2126_v11 = vld [vmem:[%s4634_s16 + $0x1a0] sm:$0xff] }
 0x133   : > { %4166 = vmatmul.msk.f32.gmra.mxu2 %vm538_vm0, %v943_v20  ;;  %4278 = vmatmul.msk.f32.gmra.mxu3 %vm2144_vm1, %v2125_v50 }
 0x134   : > { %v1024_v9 = vmin.f32 %v5076_v10, 0.0  ;;  %4071 = vmatmul.msk.f32.gmra.mxu0 %vm538_vm0, %v502_v58 }
 0x136   : > { %v5082_v17 = vpop.f32.mrf.mxu2  ;;  %v5084_v36 = vpop.f32.mrf.mxu3  ;;  %4119 = vmatmul.msk.f32.gmra.mxu1 %vm538_vm0, %v1024_v9 }
 0x137   : > { %6386 = vst [vmem:[#allocation22_spill] sm:$0xff] %v5084_v36 }
 0x139   : > { %v811_v44 = vpop.f32.mrf.mxu0 }
 0x13a   : > { %v5091_v20 = vadd.f32 %v4747_v59, %v811_v44  ;;  %v2127_v44 = vld [vmem:[%s4634_s16 + $0x1a8] sm:$0xff] }
 0x13b   : > { %4167 = vmatmul.msk.f32.gmra.mxu2 %vm538_vm0, %v944_v29  ;;  %4279 = vmatmul.msk.f32.gmra.mxu3 %vm2144_vm1, %v2126_v11 }
 0x13c   : > { %v1025_v58 = vmin.f32 %v5091_v20, 0.0  ;;  %4072 = vmatmul.msk.f32.gmra.mxu0 %vm538_vm0, %v503_v30 }
 0x13e   : > { %v5097_v50 = vpop.f32.mrf.mxu2  ;;  %v5099_v9 = vpop.f32.mrf.mxu3  ;;  %4120 = vmatmul.msk.f32.gmra.mxu1 %vm538_vm0, %v1025_v58 }
 0x13f   : > { %6387 = vst [vmem:[#allocation23_spill] sm:$0xff] %v5099_v9 }
 0x141   : > { %v814_v36 = vpop.f32.mrf.mxu0 }
 0x142   : > { %v5106_v29 = vadd.f32 %v4747_v59, %v814_v36  ;;  %v2128_v36 = vld [vmem:[%s4634_s16 + $0x1b0] sm:$0xff] }
 0x143   : > { %4168 = vmatmul.msk.f32.gmra.mxu2 %vm538_vm0, %v945_v38  ;;  %4280 = vmatmul.msk.f32.gmra.mxu3 %vm2144_vm1, %v2127_v44 }
 0x144   : > { %v1026_v30 = vmin.f32 %v5106_v29, 0.0  ;;  %4073 = vmatmul.msk.f32.gmra.mxu0 %vm538_vm0, %v504_v54 }
 0x146   : > { %v5112_v11 = vpop.f32.mrf.mxu2  ;;  %v5114_v58 = vpop.f32.mrf.mxu3  ;;  %4121 = vmatmul.msk.f32.gmra.mxu1 %vm538_vm0, %v1026_v30 }
 0x147   : > { %6388 = vst [vmem:[#allocation24_spill] sm:$0xff] %v5114_v58 }
 0x149   : > { %v817_v9 = vpop.f32.mrf.mxu0 }
 0x14a   : > { %v5121_v38 = vadd.f32 %v4747_v59, %v817_v9  ;;  %v2129_v9 = vld [vmem:[%s4634_s16 + $0x1b8] sm:$0xff] }
 0x14b   : > { %4169 = vmatmul.msk.f32.gmra.mxu2 %vm538_vm0, %v946_v47  ;;  %4281 = vmatmul.msk.f32.gmra.mxu3 %vm2144_vm1, %v2128_v36  ;;  %v948_v36 = vmax.f32 %v4885_v21, 0.0  ;;  %v508_v21 = vld [vmem:[%s4628_s29 + $0x150] sm:$0xff] }
 0x14c   : > { %v1027_v54 = vmin.f32 %v5121_v38, 0.0  ;;  %4074 = vmatmul.msk.f32.gmra.mxu0 %vm538_vm0, %v505_v31 }
 0x14e   : > { %v5127_v44 = vpop.f32.mrf.mxu2  ;;  %v5129_v30 = vpop.f32.mrf.mxu3  ;;  %4122 = vmatmul.msk.f32.gmra.mxu1 %vm538_vm0, %v1027_v54  ;;  %v2130_v54 = vld [vmem:[%s4634_s16 + $0x1c0] sm:$0xff] }
 0x14f   : > { %6389 = vst [vmem:[#allocation25_spill] sm:$0xff] %v5129_v30 }
 0x151   : > { %v820_v58 = vpop.f32.mrf.mxu0 }
 0x153   : > { %4170 = vmatmul.msk.f32.gmra.mxu2 %vm538_vm0, %v947_v57  ;;  %4282 = vmatmul.msk.f32.gmra.mxu3 %vm2144_vm1, %v2129_v9  ;;  %v949_v9 = vmax.f32 %v4901_v35, 0.0  ;;  %v509_v35 = vld [vmem:[%s4628_s29 + $0x158] sm:$0xff] }
 0x154   : > { %4075 = vmatmul.msk.f32.gmra.mxu0 %vm538_vm0, %v506_v0 }
 0x156   : > { %v5138_v31 = vpop.f32.mrf.mxu2  ;;  %v5140_v47 = vpop.f32.mrf.mxu3 }
 0x157   : > { %6390 = vst [vmem:[#allocation26_spill] sm:$0xff] %v5140_v47  ;;  %v2131_v47 = vld [vmem:[%s4634_s16 + $0x1c8] sm:$0xff] }
 0x159   : > { %v823_v30 = vpop.f32.mrf.mxu0 }
 0x15a   : > { %v5196_v40 = vadd.f32 %v4747_v59, %v823_v30  ;;  %v2549_v30 = vld [vmem:[%s6361_s9 + $0x18] sm:$0xff] }
 0x15b   : > { %4171 = vmatmul.msk.f32.gmra.mxu2 %vm538_vm0, %v948_v36  ;;  %4283 = vmatmul.msk.f32.gmra.mxu3 %vm2144_vm1, %v2130_v54 }
 0x15c   : > { %4076 = vmatmul.msk.f32.gmra.mxu0 %vm538_vm0, %v507_v8  ;;  %v950_v8 = vmax.f32 %v4922_v49, 0.0  ;;  %v2133_v49 = vld [vmem:[%s4634_s16 + $0x1d8] sm:$0xff] }
 0x15d   : > { %3159 = vmatpush.msrb.mxu0 %v2549_v30  ;;  %v512_v30 = vld [vmem:[%s4628_s29 + $0x170] sm:$0xff] }
 0x15e   : > { %v5148_v57 = vpop.f32.mrf.mxu2  ;;  %v5150_v0 = vpop.f32.mrf.mxu3 }
 0x15f   : > { %6391 = vst [vmem:[#allocation27_spill] sm:$0xff] %v5150_v0  ;;  %v2132_v0 = vld [vmem:[%s4634_s16 + $0x1d0] sm:$0xff] }
 0x161   : > { %v826_v45 = vpop.f32.mrf.mxu0 }
 0x162   : > { %v5226_v61 = vadd.f32 %v4747_v59, %v826_v45  ;;  %v2550_v45 = vld [vmem:[%s6362_s10] sm:$0xff] }
 0x163   : > { %4172 = vmatmul.msk.f32.gmra.mxu2 %vm538_vm0, %v949_v9  ;;  %4284 = vmatmul.msk.f32.gmra.mxu3 %vm2144_vm1, %v2131_v47 }
 0x164   : > { %4077 = vmatmul.msk.f32.gmra.mxu0 %vm538_vm0, %v508_v21  ;;  %v951_v21 = vmax.f32 %v4938_v60, 0.0  ;;  %v952_v60 = vmax.f32 %v4954_v18, 0.0  ;;  %v2553_v18 = vld [vmem:[%s6362_s10 + $0x18] sm:$0xff] }
 0x165   : > { %2758 = vmatpush.msrb.mxu3 %v2553_v18 }
 0x166   : > { %v5158_v36 = vpop.f32.mrf.mxu2  ;;  %v5160_v54 = vpop.f32.mrf.mxu3 }
 0x167   : > { %6392 = vst [vmem:[#allocation28_spill] sm:$0xff] %v5160_v54  ;;  %v5176_v54 = vadd.f32 %v4747_v59, %v820_v58  ;;  %v5191_v58 = vpop.f32.mrf.mxu1 }
 0x169   : > { %v5164_v25 = vpop.f32.mrf.mxu0 }
 0x16a   : > { %v5256_v51 = vadd.f32 %v4747_v59, %v5164_v25  ;;  %v2137_v25 = vld [vmem:[%s4634_s16 + $0x1f8] sm:$0xff] }
 0x16b   : > { %4173 = vmatmul.msk.f32.gmra.mxu2 %vm538_vm0, %v950_v8  ;;  %4285 = vmatmul.msk.f32.gmra.mxu3 %vm2144_vm1, %v2132_v0  ;;  %v1028_v8 = vmin.f32 %v5176_v54, 0.0 }
 0x16c   : > { %4078 = vmatmul.msk.f32.gmra.mxu0 %vm538_vm0, %v509_v35 }
 0x16d   : > { %4123 = vmatmul.msk.f32.gmra.mxu1 %vm538_vm0, %v1028_v8 }
 0x16e   : > { %v5170_v47 = vpop.f32.mrf.mxu2  ;;  %v5172_v9 = vpop.f32.mrf.mxu3 }
 0x16f   : > { %6393 = vst [vmem:[#allocation29_spill] sm:$0xff] %v5172_v9  ;;  %v2134_v9 = vld [vmem:[%s4634_s16 + $0x1e0] sm:$0xff]  ;;  %v5223_v12 = vpop.f32.mrf.mxu1 }
 0x171   : > { %v5179_v6 = vpop.f32.mrf.mxu0 }
 0x173   : > { %4174 = vmatmul.msk.f32.gmra.mxu2 %vm538_vm0, %v951_v21  ;;  %4286 = vmatmul.msk.f32.gmra.mxu3 %vm2144_vm1, %v2133_v49  ;;  %v511_v49 = vld [vmem:[%s4628_s29 + $0x168] sm:$0xff] }
 0x174   : > { %4079 = vmatmul.msk.f32.gmra.mxu0 %vm538_vm0, %v510_v53  ;;  %v1029_v53 = vmin.f32 %v5196_v40, 0.0 }
 0x176   : > { %v5186_v0 = vpop.f32.mrf.mxu2  ;;  %v5188_v35 = vpop.f32.mrf.mxu3  ;;  %4124 = vmatmul.msk.f32.gmra.mxu1 %vm538_vm0, %v1029_v53  ;;  %v1030_v53 = vmin.f32 %v5226_v61, 0.0 }
 0x177   : > { %6394 = vst [vmem:[#allocation30_spill] sm:$0xff] %v5188_v35 }
 0x179   : > { %v5198_v21 = vpop.f32.mrf.mxu0 }
 0x17b   : > { %4175 = vmatmul.msk.f32.gmra.mxu2 %vm538_vm0, %v952_v60  ;;  %4287 = vmatmul.msk.f32.gmra.mxu3 %vm2144_vm1, %v2134_v9  ;;  %v953_v9 = vmax.f32 %v4970_v37, 0.0  ;;  %v2552_v60 = vld [vmem:[%s6362_s10 + $0x10] sm:$0xff]  ;;  %v2551_v37 = vld [vmem:[%s6362_s10 + $0x8] sm:$0xff] }
 0x17c   : > { %4080 = vmatmul.msk.f32.gmra.mxu0 %vm538_vm0, %v511_v49  ;;  %v2548_v49 = vld [vmem:[%s6361_s9 + $0x10] sm:$0xff]  ;;  %2759 = vmatpush.msrb.mxu3 %v2552_v60  ;;  %v2546_v60 = vld [vmem:[%s6361_s9] sm:$0xff] }
 0x17d   : > { %3160 = vmatpush.msrb.mxu0 %v2548_v49  ;;  %v2136_v49 = vld [vmem:[%s4634_s16 + $0x1f0] sm:$0xff] }
 0x17e   : > { %v5211_v8 = vpop.f32.mrf.mxu2  ;;  %v5213_v35 = vpop.f32.mrf.mxu3  ;;  %2760 = vmatpush.msrb.mxu3 %v2551_v37 }
 0x17f   : > { %6395 = vst [vmem:[#allocation31_spill] sm:$0xff] %v5211_v8  ;;  %v5252_v37 = vpop.f32.mrf.mxu1  ;;  %4125 = vmatmul.msk.f32.gmra.mxu1 %vm538_vm0, %v1030_v53  ;;  %v5274_v53 = vadd.f32 %v4747_v59, %v5179_v6  ;;  %v5289_v6 = vadd.f32 %v4747_v59, %v5198_v21 }
 0x180   : > { %6396 = vst [vmem:[#allocation32_spill] sm:$0xff] %v5213_v35  ;;  %v2547_v35 = vld [vmem:[%s6361_s9 + $0x8] sm:$0xff]  ;;  %2761 = vmatpush.msrb.mxu3 %v2550_v45  ;;  %v1031_v45 = vmin.f32 %v5256_v51, 0.0 }
 0x181   : > { %v838_v18 = vpop.f32.mrf.mxu0  ;;  %3161 = vmatpush.msrb.mxu0 %v2547_v35 }
 0x183   : > { %4176 = vmatmul.msk.f32.gmra.mxu2 %vm538_vm0, %v953_v9  ;;  %4288 = vmatmul.msk.f32.gmra.mxu3 %vm2144_vm1, %v2135_v26  ;;  %v954_v26 = vmax.f32 %v4986_v55, 0.0 }
 0x184   : > { %4081 = vmatmul.msk.f32.gmra.mxu0 %vm538_vm0, %v512_v30  ;;  %v513_v30 = vld [vmem:[%s4628_s29 + $0x178] sm:$0xff] }
 0x185   : > { %3162 = vmatpush.msrb.mxu0 %v2546_v60 }
 0x186   : > { %v5246_v35 = vpop.f32.mrf.mxu2  ;;  %v5248_v9 = vpop.f32.mrf.mxu3 }
 0x187   : > { %6397 = vst [vmem:[#allocation33_spill] sm:$0xff] %v5246_v35  ;;  %v5270_v32 = vpop.f32.mrf.mxu1  ;;  %4126 = vmatmul.msk.f32.gmra.mxu1 %vm538_vm0, %v1031_v45  ;;  %v5297_v45 = vld [vmem:[%s6358_s6] ss:$0 sm:$0xff] }
 0x188   : > { %6398 = vst [vmem:[#allocation34_spill] sm:$0xff] %v5248_v9  ;;  %v955_v9 = vmax.f32 %v5002_v19, 0.0  ;;  %v956_v19 = vmax.f32 %v5018_v3, 0.0 }
 0x189   : > { %v841_v41 = vpop.f32.mrf.mxu0 }
 0x18b   : > { %4177 = vmatmul.msk.f32.gmra.mxu2 %vm538_vm0, %v954_v26  ;;  %4289 = vmatmul.msk.f32.gmra.mxu3 %vm2144_vm1, %v2136_v49  ;;  %v1032_v49 = vmin.f32 %v5274_v53, 0.0 }
 0x18c   : > { %4082 = vmatmul.msk.f32.gmra.mxu0 %vm538_vm0, %v513_v30 }
 0x18e   : > { %v5264_v55 = vpop.f32.mrf.mxu2  ;;  %v5266_v60 = vpop.f32.mrf.mxu3 }
 0x18f   : > { %6399 = vst [vmem:[#allocation35_spill] sm:$0xff] %v5264_v55  ;;  %v5285_v23 = vpop.f32.mrf.mxu1  ;;  %4127 = vmatmul.msk.f32.gmra.mxu1 %vm538_vm0, %v1032_v49  ;;  %v5306_v49 = vadd.f32 %v4747_v59, %v838_v18  ;;  %v958_v18 = vmax.f32 %v5046_v48, 0.0 }
 0x190   : > { %6400 = vst [vmem:[#allocation36_spill] sm:$0xff] %v5266_v60 }
 0x191   : > { %v844_v26 = vpop.f32.mrf.mxu0 }
 0x193   : > { %4178 = vmatmul.msk.f32.gmra.mxu2 %vm538_vm0, %v955_v9  ;;  %4290 = vmatmul.msk.f32.gmra.mxu3 %vm2144_vm1, %v2137_v25  ;;  %v1033_v9 = vmin.f32 %v5289_v6, 0.0 }
 0x196   : > { %v5280_v30 = vpop.f32.mrf.mxu2  ;;  %v5282_v60 = vpop.f32.mrf.mxu3 }
 0x197   : > { %6401 = vst [vmem:[#allocation37_spill] sm:$0xff] %v5280_v30  ;;  %v5303_v2 = vpop.f32.mrf.mxu1  ;;  %4128 = vmatmul.msk.f32.gmra.mxu1 %vm538_vm0, %v1033_v9  ;;  %v5321_v9 = vadd.f32 %v4747_v59, %v841_v41  ;;  %v959_v41 = vmax.f32 %v5061_v63, 0.0 }
 0x198   : > { %6402 = vst [vmem:[#allocation38_spill] sm:$0xff] %v5282_v60  ;;  %v957_v60 = vmax.f32 %v5031_v16, 0.0 }
 0x199   : > { %v847_v14 = vpop.f32.mrf.mxu0 }
 0x19b   : > { %4179 = vmatmul.msk.f32.gmra.mxu2 %vm538_vm0, %v956_v19 }
 0x19e   : > { %v1686_v25 = vpop.f32.mrf.mxu2  ;;  %v5299_v3 = vpop.f32.mrf.mxu3 }
 0x19f   : > { %6403 = vst [vmem:[#allocation39_spill] sm:$0xff] %v5299_v3  ;;  %v1687_v21 = vadd.f32 %v1686_v25, %v5191_v58  ;;  %v1034_v3 = vmin.f32 %v5306_v49, 0.0 }
 0x1a1   : > { %v1882_v19 = vadd.f32 %v5297_v45, %v1687_v21  ;;  %v850_v30 = vpop.f32.mrf.mxu0  ;;  %v5318_v21 = vpop.f32.mrf.mxu1  ;;  %4129 = vmatmul.msk.f32.gmra.mxu1 %vm538_vm0, %v1034_v3  ;;  %v5336_v3 = vadd.f32 %v4747_v59, %v844_v26  ;;  %v960_v26 = vmax.f32 %v5076_v10, 0.0 }
 0x1a3   : > { %v1946_v55 = vmax.f32 %v1882_v19, 0.0  ;;  %v2010_v35 = vmin.f32 %v1882_v19, 0.0  ;;  %4180 = vmatmul.msk.f32.gmra.mxu2 %vm538_vm0, %v957_v60 }
 0x1a5   : > { %4291 = vmatmul.msk.f32.vlgmr.msrb.gmra.mxu3 %vm538_vm0, %v2010_v35  ;;  %4355 = vmatmul.msk.f32.vlgmr.msrb.gmra.mxu0 %vm538_vm0, %v1946_v55  ;;  %v1035_v55 = vmin.f32 %v5321_v9, 0.0 }
 0x1a6   : > { %v1689_v16 = vpop.f32.mrf.mxu2  ;;  %v5314_v58 = vpop.f32.mrf.mxu3 }
 0x1a7   : > { %6404 = vst [vmem:[#allocation40_spill] sm:$0xff] %v5314_v58  ;;  %v1690_v25 = vadd.f32 %v1689_v16, %v5223_v12 }
 0x1a9   : > { %v1883_v60 = vadd.f32 %v5297_v45, %v1690_v25  ;;  %v853_v19 = vpop.f32.mrf.mxu0  ;;  %v5333_v25 = vpop.f32.mrf.mxu1  ;;  %4130 = vmatmul.msk.f32.gmra.mxu1 %vm538_vm0, %v1035_v55  ;;  %v5351_v55 = vadd.f32 %v4747_v59, %v847_v14  ;;  %v961_v14 = vmax.f32 %v5091_v20, 0.0 }
 0x1ab   : > { %v1947_v35 = vmax.f32 %v1883_v60, 0.0  ;;  %v2011_v8 = vmin.f32 %v1883_v60, 0.0  ;;  %4181 = vmatmul.msk.f32.gmra.mxu2 %vm538_vm0, %v958_v18 }
 0x1ad   : > { %4292 = vmatmul.msk.f32.gmra.mxu3 %vm538_vm0, %v2011_v8  ;;  %4356 = vmatmul.msk.f32.gmra.mxu0 %vm538_vm0, %v1947_v35  ;;  %v1036_v35 = vmin.f32 %v5336_v3, 0.0 }
 0x1ae   : > { %v1692_v12 = vpop.f32.mrf.mxu2  ;;  %v5329_v48 = vpop.f32.mrf.mxu3 }
 0x1af   : > { %6405 = vst [vmem:[#allocation41_spill] sm:$0xff] %v5329_v48  ;;  %v1693_v16 = vadd.f32 %v1692_v12, %v5252_v37 }
 0x1b1   : > { %v1884_v18 = vadd.f32 %v5297_v45, %v1693_v16  ;;  %v856_v60 = vpop.f32.mrf.mxu0  ;;  %v5348_v16 = vpop.f32.mrf.mxu1  ;;  %4131 = vmatmul.msk.f32.gmra.mxu1 %vm538_vm0, %v1036_v35  ;;  %v5366_v35 = vadd.f32 %v4747_v59, %v850_v30  ;;  %v962_v30 = vmax.f32 %v5106_v29, 0.0 }
 0x1b3   : > { %v1948_v8 = vmax.f32 %v1884_v18, 0.0  ;;  %v2012_v58 = vmin.f32 %v1884_v18, 0.0  ;;  %4182 = vmatmul.msk.f32.gmra.mxu2 %vm538_vm0, %v959_v41 }
 0x1b5   : > { %4293 = vmatmul.msk.f32.gmra.mxu3 %vm538_vm0, %v2012_v58  ;;  %4357 = vmatmul.msk.f32.gmra.mxu0 %vm538_vm0, %v1948_v8  ;;  %v1037_v8 = vmin.f32 %v5351_v55, 0.0 }
 0x1b6   : > { %v1695_v63 = vpop.f32.mrf.mxu2  ;;  %v5344_v37 = vpop.f32.mrf.mxu3 }
 0x1b7   : > { %6406 = vst [vmem:[#allocation42_spill] sm:$0xff] %v5344_v37  ;;  %v1696_v12 = vadd.f32 %v1695_v63, %v5270_v32 }
 0x1b9   : > { %v1885_v41 = vadd.f32 %v5297_v45, %v1696_v12  ;;  %v859_v18 = vpop.f32.mrf.mxu0  ;;  %v5363_v12 = vpop.f32.mrf.mxu1  ;;  %4132 = vmatmul.msk.f32.gmra.mxu1 %vm538_vm0, %v1037_v8  ;;  %v5381_v8 = vadd.f32 %v4747_v59, %v853_v19  ;;  %v963_v59 = vmax.f32 %v5121_v38, 0.0 }
 0x1bb   : > { %v1949_v58 = vmax.f32 %v1885_v41, 0.0  ;;  %v2013_v48 = vmin.f32 %v1885_v41, 0.0  ;;  %4183 = vmatmul.msk.f32.gmra.mxu2 %vm538_vm0, %v960_v26 }
 0x1bd   : > { %4294 = vmatmul.msk.f32.gmra.mxu3 %vm538_vm0, %v2013_v48  ;;  %4358 = vmatmul.msk.f32.gmra.mxu0 %vm538_vm0, %v1949_v58  ;;  %v1038_v58 = vmin.f32 %v5366_v35, 0.0 }
 0x1be   : > { %v1698_v32 = vpop.f32.mrf.mxu2  ;;  %v5359_v10 = vpop.f32.mrf.mxu3 }
 0x1bf   : > { %6407 = vst [vmem:[#allocation43_spill] sm:$0xff] %v5359_v10  ;;  %v1699_v63 = vadd.f32 %v1698_v32, %v5285_v23 }
 0x1c1   : > { %v1886_v26 = vadd.f32 %v5297_v45, %v1699_v63  ;;  %v862_v41 = vpop.f32.mrf.mxu0  ;;  %v5378_v63 = vpop.f32.mrf.mxu1  ;;  %4133 = vmatmul.msk.f32.gmra.mxu1 %vm538_vm0, %v1038_v58  ;;  %v5398_v58 = vld [vmem:[%s6355_s3] ss:$0 sm:$0xff] }
 0x1c3   : > { %v1950_v48 = vmax.f32 %v1886_v26, 0.0  ;;  %v2014_v37 = vmin.f32 %v1886_v26, 0.0  ;;  %4184 = vmatmul.msk.f32.gmra.mxu2 %vm538_vm0, %v961_v14 }
 0x1c5   : > { %4295 = vmatmul.msk.f32.gmra.mxu3 %vm538_vm0, %v2014_v37  ;;  %4359 = vmatmul.msk.f32.gmra.mxu0 %vm538_vm0, %v1950_v48  ;;  %v1039_v48 = vmin.f32 %v5381_v8, 0.0 }
 0x1c6   : > { %v1701_v23 = vpop.f32.mrf.mxu2  ;;  %v5374_v20 = vpop.f32.mrf.mxu3 }
 0x1c7   : > { %v1702_v32 = vadd.f32 %v1701_v23, %v5303_v2 }
 0x1c9   : > { %v1887_v14 = vadd.f32 %v5297_v45, %v1702_v32  ;;  %v865_v26 = vpop.f32.mrf.mxu0  ;;  %v5393_v23 = vpop.f32.mrf.mxu1  ;;  %4134 = vmatmul.msk.f32.gmra.mxu1 %vm538_vm0, %v1039_v48  ;;  %v5416_v48 = vadd.f32 %v5398_v58, %v859_v18  ;;  %v965_v18 = vmax.f32 %v5196_v40, 0.0 }
 0x1cb   : > { %v1951_v37 = vmax.f32 %v1887_v14, 0.0  ;;  %v2015_v10 = vmin.f32 %v1887_v14, 0.0  ;;  %4185 = vmatmul.msk.f32.gmra.mxu2 %vm538_vm0, %v962_v30  ;;  %v5401_v30 = vadd.f32 %v5398_v58, %v856_v60  ;;  %v964_v60 = vmax.f32 %v5176_v54, 0.0 }
 0x1cd   : > { %4296 = vmatmul.msk.f32.gmra.mxu3 %vm538_vm0, %v2015_v10  ;;  %4360 = vmatmul.msk.f32.gmra.mxu0 %vm538_vm0, %v1951_v37  ;;  %v1040_v38 = vmin.f32 %v5401_v30, 0.0 }
 0x1ce   : > { %v1704_v2 = vpop.f32.mrf.mxu2  ;;  %v5389_v29 = vpop.f32.mrf.mxu3 }
 0x1cf   : > { %6408 = vst [vmem:[#allocation44_spill] sm:$0xff] %v5389_v29  ;;  %v1705_v19 = vadd.f32 %v1704_v2, %v5318_v21 }
 0x1d1   : > { %v1888_v10 = vadd.f32 %v5297_v45, %v1705_v19  ;;  %v868_v32 = vpop.f32.mrf.mxu0  ;;  %v5413_v29 = vpop.f32.mrf.mxu1  ;;  %4135 = vmatmul.msk.f32.gmra.mxu1 %vm538_vm0, %v1040_v38  ;;  %v5431_v38 = vadd.f32 %v5398_v58, %v862_v41  ;;  %v966_v41 = vmax.f32 %v5226_v61, 0.0 }
 0x1d3   : > { %v1952_v14 = vmax.f32 %v1888_v10, 0.0  ;;  %v2016_v37 = vmin.f32 %v1888_v10, 0.0  ;;  %4186 = vmatmul.msk.f32.gmra.mxu2 %vm538_vm0, %v963_v59 }
 0x1d5   : > { %4297 = vmatmul.msk.f32.gmra.mxu3 %vm538_vm0, %v2016_v37  ;;  %4361 = vmatmul.msk.f32.gmra.mxu0 %vm538_vm0, %v1952_v14 }
 0x1d6   : > { %v1707_v21 = vpop.f32.mrf.mxu2  ;;  %v5409_v2 = vpop.f32.mrf.mxu3 }
 0x1d7   : > { %6409 = vst [vmem:[#allocation45_spill] sm:$0xff] %v5409_v2  ;;  %v1708_v19 = vadd.f32 %v1707_v21, %v5333_v25  ;;  %v1041_v2 = vmin.f32 %v5416_v48, 0.0 }
 0x1d9   : > { %v1889_v59 = vadd.f32 %v5297_v45, %v1708_v19  ;;  %v871_v14 = vpop.f32.mrf.mxu0  ;;  %v5428_v19 = vpop.f32.mrf.mxu1  ;;  %4136 = vmatmul.msk.f32.gmra.mxu1 %vm538_vm0, %v1041_v2  ;;  %v5446_v2 = vadd.f32 %v5398_v58, %v865_v26  ;;  %v967_v26 = vmax.f32 %v5256_v51, 0.0 }
 0x1db   : > { %v1953_v10 = vmax.f32 %v1889_v59, 0.0  ;;  %v2017_v37 = vmin.f32 %v1889_v59, 0.0  ;;  %4187 = vmatmul.msk.f32.gmra.mxu2 %vm538_vm0, %v964_v60 }
 0x1dd   : > { %4298 = vmatmul.msk.f32.gmra.mxu3 %vm538_vm0, %v2017_v37  ;;  %4362 = vmatmul.msk.f32.gmra.mxu0 %vm538_vm0, %v1953_v10  ;;  %v1042_v10 = vmin.f32 %v5431_v38, 0.0 }
 0x1de   : > { %v1710_v54 = vpop.f32.mrf.mxu2  ;;  %v5424_v25 = vpop.f32.mrf.mxu3 }
 0x1df   : > { %6410 = vst [vmem:[#allocation46_spill] sm:$0xff] %v5424_v25  ;;  %v1711_v21 = vadd.f32 %v1710_v54, %v5348_v16 }
 0x1e1   : > { %v1890_v60 = vadd.f32 %v5297_v45, %v1711_v21  ;;  %v874_v40 = vpop.f32.mrf.mxu0  ;;  %v5443_v25 = vpop.f32.mrf.mxu1  ;;  %4137 = vmatmul.msk.f32.gmra.mxu1 %vm538_vm0, %v1042_v10  ;;  %v5461_v10 = vadd.f32 %v5398_v58, %v868_v32  ;;  %v968_v32 = vmax.f32 %v5274_v53, 0.0 }
 0x1e3   : > { %v1954_v59 = vmax.f32 %v1890_v60, 0.0  ;;  %v2018_v37 = vmin.f32 %v1890_v60, 0.0  ;;  %4188 = vmatmul.msk.f32.gmra.mxu2 %vm538_vm0, %v965_v18 }
 0x1e5   : > { %4299 = vmatmul.msk.f32.gmra.mxu3 %vm538_vm0, %v2018_v37  ;;  %4363 = vmatmul.msk.f32.gmra.mxu0 %vm538_vm0, %v1954_v59  ;;  %v1043_v59 = vmin.f32 %v5446_v2, 0.0 }
 0x1e6   : > { %v1713_v16 = vpop.f32.mrf.mxu2  ;;  %v5439_v54 = vpop.f32.mrf.mxu3 }
 0x1e7   : > { %6411 = vst [vmem:[#allocation47_spill] sm:$0xff] %v5439_v54  ;;  %v1714_v21 = vadd.f32 %v1713_v16, %v5363_v12 }
 0x1e9   : > { %v1891_v18 = vadd.f32 %v5297_v45, %v1714_v21  ;;  %v877_v21 = vpop.f32.mrf.mxu0  ;;  %v5458_v54 = vpop.f32.mrf.mxu1  ;;  %4138 = vmatmul.msk.f32.gmra.mxu1 %vm538_vm0, %v1043_v59  ;;  %v5476_v59 = vadd.f32 %v5398_v58, %v871_v14 }
 0x1eb   : > { %v1955_v60 = vmax.f32 %v1891_v18, 0.0  ;;  %v2019_v37 = vmin.f32 %v1891_v18, 0.0  ;;  %4189 = vmatmul.msk.f32.gmra.mxu2 %vm538_vm0, %v966_v41 }
 0x1ed   : > { %4300 = vmatmul.msk.f32.gmra.mxu3 %vm538_vm0, %v2019_v37  ;;  %4364 = vmatmul.msk.f32.gmra.mxu0 %vm538_vm0, %v1955_v60  ;;  %v1044_v60 = vmin.f32 %v5461_v10, 0.0 }
 0x1ee   : > { %v1716_v61 = vpop.f32.mrf.mxu2  ;;  %v5454_v12 = vpop.f32.mrf.mxu3 }
 0x1ef   : > { %6412 = vst [vmem:[#allocation48_spill] sm:$0xff] %v5454_v12  ;;  %v1717_v16 = vadd.f32 %v1716_v61, %v5378_v63 }
 0x1f1   : > { %v1892_v41 = vadd.f32 %v5297_v45, %v1717_v16  ;;  %v5473_v16 = vpop.f32.mrf.mxu1  ;;  %4139 = vmatmul.msk.f32.gmra.mxu1 %vm538_vm0, %v1044_v60  ;;  %v5491_v60 = vadd.f32 %v5398_v58, %v874_v40 }
 0x1f3   : > { %v1956_v18 = vmax.f32 %v1892_v41, 0.0  ;;  %v2020_v37 = vmin.f32 %v1892_v41, 0.0  ;;  %4190 = vmatmul.msk.f32.gmra.mxu2 %vm538_vm0, %v967_v26  ;;  %v880_v41 = vpop.f32.mrf.mxu0 }
 0x1f5   : > { %4301 = vmatmul.msk.f32.gmra.mxu3 %vm538_vm0, %v2020_v37  ;;  %4365 = vmatmul.msk.f32.gmra.mxu0 %vm538_vm0, %v1956_v18  ;;  %v1045_v18 = vmin.f32 %v5476_v59, 0.0 }
 0x1f6   : > { %v1719_v51 = vpop.f32.mrf.mxu2  ;;  %v5469_v63 = vpop.f32.mrf.mxu3 }
 0x1f7   : > { %v1720_v61 = vadd.f32 %v1719_v51, %v5393_v23  ;;  %v969_v23 = vmax.f32 %v5289_v6, 0.0  ;;  %v3357_v6 = vld [vmem:[%s6363_s11 + $0x8] sm:$0xff] }
 0x1f8   : > { %3564 = vmatpush.msrb.mxu1 %v3357_v6 }
 0x1f9   : > { %v1893_v26 = vadd.f32 %v5297_v45, %v1720_v61  ;;  %v5488_v61 = vpop.f32.mrf.mxu1  ;;  %4140 = vmatmul.msk.f32.gmra.mxu1 %vm538_vm0, %v1045_v18 }
 0x1fb   : > { %v1957_v37 = vmax.f32 %v1893_v26, 0.0  ;;  %v2021_v12 = vmin.f32 %v1893_v26, 0.0  ;;  %4191 = vmatmul.msk.f32.gmra.mxu2 %vm538_vm0, %v968_v32 }
 0x1fd   : > { %4302 = vmatmul.msk.f32.gmra.mxu3 %vm538_vm0, %v2021_v12  ;;  %4366 = vmatmul.msk.f32.gmra.mxu0 %vm538_vm0, %v1957_v37  ;;  %v1046_v37 = vmin.f32 %v5491_v60, 0.0 }
 0x1fe   : > { %v1722_v53 = vpop.f32.mrf.mxu2  ;;  %v5486_v51 = vpop.f32.mrf.mxu3 }
 0x1ff   : > { %v1723_v14 = vadd.f32 %v1722_v53, %v5413_v29  ;;  %6413 = vst [vmem:[#allocation49_spill] sm:$0xff] %v5486_v51  ;;  %v883_v29 = vpop.f32.mrf.mxu0  ;;  %v970_v53 = vmax.f32 %v5306_v49, 0.0 }
 0x201   : > { %v1894_v32 = vadd.f32 %v5297_v45, %v1723_v14  ;;  %v5504_v14 = vpop.f32.mrf.mxu1  ;;  %4141 = vmatmul.msk.f32.gmra.mxu1 %vm538_vm0, %v1046_v37  ;;  %v5522_v37 = vadd.f32 %v5398_v58, %v880_v41 }
 0x203   : > { %v1958_v26 = vmax.f32 %v1894_v32, 0.0  ;;  %v2022_v12 = vmin.f32 %v1894_v32, 0.0  ;;  %4192 = vmatmul.msk.f32.gmra.mxu2 %vm538_vm0, %v969_v23  ;;  %v5507_v23 = vadd.f32 %v5398_v58, %v877_v21  ;;  %v971_v21 = vmax.f32 %v5321_v9, 0.0 }
 0x205   : > { %4303 = vmatmul.msk.f32.gmra.mxu3 %vm538_vm0, %v2022_v12  ;;  %4367 = vmatmul.msk.f32.gmra.mxu0 %vm538_vm0, %v1958_v26  ;;  %v1047_v26 = vmin.f32 %v5507_v23, 0.0 }
 0x206   : > { %v1725_v40 = vpop.f32.mrf.mxu2  ;;  %v5511_v6 = vpop.f32.mrf.mxu3 }
 0x207   : > { %v1726_v18 = vadd.f32 %v1725_v40, %v5428_v19  ;;  %6414 = vst [vmem:[#allocation50_spill] sm:$0xff] %v5511_v6  ;;  %v886_v19 = vpop.f32.mrf.mxu0 }
 0x209   : > { %v1895_v32 = vadd.f32 %v5297_v45, %v1726_v18  ;;  %v5519_v18 = vpop.f32.mrf.mxu1  ;;  %4142 = vmatmul.msk.f32.gmra.mxu1 %vm538_vm0, %v1047_v26  ;;  %v5537_v26 = vadd.f32 %v5398_v58, %v883_v29  ;;  %v973_v29 = vmax.f32 %v5351_v55, 0.0 }
 0x20b   : > { %v1959_v51 = vmax.f32 %v1895_v32, 0.0  ;;  %v2023_v12 = vmin.f32 %v1895_v32, 0.0  ;;  %4193 = vmatmul.msk.f32.gmra.mxu2 %vm538_vm0, %v970_v53 }
 0x20d   : > { %4304 = vmatmul.msk.f32.gmra.mxu3 %vm538_vm0, %v2023_v12  ;;  %4368 = vmatmul.msk.f32.gmra.mxu0 %vm538_vm0, %v1959_v51  ;;  %v1048_v12 = vmin.f32 %v5522_v37, 0.0 }
 0x20e   : > { %v1728_v49 = vpop.f32.mrf.mxu2  ;;  %v5527_v51 = vpop.f32.mrf.mxu3 }
 0x20f   : > { %v1729_v40 = vadd.f32 %v1728_v49, %v5443_v25  ;;  %6415 = vst [vmem:[#allocation51_spill] sm:$0xff] %v5527_v51  ;;  %v972_v25 = vmax.f32 %v5336_v3, 0.0  ;;  %v889_v49 = vpop.f32.mrf.mxu0 }
 0x211   : > { %v1896_v32 = vadd.f32 %v5297_v45, %v1729_v40  ;;  %v5534_v40 = vpop.f32.mrf.mxu1  ;;  %4143 = vmatmul.msk.f32.gmra.mxu1 %vm538_vm0, %v1048_v12  ;;  %v5552_v12 = vadd.f32 %v5398_v58, %v886_v19 }
 0x213   : > { %v1960_v53 = vmax.f32 %v1896_v32, 0.0  ;;  %v2024_v6 = vmin.f32 %v1896_v32, 0.0  ;;  %4194 = vmatmul.msk.f32.gmra.mxu2 %vm538_vm0, %v971_v21 }
 0x215   : > { %4305 = vmatmul.msk.f32.gmra.mxu3 %vm538_vm0, %v2024_v6  ;;  %4369 = vmatmul.msk.f32.gmra.mxu0 %vm538_vm0, %v1960_v53  ;;  %v1049_v6 = vmin.f32 %v5537_v26, 0.0 }
 0x216   : > { %v1731_v9 = vpop.f32.mrf.mxu2 }
 0x217   : > { %v1732_v41 = vadd.f32 %v1731_v9, %v5458_v54  ;;  %v5545_v54 = vpop.f32.mrf.mxu3 }
 0x218   : > { %6416 = vst [vmem:[#allocation52_spill] sm:$0xff] %v5545_v54 }
 0x219   : > { %v1897_v21 = vadd.f32 %v5297_v45, %v1732_v41  ;;  %v5549_v9 = vpop.f32.mrf.mxu1  ;;  %4144 = vmatmul.msk.f32.gmra.mxu1 %vm538_vm0, %v1049_v6  ;;  %v5565_v6 = vadd.f32 %v5398_v58, %v889_v49  ;;  %v975_v58 = vmax.f32 %v5381_v8, 0.0 }
 0x21b   : > { %v1961_v32 = vmax.f32 %v1897_v21, 0.0  ;;  %v2025_v51 = vmin.f32 %v1897_v21, 0.0  ;;  %4195 = vmatmul.msk.f32.gmra.mxu2 %vm538_vm0, %v972_v25 }
 0x21d   : > { %4306 = vmatmul.msk.f32.gmra.mxu3 %vm538_vm0, %v2025_v51  ;;  %4370 = vmatmul.msk.f32.gmra.mxu0 %vm538_vm0, %v1961_v32  ;;  %v1050_v32 = vmin.f32 %v5552_v12, 0.0 }
 0x21e   : > { %v1734_v3 = vpop.f32.mrf.mxu2 }
 0x21f   : > { %v1735_v53 = vadd.f32 %v1734_v3, %v5473_v16  ;;  %v974_v16 = vmax.f32 %v5366_v35, 0.0  ;;  %v1051_v35 = vmin.f32 %v5565_v6, 0.0 }
 0x221   : > { %v1898_v25 = vadd.f32 %v5297_v45, %v1735_v53  ;;  %v5562_v53 = vpop.f32.mrf.mxu1  ;;  %4145 = vmatmul.msk.f32.gmra.mxu1 %vm538_vm0, %v1050_v32 }
 0x222   : > { %v3164_v41 = vpop.f32.mrf.mxu0 }
 0x223   : > { %v1962_v51 = vmax.f32 %v1898_v25, 0.0  ;;  %v2026_v21 = vmin.f32 %v1898_v25, 0.0  ;;  %4196 = vmatmul.msk.f32.gmra.mxu2 %vm538_vm0, %v973_v29 }
 0x225   : > { %4307 = vmatmul.msk.f32.gmra.mxu3 %vm538_vm0, %v2026_v21  ;;  %4371 = vmatmul.msk.f32.gmra.mxu0 %vm538_vm0, %v1962_v51 }
 0x226   : > { %v1737_v55 = vpop.f32.mrf.mxu2 }
 0x227   : > { %v1738_v19 = vadd.f32 %v1737_v55, %v5488_v61 }
 0x228   : > { %v2763_v3 = vpop.f32.mrf.mxu3 }
 0x229   : > { %v1899_v25 = vadd.f32 %v5297_v45, %v1738_v19  ;;  %v5568_v29 = vadd.f32 %v3164_v41, %v2763_v3  ;;  %v5577_v55 = vpop.f32.mrf.mxu1  ;;  %4146 = vmatmul.msk.f32.gmra.mxu1 %vm538_vm0, %v1051_v35 }
 0x22a   : > { %v3167_v21 = vpop.f32.mrf.mxu0 }
 0x22b   : > { %v1963_v54 = vmax.f32 %v1899_v25, 0.0  ;;  %v2027_v51 = vmin.f32 %v1899_v25, 0.0  ;;  %4197 = vmatmul.msk.f32.gmra.mxu2 %vm538_vm0, %v974_v16 }
 0x22d   : > { %4308 = vmatmul.msk.f32.gmra.mxu3 %vm538_vm0, %v2027_v51  ;;  %4372 = vmatmul.msk.f32.gmra.mxu0 %vm538_vm0, %v1963_v54 }
 0x22e   : > { %v1740_v61 = vpop.f32.mrf.mxu2 }
 0x22f   : > { %v1741_v49 = vadd.f32 %v1740_v61, %v5504_v14  ;;  %v976_v14 = vmax.f32 %v5401_v30, 0.0  ;;  %v977_v30 = vmax.f32 %v5416_v48, 0.0  ;;  %v978_v48 = vmax.f32 %v5431_v38, 0.0 }
 0x230   : > { %v2766_v41 = vpop.f32.mrf.mxu3  ;;  %v979_v38 = vmax.f32 %v5446_v2, 0.0  ;;  %v980_v2 = vmax.f32 %v5461_v10, 0.0  ;;  %v981_v10 = vmax.f32 %v5476_v59, 0.0  ;;  %v982_v59 = vmax.f32 %v5491_v60, 0.0 }
 0x231   : > { %v1900_v32 = vadd.f32 %v5297_v45, %v1741_v49  ;;  %v5580_v19 = vadd.f32 %v3167_v21, %v2766_v41  ;;  %v5588_v61 = vpop.f32.mrf.mxu1  ;;  %v983_v60 = vmax.f32 %v5507_v23, 0.0  ;;  %v984_v23 = vmax.f32 %v5522_v37, 0.0 }
 0x232   : > { %v3170_v16 = vpop.f32.mrf.mxu0 }
 0x233   : > { %v1964_v3 = vmax.f32 %v1900_v32, 0.0  ;;  %v2028_v25 = vmin.f32 %v1900_v32, 0.0  ;;  %4198 = vmatmul.msk.f32.gmra.mxu2 %vm538_vm0, %v975_v58 }
 0x235   : > { %4309 = vmatmul.msk.f32.gmra.mxu3 %vm538_vm0, %v2028_v25  ;;  %4373 = vmatmul.msk.f32.gmra.mxu0 %vm538_vm0, %v1964_v3 }
 0x236   : > { %v1743_v8 = vpop.f32.mrf.mxu2 }
 0x237   : > { %v1744_v54 = vadd.f32 %v1743_v8, %v5519_v18 }
 0x238   : > { %v2769_v51 = vpop.f32.mrf.mxu3 }
 0x239   : > { %v1901_v21 = vadd.f32 %v5297_v45, %v1744_v54  ;;  %v5591_v35 = vadd.f32 %v3170_v16, %v2769_v51  ;;  %v5598_v25 = vpop.f32.mrf.mxu1 }
 0x23a   : > { %v3173_v49 = vpop.f32.mrf.mxu0 }
 0x23b   : > { %v1965_v41 = vmax.f32 %v1901_v21, 0.0  ;;  %v2029_v32 = vmin.f32 %v1901_v21, 0.0  ;;  %4199 = vmatmul.msk.f32.gmra.mxu2 %vm538_vm0, %v976_v14 }
 0x23d   : > { %4310 = vmatmul.msk.f32.gmra.mxu3 %vm538_vm0, %v2029_v32  ;;  %4374 = vmatmul.msk.f32.gmra.mxu0 %vm538_vm0, %v1965_v41 }
 0x23e   : > { %v1746_v58 = vpop.f32.mrf.mxu2 }
 0x23f   : > { %v1747_v18 = vadd.f32 %v1746_v58, %v5534_v40 }
 0x240   : > { %v2772_v3 = vpop.f32.mrf.mxu3 }
 0x241   : > { %v1902_v16 = vadd.f32 %v5297_v45, %v1747_v18  ;;  %v5601_v8 = vadd.f32 %v3173_v49, %v2772_v3  ;;  %v5608_v32 = vpop.f32.mrf.mxu1 }
 0x242   : > { %v3176_v54 = vpop.f32.mrf.mxu0 }
 0x243   : > { %v1966_v51 = vmax.f32 %v1902_v16, 0.0  ;;  %v2030_v21 = vmin.f32 %v1902_v16, 0.0  ;;  %4200 = vmatmul.msk.f32.gmra.mxu2 %vm538_vm0, %v977_v30 }
 0x245   : > { %4311 = vmatmul.msk.f32.gmra.mxu3 %vm538_vm0, %v2030_v21  ;;  %4375 = vmatmul.msk.f32.gmra.mxu0 %vm538_vm0, %v1966_v51 }
 0x246   : > { %v1749_v14 = vpop.f32.mrf.mxu2 }
 0x247   : > { %v1750_v40 = vadd.f32 %v1749_v14, %v5549_v9 }
 0x248   : > { %v2775_v41 = vpop.f32.mrf.mxu3 }
 0x249   : > { %v1903_v49 = vadd.f32 %v5297_v45, %v1750_v40  ;;  %v5611_v58 = vadd.f32 %v3176_v54, %v2775_v41  ;;  %v5618_v21 = vpop.f32.mrf.mxu1 }
 0x24a   : > { %v3179_v18 = vpop.f32.mrf.mxu0 }
 0x24b   : > { %v1967_v3 = vmax.f32 %v1903_v49, 0.0  ;;  %v2031_v16 = vmin.f32 %v1903_v49, 0.0  ;;  %4201 = vmatmul.msk.f32.gmra.mxu2 %vm538_vm0, %v978_v48 }
 0x24d   : > { %4312 = vmatmul.msk.f32.gmra.mxu3 %vm538_vm0, %v2031_v16  ;;  %4376 = vmatmul.msk.f32.gmra.mxu0 %vm538_vm0, %v1967_v3 }
 0x24e   : > { %v1752_v30 = vpop.f32.mrf.mxu2 }
 0x24f   : > { %v1753_v9 = vadd.f32 %v1752_v30, %v5562_v53 }
 0x250   : > { %v2778_v51 = vpop.f32.mrf.mxu3 }
 0x251   : > { %v1904_v54 = vadd.f32 %v5297_v45, %v1753_v9  ;;  %v5621_v14 = vadd.f32 %v3179_v18, %v2778_v51  ;;  %v1369_v16 = vpop.f32.mrf.mxu1 }
 0x252   : > { %v3182_v40 = vpop.f32.mrf.mxu0 }
 0x253   : > { %v1968_v41 = vmax.f32 %v1904_v54, 0.0  ;;  %v2032_v49 = vmin.f32 %v1904_v54, 0.0  ;;  %4202 = vmatmul.msk.f32.gmra.mxu2 %vm538_vm0, %v979_v38 }
 0x255   : > { %4313 = vmatmul.msk.f32.gmra.mxu3 %vm538_vm0, %v2032_v49  ;;  %4377 = vmatmul.msk.f32.gmra.mxu0 %vm538_vm0, %v1968_v41 }
 0x256   : > { %v1755_v48 = vpop.f32.mrf.mxu2 }
 0x257   : > { %v1756_v53 = vadd.f32 %v1755_v48, %v5577_v55 }
 0x258   : > { %v2781_v3 = vpop.f32.mrf.mxu3 }
 0x259   : > { %v1905_v30 = vadd.f32 %v5297_v45, %v1756_v53  ;;  %v5629_v18 = vadd.f32 %v3182_v40, %v2781_v3  ;;  %v1372_v53 = vpop.f32.mrf.mxu1 }
 0x25a   : > { %v3185_v9 = vpop.f32.mrf.mxu0 }
 0x25b   : > { %v1969_v51 = vmax.f32 %v1905_v30, 0.0  ;;  %v2033_v54 = vmin.f32 %v1905_v30, 0.0  ;;  %4203 = vmatmul.msk.f32.gmra.mxu2 %vm538_vm0, %v980_v2 }
 0x25d   : > { %4314 = vmatmul.msk.f32.gmra.mxu3 %vm538_vm0, %v2033_v54  ;;  %4378 = vmatmul.msk.f32.gmra.mxu0 %vm538_vm0, %v1969_v51 }
 0x25e   : > { %v1758_v38 = vpop.f32.mrf.mxu2 }
 0x25f   : > { %v1759_v55 = vadd.f32 %v1758_v38, %v5588_v61 }
 0x260   : > { %v2784_v41 = vpop.f32.mrf.mxu3 }
 0x261   : > { %v1906_v49 = vadd.f32 %v5297_v45, %v1759_v55  ;;  %v5637_v48 = vadd.f32 %v3185_v9, %v2784_v41 }
 0x262   : > { %v3188_v40 = vpop.f32.mrf.mxu0 }
 0x263   : > { %v1970_v3 = vmax.f32 %v1906_v49, 0.0  ;;  %v2034_v30 = vmin.f32 %v1906_v49, 0.0  ;;  %4204 = vmatmul.msk.f32.gmra.mxu2 %vm538_vm0, %v981_v10  ;;  %v1375_v10 = vpop.f32.mrf.mxu1 }
 0x265   : > { %4315 = vmatmul.msk.f32.gmra.mxu3 %vm538_vm0, %v2034_v30  ;;  %4379 = vmatmul.msk.f32.gmra.mxu0 %vm538_vm0, %v1970_v3 }
 0x266   : > { %v1761_v2 = vpop.f32.mrf.mxu2 }
 0x267   : > { %v1762_v61 = vadd.f32 %v1761_v2, %v5598_v25 }
 0x268   : > { %v2787_v51 = vpop.f32.mrf.mxu3 }
 0x269   : > { %v1907_v54 = vadd.f32 %v5297_v45, %v1762_v61  ;;  %v5645_v9 = vadd.f32 %v3188_v40, %v2787_v51 }
 0x26a   : > { %v3191_v38 = vpop.f32.mrf.mxu0 }
 0x26b   : > { %v1971_v55 = vmax.f32 %v1907_v54, 0.0  ;;  %v2035_v41 = vmin.f32 %v1907_v54, 0.0  ;;  %4205 = vmatmul.msk.f32.gmra.mxu2 %vm538_vm0, %v982_v59  ;;  %v1378_v54 = vpop.f32.mrf.mxu1 }
 0x26d   : > { %4316 = vmatmul.msk.f32.gmra.mxu3 %vm538_vm0, %v2035_v41  ;;  %4380 = vmatmul.msk.f32.gmra.mxu0 %vm538_vm0, %v1971_v55 }
 0x26e   : > { %v1764_v49 = vpop.f32.mrf.mxu2 }
 0x26f   : > { %v1765_v25 = vadd.f32 %v1764_v49, %v5608_v32 }
 0x270   : > { %v2790_v3 = vpop.f32.mrf.mxu3 }
 0x271   : > { %v1908_v30 = vadd.f32 %v5297_v45, %v1765_v25  ;;  %v5653_v40 = vadd.f32 %v3191_v38, %v2790_v3 }
 0x272   : > { %v3194_v2 = vpop.f32.mrf.mxu0 }
 0x273   : > { %v1972_v61 = vmax.f32 %v1908_v30, 0.0  ;;  %v2036_v51 = vmin.f32 %v1908_v30, 0.0  ;;  %4206 = vmatmul.msk.f32.gmra.mxu2 %vm538_vm0, %v983_v60  ;;  %v985_v30 = vmax.f32 %v5537_v26, 0.0 }
 0x275   : > { %4317 = vmatmul.msk.f32.gmra.mxu3 %vm538_vm0, %v2036_v51  ;;  %4381 = vmatmul.msk.f32.gmra.mxu0 %vm538_vm0, %v1972_v61 }
 0x276   : > { %v1767_v59 = vpop.f32.mrf.mxu2 }
 0x277   : > { %v1768_v32 = vadd.f32 %v1767_v59, %v5618_v21  ;;  %v1381_v21 = vpop.f32.mrf.mxu1 }
 0x278   : > { %v2793_v55 = vpop.f32.mrf.mxu3 }
 0x279   : > { %v1909_v41 = vadd.f32 %v5297_v45, %v1768_v32  ;;  %v5661_v38 = vadd.f32 %v3194_v2, %v2793_v55 }
 0x27a   : > { %v3197_v49 = vpop.f32.mrf.mxu0 }
 0x27b   : > { %v1973_v25 = vmax.f32 %v1909_v41, 0.0  ;;  %v2037_v3 = vmin.f32 %v1909_v41, 0.0  ;;  %4207 = vmatmul.msk.f32.gmra.mxu2 %vm538_vm0, %v984_v23  ;;  %v986_v41 = vmax.f32 %v5552_v12, 0.0 }
 0x27d   : > { %4318 = vmatmul.msk.f32.gmra.mxu3 %vm538_vm0, %v2037_v3  ;;  %4382 = vmatmul.msk.f32.gmra.mxu0 %vm538_vm0, %v1973_v25 }
 0x27e   : > { %v1770_v60 = vpop.f32.mrf.mxu2 }
 0x27f   : > { %v1771_v37 = vadd.f32 %v1770_v60, %v1369_v16  ;;  %v1384_v60 = vpop.f32.mrf.mxu1 }
 0x280   : > { %v2796_v61 = vpop.f32.mrf.mxu3 }
 0x281   : > { %v1910_v51 = vadd.f32 %v5297_v45, %v1771_v37  ;;  %v5668_v59 = vadd.f32 %v3197_v49, %v2796_v61 }
 0x282   : > { %v3200_v2 = vpop.f32.mrf.mxu0 }
 0x283   : > { %v1974_v32 = vmax.f32 %v1910_v51, 0.0  ;;  %v2038_v55 = vmin.f32 %v1910_v51, 0.0  ;;  %4208 = vmatmul.msk.f32.gmra.mxu2 %vm538_vm0, %v985_v30  ;;  %v987_v51 = vmax.f32 %v5565_v6, 0.0  ;;  %v988_v6 = vmax.f32 %v4761_v4, 0.0 }
 0x285   : > { %4319 = vmatmul.msk.f32.gmra.mxu3 %vm538_vm0, %v2038_v55  ;;  %4383 = vmatmul.msk.f32.gmra.mxu0 %vm538_vm0, %v1974_v32 }
 0x286   : > { %v1773_v23 = vpop.f32.mrf.mxu2 }
 0x287   : > { %v1774_v26 = vadd.f32 %v1773_v23, %v1372_v53 }
 0x288   : > { %v2799_v16 = vpop.f32.mrf.mxu3 }
 0x289   : > { %v1911_v25 = vadd.f32 %v5297_v45, %v1774_v26  ;;  %v5675_v3 = vadd.f32 %v3200_v2, %v2799_v16  ;;  %v1387_v16 = vpop.f32.mrf.mxu1 }
 0x28a   : > { %v3203_v49 = vpop.f32.mrf.mxu0 }
 0x28b   : > { %v1975_v37 = vmax.f32 %v1911_v25, 0.0  ;;  %v2039_v61 = vmin.f32 %v1911_v25, 0.0  ;;  %4209 = vmatmul.msk.f32.gmra.mxu2 %vm538_vm0, %v986_v41 }
 0x28d   : > { %4320 = vmatmul.msk.f32.gmra.mxu3 %vm538_vm0, %v2039_v61  ;;  %4384 = vmatmul.msk.f32.gmra.mxu0 %vm538_vm0, %v1975_v37 }
 0x28e   : > { %v1776_v30 = vpop.f32.mrf.mxu2 }
 0x28f   : > { %v1777_v12 = vadd.f32 %v1776_v30, %v1375_v10 }
 0x290   : > { %v2802_v53 = vpop.f32.mrf.mxu3 }
 0x291   : > { %v1912_v32 = vadd.f32 %v5297_v45, %v1777_v12  ;;  %v5682_v55 = vadd.f32 %v3203_v49, %v2802_v53  ;;  %v1390_v53 = vpop.f32.mrf.mxu1 }
 0x292   : > { %v3206_v2 = vpop.f32.mrf.mxu0 }
 0x293   : > { %v1976_v23 = vmax.f32 %v1912_v32, 0.0  ;;  %v2040_v26 = vmin.f32 %v1912_v32, 0.0  ;;  %4210 = vmatmul.msk.f32.gmra.mxu2 %vm538_vm0, %v987_v51 }
 0x295   : > { %4321 = vmatmul.msk.f32.gmra.mxu3 %vm538_vm0, %v2040_v26  ;;  %4385 = vmatmul.msk.f32.gmra.mxu0 %vm538_vm0, %v1976_v23  ;;  %v989_v23 = vmax.f32 %v4780_v15, 0.0 }
 0x296   : > { %v1779_v41 = vpop.f32.mrf.mxu2 }
 0x297   : > { %v1780_v25 = vadd.f32 %v1779_v41, %v1378_v54 }
 0x298   : > { %v2805_v37 = vpop.f32.mrf.mxu3 }
 0x299   : > { %v1913_v10 = vadd.f32 %v5297_v45, %v1780_v25  ;;  %v5689_v61 = vadd.f32 %v3206_v2, %v2805_v37 }
 0x29a   : > { %v3209_v49 = vpop.f32.mrf.mxu0 }
 0x29b   : > { %v1977_v30 = vmax.f32 %v1913_v10, 0.0  ;;  %v2041_v12 = vmin.f32 %v1913_v10, 0.0  ;;  %4211 = vmatmul.msk.f32.gmra.mxu2 %vm538_vm0, %v988_v6 }
 0x29d   : > { %4322 = vmatmul.msk.f32.gmra.mxu3 %vm538_vm0, %v2041_v12  ;;  %4386 = vmatmul.msk.f32.gmra.mxu0 %vm538_vm0, %v1977_v30  ;;  %v990_v30 = vmax.f32 %v4796_v24, 0.0 }
 0x29e   : > { %v1782_v51 = vpop.f32.mrf.mxu2 }
 0x29f   : > { %v1783_v32 = vadd.f32 %v1782_v51, %v1381_v21  ;;  %v1393_v21 = vpop.f32.mrf.mxu1 }
 0x2a0   : > { %v2808_v54 = vpop.f32.mrf.mxu3 }
 0x2a1   : > { %v1914_v4 = vadd.f32 %v5297_v45, %v1783_v32  ;;  %v5696_v26 = vadd.f32 %v3209_v49, %v2808_v54 }
 0x2a2   : > { %v3212_v2 = vpop.f32.mrf.mxu0 }
 0x2a3   : > { %v1978_v41 = vmax.f32 %v1914_v4, 0.0  ;;  %v2042_v25 = vmin.f32 %v1914_v4, 0.0  ;;  %4212 = vmatmul.msk.f32.gmra.mxu2 %vm538_vm0, %v989_v23  ;;  %v991_v4 = vmax.f32 %v4812_v33, 0.0 }
 0x2a5   : > { %4323 = vmatmul.msk.f32.gmra.mxu3 %vm538_vm0, %v2042_v25  ;;  %4387 = vmatmul.msk.f32.gmra.mxu0 %vm538_vm0, %v1978_v41 }
 0x2a6   : > { %v1785_v37 = vpop.f32.mrf.mxu2 }
 0x2a7   : > { %v1786_v6 = vadd.f32 %v1785_v37, %v1384_v60  ;;  %v1396_v25 = vpop.f32.mrf.mxu1 }
 0x2a8   : > { %v2811_v10 = vpop.f32.mrf.mxu3 }
 0x2a9   : > { %v1915_v15 = vadd.f32 %v5297_v45, %v1786_v6  ;;  %v5703_v12 = vadd.f32 %v3212_v2, %v2811_v10 }
 0x2aa   : > { %v3215_v49 = vpop.f32.mrf.mxu0 }
 0x2ab   : > { %v1979_v51 = vmax.f32 %v1915_v15, 0.0  ;;  %v2043_v32 = vmin.f32 %v1915_v15, 0.0  ;;  %4213 = vmatmul.msk.f32.gmra.mxu2 %vm538_vm0, %v990_v30  ;;  %v992_v15 = vmax.f32 %v4828_v42, 0.0 }
 0x2ad   : > { %4324 = vmatmul.msk.f32.gmra.mxu3 %vm538_vm0, %v2043_v32  ;;  %4388 = vmatmul.msk.f32.gmra.mxu0 %vm538_vm0, %v1979_v51 }
 0x2ae   : > { %v1788_v54 = vpop.f32.mrf.mxu2 }
 0x2af   : > { %v1789_v23 = vadd.f32 %v1788_v54, %v1387_v16 }
 0x2b0   : > { %v2814_v60 = vpop.f32.mrf.mxu3 }
 0x2b1   : > { %v1916_v24 = vadd.f32 %v5297_v45, %v1789_v23  ;;  %v5710_v41 = vadd.f32 %v3215_v49, %v2814_v60  ;;  %v1399_v23 = vpop.f32.mrf.mxu1 }
 0x2b2   : > { %v3218_v2 = vpop.f32.mrf.mxu0 }
 0x2b3   : > { %v1980_v37 = vmax.f32 %v1916_v24, 0.0  ;;  %v2044_v6 = vmin.f32 %v1916_v24, 0.0  ;;  %4214 = vmatmul.msk.f32.gmra.mxu2 %vm538_vm0, %v991_v4  ;;  %v993_v24 = vmax.f32 %v4847_v52, 0.0 }
 0x2b5   : > { %4325 = vmatmul.msk.f32.gmra.mxu3 %vm538_vm0, %v2044_v6  ;;  %4389 = vmatmul.msk.f32.gmra.mxu0 %vm538_vm0, %v1980_v37 }
 0x2b6   : > { %v1791_v10 = vpop.f32.mrf.mxu2 }
 0x2b7   : > { %v1792_v30 = vadd.f32 %v1791_v10, %v1390_v53 }
 0x2b8   : > { %v2817_v16 = vpop.f32.mrf.mxu3 }
 0x2b9   : > { %v1917_v33 = vadd.f32 %v5297_v45, %v1792_v30  ;;  %v5717_v51 = vadd.f32 %v3218_v2, %v2817_v16  ;;  %v3356_v30 = vld [vmem:[%s6363_s11] sm:$0xff]  ;;  %v1402_v52 = vpop.f32.mrf.mxu1 }
 0x2ba   : > { %v3221_v49 = vpop.f32.mrf.mxu0  ;;  %3565 = vmatpush.msrb.mxu1 %v3356_v30 }
 0x2bb   : > { %v1981_v32 = vmax.f32 %v1917_v33, 0.0  ;;  %v2045_v54 = vmin.f32 %v1917_v33, 0.0  ;;  %4215 = vmatmul.msk.f32.gmra.mxu2 %vm538_vm0, %v992_v15  ;;  %v994_v15 = vmax.f32 %v4863_v62, 0.0  ;;  %v5736_v33 = vld [vmem:[%s6358_s6] ss:$0 sm:$0xff] }
 0x2bd   : > { %4326 = vmatmul.msk.f32.gmra.mxu3 %vm538_vm0, %v2045_v54  ;;  %4390 = vmatmul.msk.f32.gmra.mxu0 %vm538_vm0, %v1981_v32 }
 0x2be   : > { %v1794_v60 = vpop.f32.mrf.mxu2 }
 0x2bf   : > { %v1795_v4 = vadd.f32 %v1794_v60, %v1393_v21 }
 0x2c0   : > { %v2820_v53 = vpop.f32.mrf.mxu3 }
 0x2c1   : > { %v1918_v42 = vadd.f32 %v5297_v45, %v1795_v4  ;;  %v5724_v37 = vadd.f32 %v3221_v49, %v2820_v53 }
 0x2c2   : > { %v3224_v2 = vpop.f32.mrf.mxu0 }
 0x2c3   : > { %v1982_v6 = vmax.f32 %v1918_v42, 0.0  ;;  %v2046_v10 = vmin.f32 %v1918_v42, 0.0  ;;  %4216 = vmatmul.msk.f32.gmra.mxu2 %vm538_vm0, %v993_v24  ;;  %v1405_v24 = vpop.f32.mrf.mxu1  ;;  %v995_v42 = vmax.f32 %v4879_v13, 0.0 }
 0x2c5   : > { %4327 = vmatmul.msk.f32.gmra.mxu3 %vm538_vm0, %v2046_v10  ;;  %4391 = vmatmul.msk.f32.gmra.mxu0 %vm538_vm0, %v1982_v6 }
 0x2c6   : > { %v1797_v21 = vpop.f32.mrf.mxu2 }
 0x2c7   : > { %v1798_v16 = vadd.f32 %v1797_v21, %v1396_v25 }
 0x2c8   : > { %v2823_v45 = vpop.f32.mrf.mxu3 }
 0x2c9   : > { %v1919_v49 = vadd.f32 %v5736_v33, %v1798_v16  ;;  %v5739_v32 = vadd.f32 %v3224_v2, %v2823_v45 }
 0x2ca   : > { %v3227_v54 = vpop.f32.mrf.mxu0 }
 0x2cb   : > { %v1983_v60 = vmax.f32 %v1919_v49, 0.0  ;;  %v2047_v4 = vmin.f32 %v1919_v49, 0.0  ;;  %4217 = vmatmul.msk.f32.gmra.mxu2 %vm538_vm0, %v994_v15  ;;  %v996_v15 = vmax.f32 %v4895_v27, 0.0 }
 0x2cd   : > { %4328 = vmatmul.msk.f32.gmra.mxu3 %vm538_vm0, %v2047_v4  ;;  %4392 = vmatmul.msk.f32.gmra.mxu0 %vm538_vm0, %v1983_v60  ;;  %v1408_v60 = vpop.f32.mrf.mxu1 }
 0x2ce   : > { %v1800_v25 = vpop.f32.mrf.mxu2 }
 0x2cf   : > { %v1801_v62 = vadd.f32 %v1800_v25, %v1399_v23 }
 0x2d0   : > { %v2826_v53 = vpop.f32.mrf.mxu3 }
 0x2d1   : > { %v1920_v6 = vadd.f32 %v5736_v33, %v1801_v62  ;;  %v5746_v10 = vadd.f32 %v3227_v54, %v2826_v53 }
 0x2d2   : > { %v3230_v2 = vpop.f32.mrf.mxu0 }
 0x2d3   : > { %v1984_v30 = vmax.f32 %v1920_v6, 0.0  ;;  %v2048_v21 = vmin.f32 %v1920_v6, 0.0  ;;  %4218 = vmatmul.msk.f32.gmra.mxu2 %vm538_vm0, %v995_v42  ;;  %v997_v42 = vmax.f32 %v4915_v43, 0.0 }
 0x2d5   : > { %4329 = vmatmul.msk.f32.gmra.mxu3 %vm538_vm0, %v2048_v21  ;;  %4393 = vmatmul.msk.f32.gmra.mxu0 %vm538_vm0, %v1984_v30 }
 0x2d6   : > { %v1803_v16 = vpop.f32.mrf.mxu2 }
 0x2d7   : > { %v1804_v45 = vadd.f32 %v1803_v16, %v1402_v52  ;;  %v1411_v16 = vpop.f32.mrf.mxu1 }
 0x2d8   : > { %v2829_v23 = vpop.f32.mrf.mxu3 }
 0x2d9   : > { %v1921_v13 = vadd.f32 %v5736_v33, %v1804_v45  ;;  %v5753_v49 = vadd.f32 %v3230_v2, %v2829_v23 }
 0x2da   : > { %v3233_v54 = vpop.f32.mrf.mxu0 }
 0x2db   : > { %v1985_v4 = vmax.f32 %v1921_v13, 0.0  ;;  %v2049_v25 = vmin.f32 %v1921_v13, 0.0  ;;  %4219 = vmatmul.msk.f32.gmra.mxu2 %vm538_vm0, %v996_v15  ;;  %v998_v15 = vmax.f32 %v4932_v5, 0.0 }
 0x2dd   : > { %4330 = vmatmul.msk.f32.gmra.mxu3 %vm538_vm0, %v2049_v25  ;;  %4394 = vmatmul.msk.f32.gmra.mxu0 %vm538_vm0, %v1985_v4 }
 0x2de   : > { %v1806_v62 = vpop.f32.mrf.mxu2 }
 0x2df   : > { %v1807_v53 = vadd.f32 %v1806_v62, %v1405_v24 }
 0x2e0   : > { %v2832_v52 = vpop.f32.mrf.mxu3 }
 0x2e1   : > { %v1922_v27 = vadd.f32 %v5736_v33, %v1807_v53  ;;  %v5760_v6 = vadd.f32 %v3233_v54, %v2832_v52  ;;  %v1414_v53 = vpop.f32.mrf.mxu1 }
 0x2e2   : > { %v3236_v2 = vpop.f32.mrf.mxu0 }
 0x2e3   : > { %v1986_v30 = vmax.f32 %v1922_v27, 0.0  ;;  %v2050_v21 = vmin.f32 %v1922_v27, 0.0  ;;  %4220 = vmatmul.msk.f32.gmra.mxu2 %vm538_vm0, %v997_v42  ;;  %v999_v42 = vmax.f32 %v4948_v7, 0.0 }
 0x2e5   : > { %4331 = vmatmul.msk.f32.gmra.mxu3 %vm538_vm0, %v2050_v21  ;;  %4395 = vmatmul.msk.f32.gmra.mxu0 %vm538_vm0, %v1986_v30 }
 0x2e6   : > { %v1809_v45 = vpop.f32.mrf.mxu2 }
 0x2e7   : > { %v1810_v23 = vadd.f32 %v1809_v45, %v1408_v60 }
 0x2e8   : > { %v2835_v24 = vpop.f32.mrf.mxu3 }
 0x2e9   : > { %v1923_v43 = vadd.f32 %v5736_v33, %v1810_v23  ;;  %v5767_v13 = vadd.f32 %v3236_v2, %v2835_v24  ;;  %v1417_v24 = vpop.f32.mrf.mxu1 }
 0x2ea   : > { %v3239_v54 = vpop.f32.mrf.mxu0 }
 0x2eb   : > { %v1987_v4 = vmax.f32 %v1923_v43, 0.0  ;;  %v2051_v25 = vmin.f32 %v1923_v43, 0.0  ;;  %4221 = vmatmul.msk.f32.gmra.mxu2 %vm538_vm0, %v998_v15  ;;  %v1000_v15 = vmax.f32 %v4964_v28, 0.0 }
 0x2ed   : > { %4332 = vmatmul.msk.f32.gmra.mxu3 %vm538_vm0, %v2051_v25  ;;  %4396 = vmatmul.msk.f32.gmra.mxu0 %vm538_vm0, %v1987_v4 }
 0x2ee   : > { %v1812_v62 = vpop.f32.mrf.mxu2 }
 0x2ef   : > { %v1813_v52 = vadd.f32 %v1812_v62, %v1411_v16 }
 0x2f0   : > { %v2838_v60 = vpop.f32.mrf.mxu3 }
 0x2f1   : > { %v1924_v5 = vadd.f32 %v5736_v33, %v1813_v52  ;;  %v5774_v27 = vadd.f32 %v3239_v54, %v2838_v60  ;;  %v1001_v60 = vmax.f32 %v4980_v46, 0.0 }
 0x2f2   : > { %v3242_v2 = vpop.f32.mrf.mxu0 }
 0x2f3   : > { %v1988_v30 = vmax.f32 %v1924_v5, 0.0  ;;  %v2052_v21 = vmin.f32 %v1924_v5, 0.0  ;;  %4222 = vmatmul.msk.f32.gmra.mxu2 %vm538_vm0, %v999_v42  ;;  %v1420_v5 = vpop.f32.mrf.mxu1 }
 0x2f5   : > { %4333 = vmatmul.msk.f32.gmra.mxu3 %vm538_vm0, %v2052_v21  ;;  %4397 = vmatmul.msk.f32.gmra.mxu0 %vm538_vm0, %v1988_v30 }
 0x2f6   : > { %v1815_v45 = vpop.f32.mrf.mxu2 }
 0x2f7   : > { %v1816_v23 = vadd.f32 %v1815_v45, %v1414_v53 }
 0x2f8   : > { %v2841_v16 = vpop.f32.mrf.mxu3 }
 0x2f9   : > { %v1925_v7 = vadd.f32 %v5736_v33, %v1816_v23  ;;  %v5781_v43 = vadd.f32 %v3242_v2, %v2841_v16  ;;  %v1002_v16 = vmax.f32 %v4996_v1, 0.0  ;;  %v1003_v1 = vmax.f32 %v5012_v34, 0.0 }
 0x2fa   : > { %v3245_v54 = vpop.f32.mrf.mxu0 }
 0x2fb   : > { %v1989_v4 = vmax.f32 %v1925_v7, 0.0  ;;  %v2053_v25 = vmin.f32 %v1925_v7, 0.0  ;;  %4223 = vmatmul.msk.f32.gmra.mxu2 %vm538_vm0, %v1000_v15 }
 0x2fd   : > { %4334 = vmatmul.msk.f32.gmra.mxu3 %vm538_vm0, %v2053_v25  ;;  %4398 = vmatmul.msk.f32.gmra.mxu0 %vm538_vm0, %v1989_v4  ;;  %v1423_v25 = vpop.f32.mrf.mxu1 }
 0x2fe   : > { %v1818_v62 = vpop.f32.mrf.mxu2 }
 0x2ff   : > { %v1819_v52 = vadd.f32 %v1818_v62, %v1417_v24 }
 0x300   : > { %v2844_v53 = vpop.f32.mrf.mxu3 }
 0x301   : > { %v1926_v28 = vadd.f32 %v5736_v33, %v1819_v52  ;;  %v5788_v42 = vadd.f32 %v3245_v54, %v2844_v53 }
 0x302   : > { %v3248_v2 = vpop.f32.mrf.mxu0 }
 0x303   : > { %v1990_v30 = vmax.f32 %v1926_v28, 0.0  ;;  %v2054_v21 = vmin.f32 %v1926_v28, 0.0  ;;  %4224 = vmatmul.msk.f32.gmra.mxu2 %vm538_vm0, %v1001_v60 }
 0x305   : > { %4335 = vmatmul.msk.f32.gmra.mxu3 %vm538_vm0, %v2054_v21  ;;  %4399 = vmatmul.msk.f32.gmra.mxu0 %vm538_vm0, %v1990_v30  ;;  %v1426_v21 = vpop.f32.mrf.mxu1 }
 0x306   : > { %v1821_v45 = vpop.f32.mrf.mxu2 }
 0x307   : > { %v1822_v23 = vadd.f32 %v1821_v45, %v1420_v5 }
 0x308   : > { %v2847_v24 = vpop.f32.mrf.mxu3 }
 0x309   : > { %v1927_v46 = vadd.f32 %v5736_v33, %v1822_v23  ;;  %v5795_v15 = vadd.f32 %v3248_v2, %v2847_v24 }
 0x30a   : > { %v3251_v7 = vpop.f32.mrf.mxu0 }
 0x30b   : > { %v1991_v54 = vmax.f32 %v1927_v46, 0.0  ;;  %v2055_v4 = vmin.f32 %v1927_v46, 0.0  ;;  %4225 = vmatmul.msk.f32.gmra.mxu2 %vm538_vm0, %v1002_v16  ;;  %v2074_v16 = vld [vmem:[%s4634_s16] sm:$0xff] }
 0x30d   : > { %4336 = vmatmul.msk.f32.gmra.mxu3 %vm538_vm0, %v2055_v4  ;;  %4400 = vmatmul.msk.f32.gmra.mxu0 %vm538_vm0, %v1991_v54 }
 0x30e   : > { %v1824_v62 = vpop.f32.mrf.mxu2 }
 0x30f   : > { %v1825_v52 = vadd.f32 %v1824_v62, %v1423_v25 }
 0x310   : > { %v2850_v53 = vpop.f32.mrf.mxu3 }
 0x311   : > { %v1928_v60 = vadd.f32 %v5736_v33, %v1825_v52  ;;  %v5802_v28 = vadd.f32 %v3251_v7, %v2850_v53  ;;  %v2075_v53 = vld [vmem:[%s4634_s16 + $0x8] sm:$0xff] }
 0x312   : > { %v3254_v5 = vpop.f32.mrf.mxu0 }
 0x313   : > { %v1992_v2 = vmax.f32 %v1928_v60, 0.0  ;;  %v2056_v30 = vmin.f32 %v1928_v60, 0.0  ;;  %4226 = vmatmul.msk.f32.gmra.mxu2 %vm538_vm0, %v1003_v1 }
 0x315   : > { %4337 = vmatmul.msk.f32.gmra.mxu3 %vm538_vm0, %v2056_v30  ;;  %4401 = vmatmul.msk.f32.gmra.mxu0 %vm538_vm0, %v1992_v2 }
 0x316   : > { %v1827_v45 = vpop.f32.mrf.mxu2 }
 0x317   : > { %v1828_v23 = vadd.f32 %v1827_v45, %v1426_v21 }
 0x318   : > { %v2853_v24 = vpop.f32.mrf.mxu3 }
 0x319   : > { %v1929_v34 = vadd.f32 %v5736_v33, %v1828_v23  ;;  %v5809_v46 = vadd.f32 %v3254_v5, %v2853_v24  ;;  %v2076_v23 = vld [vmem:[%s4634_s16 + $0x10] sm:$0xff] }
 0x31a   : > { %v3257_v7 = vpop.f32.mrf.mxu0 }
 0x31b   : > { %v1993_v54 = vmax.f32 %v1929_v34, 0.0  ;;  %v2057_v4 = vmin.f32 %v1929_v34, 0.0  ;;  %4227 = vmatmul.msk.f32.vlgmr.msrb.gmra.mxu2 %vm2144_vm1, %v2074_v16 }
 0x31d   : > { %4338 = vmatmul.msk.f32.gmra.mxu3 %vm538_vm0, %v2057_v4  ;;  %4402 = vmatmul.msk.f32.gmra.mxu0 %vm538_vm0, %v1993_v54 }
 0x31e   : > { %v1830_v25 = vpop.f32.mrf.mxu2 }
 0x31f   : > { %v1831_v62 = vadd.f32 %v1830_v25, %v5037_v22 }
 0x320   : > { %v2856_v52 = vpop.f32.mrf.mxu3 }
 0x321   : > { %v1930_v1 = vadd.f32 %v5736_v33, %v1831_v62  ;;  %v5817_v60 = vadd.f32 %v3257_v7, %v2856_v52  ;;  %v2077_v62 = vld [vmem:[%s4634_s16 + $0x18] sm:$0xff] }
 0x322   : > { %v3260_v5 = vpop.f32.mrf.mxu0 }
 0x323   : > { %v1994_v2 = vmax.f32 %v1930_v1, 0.0  ;;  %v2058_v30 = vmin.f32 %v1930_v1, 0.0  ;;  %4228 = vmatmul.msk.f32.gmra.mxu2 %vm2144_vm1, %v2075_v53 }
 0x325   : > { %4339 = vmatmul.msk.f32.gmra.mxu3 %vm538_vm0, %v2058_v30  ;;  %4403 = vmatmul.msk.f32.gmra.mxu0 %vm538_vm0, %v1994_v2 }
 0x326   : > { %v1833_v21 = vpop.f32.mrf.mxu2 }
 0x327   : > { %v1834_v45 = vadd.f32 %v1833_v21, %v5052_v56 }
 0x328   : > { %v2859_v22 = vpop.f32.mrf.mxu3 }
 0x329   : > { %v1931_v24 = vadd.f32 %v5736_v33, %v1834_v45  ;;  %v5825_v16 = vadd.f32 %v3260_v5, %v2859_v22  ;;  %v2078_v45 = vld [vmem:[%s4634_s16 + $0x20] sm:$0xff] }
 0x32a   : > { %v3263_v34 = vpop.f32.mrf.mxu0 }
 0x32b   : > { %v1995_v7 = vmax.f32 %v1931_v24, 0.0  ;;  %v2059_v54 = vmin.f32 %v1931_v24, 0.0  ;;  %4229 = vmatmul.msk.f32.gmra.mxu2 %vm2144_vm1, %v2076_v23 }
 0x32d   : > { %4340 = vmatmul.msk.f32.gmra.mxu3 %vm538_vm0, %v2059_v54  ;;  %4404 = vmatmul.msk.f32.gmra.mxu0 %vm538_vm0, %v1995_v7 }
 0x32e   : > { %v1836_v4 = vpop.f32.mrf.mxu2 }
 0x32f   : > { %v1837_v25 = vadd.f32 %v1836_v4, %v5067_v39 }
 0x330   : > { %v2862_v56 = vpop.f32.mrf.mxu3 }
 0x331   : > { %v1932_v52 = vadd.f32 %v5736_v33, %v1837_v25  ;;  %v5833_v53 = vadd.f32 %v3263_v34, %v2862_v56  ;;  %v2079_v25 = vld [vmem:[%s4634_s16 + $0x28] sm:$0xff] }
 0x332   : > { %v3266_v1 = vpop.f32.mrf.mxu0 }
 0x333   : > { %v1996_v5 = vmax.f32 %v1932_v52, 0.0  ;;  %v2060_v2 = vmin.f32 %v1932_v52, 0.0  ;;  %4230 = vmatmul.msk.f32.gmra.mxu2 %vm2144_vm1, %v2077_v62 }
 0x335   : > { %4341 = vmatmul.msk.f32.gmra.mxu3 %vm538_vm0, %v2060_v2  ;;  %4405 = vmatmul.msk.f32.gmra.mxu0 %vm538_vm0, %v1996_v5 }
 0x336   : > { %v1839_v30 = vpop.f32.mrf.mxu2 }
 0x337   : > { %v1840_v21 = vadd.f32 %v1839_v30, %v5082_v17 }
 0x338   : > { %v2865_v39 = vpop.f32.mrf.mxu3 }
 0x339   : > { %v1933_v22 = vadd.f32 %v5736_v33, %v1840_v21  ;;  %v5841_v23 = vadd.f32 %v3266_v1, %v2865_v39  ;;  %v2080_v21 = vld [vmem:[%s4634_s16 + $0x30] sm:$0xff] }
 0x33a   : > { %v3269_v24 = vpop.f32.mrf.mxu0 }
 0x33b   : > { %v1997_v34 = vmax.f32 %v1933_v22, 0.0  ;;  %v2061_v7 = vmin.f32 %v1933_v22, 0.0  ;;  %4231 = vmatmul.msk.f32.gmra.mxu2 %vm2144_vm1, %v2078_v45 }
 0x33d   : > { %4342 = vmatmul.msk.f32.gmra.mxu3 %vm538_vm0, %v2061_v7  ;;  %4406 = vmatmul.msk.f32.gmra.mxu0 %vm538_vm0, %v1997_v34 }
 0x33e   : > { %v1842_v54 = vpop.f32.mrf.mxu2 }
 0x33f   : > { %v1843_v4 = vadd.f32 %v1842_v54, %v5097_v50 }
 0x340   : > { %v2868_v17 = vpop.f32.mrf.mxu3 }
 0x341   : > { %v1934_v56 = vadd.f32 %v5736_v33, %v1843_v4  ;;  %v5849_v62 = vadd.f32 %v3269_v24, %v2868_v17  ;;  %v2081_v4 = vld [vmem:[%s4634_s16 + $0x38] sm:$0xff] }
 0x342   : > { %v3272_v52 = vpop.f32.mrf.mxu0 }
 0x343   : > { %v1998_v1 = vmax.f32 %v1934_v56, 0.0  ;;  %v2062_v5 = vmin.f32 %v1934_v56, 0.0  ;;  %4232 = vmatmul.msk.f32.gmra.mxu2 %vm2144_vm1, %v2079_v25 }
 0x345   : > { %4343 = vmatmul.msk.f32.gmra.mxu3 %vm538_vm0, %v2062_v5  ;;  %4407 = vmatmul.msk.f32.gmra.mxu0 %vm538_vm0, %v1998_v1 }
 0x346   : > { %v1845_v2 = vpop.f32.mrf.mxu2 }
 0x347   : > { %v1846_v30 = vadd.f32 %v1845_v2, %v5112_v11 }
 0x348   : > { %v2871_v50 = vpop.f32.mrf.mxu3 }
 0x349   : > { %v1935_v39 = vadd.f32 %v5736_v33, %v1846_v30  ;;  %v5857_v45 = vadd.f32 %v3272_v52, %v2871_v50  ;;  %v2082_v30 = vld [vmem:[%s4634_s16 + $0x40] sm:$0xff] }
 0x34a   : > { %v3275_v34 = vpop.f32.mrf.mxu0 }
 0x34b   : > { %v1999_v22 = vmax.f32 %v1935_v39, 0.0  ;;  %v2063_v24 = vmin.f32 %v1935_v39, 0.0  ;;  %4233 = vmatmul.msk.f32.gmra.mxu2 %vm2144_vm1, %v2080_v21 }
 0x34d   : > { %4344 = vmatmul.msk.f32.gmra.mxu3 %vm538_vm0, %v2063_v24  ;;  %4408 = vmatmul.msk.f32.gmra.mxu0 %vm538_vm0, %v1999_v22 }
 0x34e   : > { %v1848_v7 = vpop.f32.mrf.mxu2 }
 0x34f   : > { %v1849_v54 = vadd.f32 %v1848_v7, %v5127_v44 }
 0x350   : > { %v2874_v11 = vpop.f32.mrf.mxu3 }
 0x351   : > { %v1936_v17 = vadd.f32 %v5736_v33, %v1849_v54  ;;  %v5865_v25 = vadd.f32 %v3275_v34, %v2874_v11  ;;  %v2083_v54 = vld [vmem:[%s4634_s16 + $0x48] sm:$0xff] }
 0x352   : > { %v3278_v1 = vpop.f32.mrf.mxu0 }
 0x353   : > { %v2000_v56 = vmax.f32 %v1936_v17, 0.0  ;;  %v2064_v52 = vmin.f32 %v1936_v17, 0.0  ;;  %4234 = vmatmul.msk.f32.gmra.mxu2 %vm2144_vm1, %v2081_v4 }
 0x355   : > { %4345 = vmatmul.msk.f32.gmra.mxu3 %vm538_vm0, %v2064_v52  ;;  %4409 = vmatmul.msk.f32.gmra.mxu0 %vm538_vm0, %v2000_v56 }
 0x356   : > { %v1851_v5 = vpop.f32.mrf.mxu2 }
 0x357   : > { %v1852_v2 = vadd.f32 %v1851_v5, %v5138_v31 }
 0x358   : > { %v2877_v44 = vpop.f32.mrf.mxu3 }
 0x359   : > { %v1937_v50 = vadd.f32 %v5736_v33, %v1852_v2  ;;  %v5873_v21 = vadd.f32 %v3278_v1, %v2877_v44 }
 0x35a   : > { %v3281_v7 = vpop.f32.mrf.mxu0 }
 0x35b   : > { %v2001_v39 = vmax.f32 %v1937_v50, 0.0  ;;  %v2065_v22 = vmin.f32 %v1937_v50, 0.0  ;;  %4235 = vmatmul.msk.f32.gmra.mxu2 %vm2144_vm1, %v2082_v30 }
 0x35d   : > { %4346 = vmatmul.msk.f32.gmra.mxu3 %vm538_vm0, %v2065_v22  ;;  %4410 = vmatmul.msk.f32.gmra.mxu0 %vm538_vm0, %v2001_v39  ;;  %v2085_v39 = vld [vmem:[%s4634_s16 + $0x58] sm:$0xff] }
 0x35e   : > { %v1854_v24 = vpop.f32.mrf.mxu2 }
 0x35f   : > { %v1855_v34 = vadd.f32 %v1854_v24, %v5148_v57  ;;  %v2084_v57 = vld [vmem:[%s4634_s16 + $0x50] sm:$0xff] }
 0x360   : > { %v2880_v31 = vpop.f32.mrf.mxu3 }
 0x361   : > { %v1938_v11 = vadd.f32 %v5736_v33, %v1855_v34  ;;  %v5881_v4 = vadd.f32 %v3281_v7, %v2880_v31  ;;  %v2086_v31 = vld [vmem:[%s4634_s16 + $0x60] sm:$0xff] }
 0x363   : > { %v2002_v17 = vmax.f32 %v1938_v11, 0.0  ;;  %v2066_v56 = vmin.f32 %v1938_v11, 0.0  ;;  %4236 = vmatmul.msk.f32.gmra.mxu2 %vm2144_vm1, %v2083_v54 }
 0x365   : > { %4347 = vmatmul.msk.f32.gmra.mxu3 %vm538_vm0, %v2066_v56  ;;  %4411 = vmatmul.msk.f32.gmra.mxu0 %vm538_vm0, %v2002_v17  ;;  %v6417_v56 = vld [vmem:[#allocation31_spill] sm:$0xff] }
 0x366   : > { %v1857_v52 = vpop.f32.mrf.mxu2 }
 0x367   : > { %v1858_v1 = vadd.f32 %v1857_v52, %v5158_v36 }
 0x369   : > { %v1939_v5 = vadd.f32 %v5736_v33, %v1858_v1  ;;  %v2087_v1 = vld [vmem:[%s4634_s16 + $0x68] sm:$0xff] }
 0x36b   : > { %v2003_v2 = vmax.f32 %v1939_v5, 0.0  ;;  %v2067_v44 = vmin.f32 %v1939_v5, 0.0  ;;  %4237 = vmatmul.msk.f32.gmra.mxu2 %vm2144_vm1, %v2084_v57 }
 0x36d   : > { %4348 = vmatmul.msk.f32.gmra.mxu3 %vm538_vm0, %v2067_v44  ;;  %4412 = vmatmul.msk.f32.gmra.mxu0 %vm538_vm0, %v2003_v2  ;;  %v6418_v44 = vld [vmem:[#allocation33_spill] sm:$0xff] }
 0x36e   : > { %v1860_v30 = vpop.f32.mrf.mxu2 }
 0x36f   : > { %v1861_v50 = vadd.f32 %v1860_v30, %v5170_v47 }
 0x371   : > { %v1940_v22 = vadd.f32 %v5736_v33, %v1861_v50  ;;  %v2088_v50 = vld [vmem:[%s4634_s16 + $0x70] sm:$0xff] }
 0x373   : > { %v2004_v24 = vmax.f32 %v1940_v22, 0.0  ;;  %v2068_v36 = vmin.f32 %v1940_v22, 0.0  ;;  %4238 = vmatmul.msk.f32.gmra.mxu2 %vm2144_vm1, %v2085_v39 }
 0x375   : > { %4349 = vmatmul.msk.f32.gmra.mxu3 %vm538_vm0, %v2068_v36  ;;  %4413 = vmatmul.msk.f32.gmra.mxu0 %vm538_vm0, %v2004_v24 }
 0x376   : > { %v1863_v34 = vpop.f32.mrf.mxu2 }
 0x377   : > { %v1864_v7 = vadd.f32 %v1863_v34, %v5186_v0  ;;  %v6419_v34 = vld [vmem:[#allocation35_spill] sm:$0xff] }
 0x379   : > { %v1941_v54 = vadd.f32 %v5736_v33, %v1864_v7 }
 0x37b   : > { %v2005_v11 = vmax.f32 %v1941_v54, 0.0  ;;  %v2069_v47 = vmin.f32 %v1941_v54, 0.0  ;;  %4239 = vmatmul.msk.f32.gmra.mxu2 %vm2144_vm1, %v2086_v31 }
 0x37d   : > { %4350 = vmatmul.msk.f32.gmra.mxu3 %vm538_vm0, %v2069_v47  ;;  %4414 = vmatmul.msk.f32.gmra.mxu0 %vm538_vm0, %v2005_v11 }
 0x37e   : > { %v1866_v17 = vpop.f32.mrf.mxu2 }
 0x37f   : > { %v1867_v52 = vadd.f32 %v1866_v17, %v6417_v56  ;;  %v6420_v17 = vld [vmem:[#allocation37_spill] sm:$0xff] }
 0x381   : > { %v1942_v57 = vadd.f32 %v5736_v33, %v1867_v52 }
 0x383   : > { %v2006_v5 = vmax.f32 %v1942_v57, 0.0  ;;  %v2070_v0 = vmin.f32 %v1942_v57, 0.0  ;;  %4240 = vmatmul.msk.f32.gmra.mxu2 %vm2144_vm1, %v2087_v1 }
 0x385   : > { %4351 = vmatmul.msk.f32.gmra.mxu3 %vm538_vm0, %v2070_v0  ;;  %4415 = vmatmul.msk.f32.gmra.mxu0 %vm538_vm0, %v2006_v5  ;;  %v5925_v5 = vld [vmem:[%s6360_s8] ss:$0 sm:$0xff] }
 0x386   : > { %v1869_v2 = vpop.f32.mrf.mxu2 }
 0x387   : > { %v1870_v30 = vadd.f32 %v1869_v2, %v6418_v44 }
 0x389   : > { %v1943_v39 = vadd.f32 %v5736_v33, %v1870_v30 }
 0x38b   : > { %v2007_v22 = vmax.f32 %v1943_v39, 0.0  ;;  %v2071_v24 = vmin.f32 %v1943_v39, 0.0  ;;  %4241 = vmatmul.msk.f32.gmra.mxu2 %vm2144_vm1, %v2088_v50 }
 0x38d   : > { %4352 = vmatmul.msk.f32.gmra.mxu3 %vm538_vm0, %v2071_v24  ;;  %4416 = vmatmul.msk.f32.gmra.mxu0 %vm538_vm0, %v2007_v22 }
 0x38e   : > { %v1872_v36 = vpop.f32.mrf.mxu2 }
 0x38f   : > { %v1873_v7 = vadd.f32 %v1872_v36, %v6419_v34 }
 0x391   : > { %v1944_v31 = vadd.f32 %v5736_v33, %v1873_v7 }
 0x393   : > { %v2008_v54 = vmax.f32 %v1944_v31, 0.0  ;;  %v2072_v11 = vmin.f32 %v1944_v31, 0.0 }
 0x395   : > { %4353 = vmatmul.msk.f32.gmra.mxu3 %vm538_vm0, %v2072_v11  ;;  %4417 = vmatmul.msk.f32.gmra.mxu0 %vm538_vm0, %v2008_v54 }
 0x396   : > { %v1875_v47 = vpop.f32.mrf.mxu2 }
 0x397   : > { %v1876_v56 = vadd.f32 %v1875_v47, %v6420_v17 }
 0x399   : > { %v1945_v52 = vadd.f32 %v5736_v33, %v1876_v56 }
 0x39b   : > { %v2009_v1 = vmax.f32 %v1945_v52, 0.0  ;;  %v2073_v57 = vmin.f32 %v1945_v52, 0.0 }
 0x39d   : > { %4354 = vmatmul.msk.f32.gmra.mxu3 %vm538_vm0, %v2073_v57  ;;  %4418 = vmatmul.msk.f32.gmra.mxu0 %vm538_vm0, %v2009_v1 }
 0x39e   : > { %v2354_v0 = vpop.f32.mrf.mxu2 }
 0x39f   : > { %v2355_v2 = vadd.f32 %v5925_v5, %v2354_v0 }
 0x3a1   : > { %4419 = vmatmul.msk.f32.vlgmr.msrb.gmra.mxu1 %vm2144_vm1, %v2355_v2 }
 0x3a6   : > { %v2357_v44 = vpop.f32.mrf.mxu2 }
 0x3a7   : > { %v2358_v30 = vadd.f32 %v5925_v5, %v2357_v44 }
 0x3a9   : > { %4420 = vmatmul.msk.f32.gmra.mxu1 %vm2144_vm1, %v2358_v30 }
 0x3ae   : > { %v2360_v33 = vpop.f32.mrf.mxu2 }
 0x3af   : > { %v2361_v50 = vadd.f32 %v5925_v5, %v2360_v33 }
 0x3b1   : > { %4421 = vmatmul.msk.f32.gmra.mxu1 %vm2144_vm1, %v2361_v50 }
 0x3b6   : > { %v2363_v39 = vpop.f32.mrf.mxu2 }
 0x3b7   : > { %v2364_v22 = vadd.f32 %v5925_v5, %v2363_v39 }
 0x3b9   : > { %4422 = vmatmul.msk.f32.gmra.mxu1 %vm2144_vm1, %v2364_v22 }
 0x3be   : > { %v2366_v24 = vpop.f32.mrf.mxu2 }
 0x3bf   : > { %v2367_v36 = vadd.f32 %v5925_v5, %v2366_v24 }
 0x3c1   : > { %4423 = vmatmul.msk.f32.gmra.mxu1 %vm2144_vm1, %v2367_v36  ;;  %v6421_v36 = vld [vmem:[#allocation2_spill] sm:$0xff] }
 0x3c6   : > { %v2369_v34 = vpop.f32.mrf.mxu2 }
 0x3c7   : > { %v2370_v7 = vadd.f32 %v5925_v5, %v2369_v34  ;;  %v2400_v34 = vadd.f32 %v5925_v5, %v6421_v36  ;;  %v6426_v36 = vld [vmem:[#allocation7_spill] sm:$0xff] }
 0x3c9   : > { %4424 = vmatmul.msk.f32.gmra.mxu1 %vm2144_vm1, %v2370_v7  ;;  %v5965_v7 = vld [vmem:[%s6364_s12] ss:$0 sm:$0xff] }
 0x3ce   : > { %v2372_v31 = vpop.f32.mrf.mxu2 }
 0x3cf   : > { %v2373_v54 = vadd.f32 %v5925_v5, %v2372_v31 }
 0x3d1   : > { %4425 = vmatmul.msk.f32.gmra.mxu1 %vm2144_vm1, %v2373_v54  ;;  %v6422_v54 = vld [vmem:[#allocation3_spill] sm:$0xff] }
 0x3d6   : > { %v2375_v11 = vpop.f32.mrf.mxu2 }
 0x3d7   : > { %v2376_v47 = vadd.f32 %v5925_v5, %v2375_v11  ;;  %v2403_v11 = vadd.f32 %v5925_v5, %v6422_v54 }
 0x3d9   : > { %4426 = vmatmul.msk.f32.gmra.mxu1 %vm2144_vm1, %v2376_v47 }
 0x3de   : > { %v2378_v17 = vpop.f32.mrf.mxu2 }
 0x3df   : > { %v2379_v56 = vadd.f32 %v5925_v5, %v2378_v17 }
 0x3e1   : > { %4427 = vmatmul.msk.f32.gmra.mxu1 %vm2144_vm1, %v2379_v56 }
 0x3e6   : > { %v2381_v52 = vpop.f32.mrf.mxu2 }
 0x3e7   : > { %v2382_v1 = vadd.f32 %v5925_v5, %v2381_v52  ;;  %v6423_v52 = vld [vmem:[#allocation4_spill] sm:$0xff] }
 0x3e9   : > { %4428 = vmatmul.msk.f32.gmra.mxu1 %vm2144_vm1, %v2382_v1  ;;  %v2406_v1 = vadd.f32 %v5925_v5, %v6423_v52  ;;  %v6428_v52 = vld [vmem:[#allocation9_spill] sm:$0xff] }
 0x3ee   : > { %v2384_v57 = vpop.f32.mrf.mxu2 }
 0x3ef   : > { %v2385_v0 = vadd.f32 %v5925_v5, %v2384_v57 }
 0x3f1   : > { %4429 = vmatmul.msk.f32.gmra.mxu1 %vm2144_vm1, %v2385_v0 }
 0x3f6   : > { %v2387_v2 = vpop.f32.mrf.mxu2 }
 0x3f7   : > { %v2388_v44 = vadd.f32 %v5925_v5, %v2387_v2  ;;  %v6424_v2 = vld [vmem:[#allocation5_spill] sm:$0xff] }
 0x3f9   : > { %4430 = vmatmul.msk.f32.gmra.mxu1 %vm2144_vm1, %v2388_v44  ;;  %v2409_v44 = vadd.f32 %v5925_v5, %v6424_v2 }
 0x3fe   : > { %v2390_v30 = vpop.f32.mrf.mxu2 }
 0x3ff   : > { %v2391_v33 = vadd.f32 %v5925_v5, %v2390_v30 }
 0x401   : > { %4431 = vmatmul.msk.f32.gmra.mxu1 %vm2144_vm1, %v2391_v33 }
 0x406   : > { %v2393_v50 = vpop.f32.mrf.mxu2 }
 0x407   : > { %v2394_v39 = vadd.f32 %v5925_v5, %v2393_v50  ;;  %v6425_v50 = vld [vmem:[#allocation6_spill] sm:$0xff] }
 0x409   : > { %4432 = vmatmul.msk.f32.gmra.mxu1 %vm2144_vm1, %v2394_v39  ;;  %v2412_v39 = vadd.f32 %v5925_v5, %v6425_v50 }
 0x40e   : > { %v2396_v22 = vpop.f32.mrf.mxu2 }
 0x40f   : > { %v2397_v24 = vadd.f32 %v5925_v5, %v2396_v22 }
 0x411   : > { %4433 = vmatmul.msk.f32.gmra.mxu1 %vm2144_vm1, %v2397_v24 }
 0x419   : > { %4434 = vmatmul.msk.f32.gmra.mxu1 %vm2144_vm1, %v2400_v34  ;;  %v2415_v34 = vadd.f32 %v5925_v5, %v6426_v36 }
 0x41e   : > { %v3567_v31 = vpop.f32.mrf.mxu1 }
 0x41f   : > { %v3759_v47 = vadd.f32 %v3567_v31, %v5568_v29 }
 0x421   : > { %v3827_v17 = vadd.f32 %v5965_v7, %v3759_v47  ;;  %4435 = vmatmul.msk.f32.gmra.mxu1 %vm2144_vm1, %v2403_v11  ;;  %v6427_v11 = vld [vmem:[#allocation8_spill] sm:$0xff] }
 0x422   : > { %v2418_v47 = vadd.f32 %v5925_v5, %v6427_v11  ;;  %v6433_v11 = vld [vmem:[#allocation14_spill] sm:$0xff] }
 0x423   : > { %3892 = vst.msk [vmem:[%s5974_s22] sm:$0xff] %vm3891_vm2, %v3827_v17 }
 0x426   : > { %v3570_v56 = vpop.f32.mrf.mxu1 }
 0x427   : > { %v3760_v29 = vadd.f32 %v3570_v56, %v5580_v19 }
 0x429   : > { %v3828_v57 = vadd.f32 %v5965_v7, %v3760_v29  ;;  %4436 = vmatmul.msk.f32.gmra.mxu1 %vm2144_vm1, %v2406_v1  ;;  %v2421_v1 = vadd.f32 %v5925_v5, %v6428_v52 }
 0x42b   : > { %3893 = vst.msk [vmem:[%s5974_s22 + $0x8] sm:$0xff] %vm3891_vm2, %v3828_v57 }
 0x42e   : > { %v3573_v0 = vpop.f32.mrf.mxu1 }
 0x42f   : > { %v3761_v30 = vadd.f32 %v3573_v0, %v5591_v35  ;;  %v6429_v0 = vld [vmem:[#allocation10_spill] sm:$0xff] }
 0x430   : > { %v2424_v2 = vadd.f32 %v5925_v5, %v6429_v0 }
 0x431   : > { %v3829_v33 = vadd.f32 %v5965_v7, %v3761_v30  ;;  %4437 = vmatmul.msk.f32.gmra.mxu1 %vm2144_vm1, %v2409_v44 }
 0x433   : > { %3894 = vst.msk [vmem:[%s5974_s22 + $0x10] sm:$0xff] %vm3891_vm2, %v3829_v33  ;;  %v6430_v33 = vld [vmem:[#allocation11_spill] sm:$0xff] }
 0x436   : > { %v3576_v19 = vpop.f32.mrf.mxu1 }
 0x437   : > { %v3762_v22 = vadd.f32 %v3576_v19, %v5601_v8  ;;  %v2427_v19 = vadd.f32 %v5925_v5, %v6430_v33 }
 0x439   : > { %v3830_v24 = vadd.f32 %v5965_v7, %v3762_v22  ;;  %4438 = vmatmul.msk.f32.gmra.mxu1 %vm2144_vm1, %v2412_v39  ;;  %v6431_v22 = vld [vmem:[#allocation12_spill] sm:$0xff] }
 0x43b   : > { %3895 = vst.msk [vmem:[%s5974_s22 + $0x18] sm:$0xff] %vm3891_vm2, %v3830_v24  ;;  %v2430_v24 = vadd.f32 %v5925_v5, %v6431_v22  ;;  %v6438_v22 = vld [vmem:[#allocation19_spill] sm:$0xff] }
 0x43e   : > { %v3579_v35 = vpop.f32.mrf.mxu1 }
 0x43f   : > { %v3763_v31 = vadd.f32 %v3579_v35, %v5611_v58 }
 0x441   : > { %v3831_v54 = vadd.f32 %v5965_v7, %v3763_v31  ;;  %4439 = vmatmul.msk.f32.gmra.mxu1 %vm2144_vm1, %v2415_v34  ;;  %v6432_v34 = vld [vmem:[#allocation13_spill] sm:$0xff] }
 0x442   : > { %v2433_v31 = vadd.f32 %v5925_v5, %v6432_v34 }
 0x443   : > { %3896 = vst.msk [vmem:[%s5974_s22 + $0x20] sm:$0xff] %vm3891_vm2, %v3831_v54 }
 0x446   : > { %v3582_v8 = vpop.f32.mrf.mxu1 }
 0x447   : > { %v3764_v17 = vadd.f32 %v3582_v8, %v5621_v14 }
 0x449   : > { %v3832_v56 = vadd.f32 %v5965_v7, %v3764_v17  ;;  %4440 = vmatmul.msk.f32.gmra.mxu1 %vm2144_vm1, %v2418_v47  ;;  %v2436_v47 = vadd.f32 %v5925_v5, %v6433_v11 }
 0x44b   : > { %3897 = vst.msk [vmem:[%s5974_s22 + $0x28] sm:$0xff] %vm3891_vm2, %v3832_v56 }
 0x44e   : > { %v3585_v58 = vpop.f32.mrf.mxu1 }
 0x44f   : > { %v3765_v29 = vadd.f32 %v3585_v58, %v5629_v18  ;;  %v6434_v58 = vld [vmem:[#allocation15_spill] sm:$0xff] }
 0x450   : > { %v2439_v52 = vadd.f32 %v5925_v5, %v6434_v58 }
 0x451   : > { %v3833_v57 = vadd.f32 %v5965_v7, %v3765_v29  ;;  %4441 = vmatmul.msk.f32.gmra.mxu1 %vm2144_vm1, %v2421_v1 }
 0x453   : > { %3898 = vst.msk [vmem:[%s5974_s22 + $0x30] sm:$0xff] %vm3891_vm2, %v3833_v57  ;;  %v6435_v57 = vld [vmem:[#allocation16_spill] sm:$0xff] }
 0x456   : > { %v3588_v14 = vpop.f32.mrf.mxu1 }
 0x457   : > { %v3766_v44 = vadd.f32 %v3588_v14, %v5637_v48  ;;  %v2442_v14 = vadd.f32 %v5925_v5, %v6435_v57  ;;  %v6443_v57 = vld [vmem:[#allocation24_spill] sm:$0xff] }
 0x459   : > { %v3834_v30 = vadd.f32 %v5965_v7, %v3766_v44  ;;  %4442 = vmatmul.msk.f32.gmra.mxu1 %vm2144_vm1, %v2424_v2  ;;  %v6436_v44 = vld [vmem:[#allocation17_spill] sm:$0xff] }
 0x45b   : > { %3899 = vst.msk [vmem:[%s5974_s22 + $0x38] sm:$0xff] %vm3891_vm2, %v3834_v30  ;;  %v2445_v30 = vadd.f32 %v5925_v5, %v6436_v44 }
 0x45e   : > { %v3591_v18 = vpop.f32.mrf.mxu1 }
 0x45f   : > { %v3767_v50 = vadd.f32 %v3591_v18, %v5645_v9 }
 0x461   : > { %v3835_v39 = vadd.f32 %v5965_v7, %v3767_v50  ;;  %4443 = vmatmul.msk.f32.gmra.mxu1 %vm2144_vm1, %v2427_v19  ;;  %v6437_v19 = vld [vmem:[#allocation18_spill] sm:$0xff] }
 0x462   : > { %v2448_v50 = vadd.f32 %v5925_v5, %v6437_v19 }
 0x463   : > { %3900 = vst.msk [vmem:[%s5974_s22 + $0x40] sm:$0xff] %vm3891_vm2, %v3835_v39 }
 0x466   : > { %v3594_v48 = vpop.f32.mrf.mxu1 }
 0x467   : > { %v3768_v35 = vadd.f32 %v3594_v48, %v5653_v40 }
 0x469   : > { %v3836_v36 = vadd.f32 %v5965_v7, %v3768_v35  ;;  %4444 = vmatmul.msk.f32.gmra.mxu1 %vm2144_vm1, %v2430_v24  ;;  %v2451_v24 = vadd.f32 %v5925_v5, %v6438_v22 }
 0x46b   : > { %3901 = vst.msk [vmem:[%s5974_s22 + $0x48] sm:$0xff] %vm3891_vm2, %v3836_v36 }
 0x46e   : > { %v3597_v9 = vpop.f32.mrf.mxu1 }
 0x46f   : > { %v3769_v54 = vadd.f32 %v3597_v9, %v5661_v38  ;;  %v6439_v9 = vld [vmem:[#allocation20_spill] sm:$0xff] }
 0x470   : > { %v2454_v34 = vadd.f32 %v5925_v5, %v6439_v9  ;;  %v6448_v9 = vld [vmem:[#allocation29_spill] sm:$0xff] }
 0x471   : > { %v3837_v8 = vadd.f32 %v5965_v7, %v3769_v54  ;;  %4445 = vmatmul.msk.f32.gmra.mxu1 %vm2144_vm1, %v2433_v31 }
 0x473   : > { %3902 = vst.msk [vmem:[%s5974_s22 + $0x50] sm:$0xff] %vm3891_vm2, %v3837_v8  ;;  %v6440_v8 = vld [vmem:[#allocation21_spill] sm:$0xff] }
 0x476   : > { %v3600_v40 = vpop.f32.mrf.mxu1 }
 0x477   : > { %v3770_v17 = vadd.f32 %v3600_v40, %v5668_v59  ;;  %v2457_v40 = vadd.f32 %v5925_v5, %v6440_v8 }
 0x479   : > { %v3838_v56 = vadd.f32 %v5965_v7, %v3770_v17  ;;  %4446 = vmatmul.msk.f32.gmra.mxu1 %vm2144_vm1, %v2436_v47  ;;  %v6441_v17 = vld [vmem:[#allocation22_spill] sm:$0xff] }
 0x47b   : > { %3903 = vst.msk [vmem:[%s5974_s22 + $0x58] sm:$0xff] %vm3891_vm2, %v3838_v56  ;;  %v2460_v56 = vadd.f32 %v5925_v5, %v6441_v17 }
 0x47e   : > { %v3603_v38 = vpop.f32.mrf.mxu1 }
 0x47f   : > { %v3771_v1 = vadd.f32 %v3603_v38, %v5675_v3 }
 0x481   : > { %v3839_v29 = vadd.f32 %v5965_v7, %v3771_v1  ;;  %4447 = vmatmul.msk.f32.gmra.mxu1 %vm2144_vm1, %v2439_v52  ;;  %v6442_v52 = vld [vmem:[#allocation23_spill] sm:$0xff] }
 0x482   : > { %v2463_v1 = vadd.f32 %v5925_v5, %v6442_v52 }
 0x483   : > { %3904 = vst.msk [vmem:[%s5974_s22 + $0x60] sm:$0xff] %vm3891_vm2, %v3839_v29 }
 0x486   : > { %v3606_v59 = vpop.f32.mrf.mxu1 }
 0x487   : > { %v3772_v0 = vadd.f32 %v3606_v59, %v5682_v55 }
 0x489   : > { %v3840_v2 = vadd.f32 %v5965_v7, %v3772_v0  ;;  %4448 = vmatmul.msk.f32.gmra.mxu1 %vm2144_vm1, %v2442_v14  ;;  %v2466_v14 = vadd.f32 %v5925_v5, %v6443_v57  ;;  %v6453_v57 = vld [vmem:[#allocation38_spill] sm:$0xff] }
 0x48b   : > { %3905 = vst.msk [vmem:[%s5974_s22 + $0x68] sm:$0xff] %vm3891_vm2, %v3840_v2 }
 0x48e   : > { %v3609_v3 = vpop.f32.mrf.mxu1 }
 0x48f   : > { %v3773_v18 = vadd.f32 %v3609_v3, %v5689_v61  ;;  %v6444_v3 = vld [vmem:[#allocation25_spill] sm:$0xff] }
 0x490   : > { %v2469_v44 = vadd.f32 %v5925_v5, %v6444_v3 }
 0x491   : > { %v3841_v33 = vadd.f32 %v5965_v7, %v3773_v18  ;;  %4449 = vmatmul.msk.f32.gmra.mxu1 %vm2144_vm1, %v2445_v30 }
 0x493   : > { %3906 = vst.msk [vmem:[%s5974_s22 + $0x70] sm:$0xff] %vm3891_vm2, %v3841_v33  ;;  %v6445_v33 = vld [vmem:[#allocation26_spill] sm:$0xff] }
 0x496   : > { %v3612_v55 = vpop.f32.mrf.mxu1 }
 0x497   : > { %v3774_v39 = vadd.f32 %v3612_v55, %v5696_v26  ;;  %v2472_v55 = vadd.f32 %v5925_v5, %v6445_v33 }
 0x499   : > { %v3842_v48 = vadd.f32 %v5965_v7, %v3774_v39  ;;  %4450 = vmatmul.msk.f32.gmra.mxu1 %vm2144_vm1, %v2448_v50  ;;  %v6446_v39 = vld [vmem:[#allocation27_spill] sm:$0xff] }
 0x49b   : > { %3907 = vst.msk [vmem:[%s5974_s22 + $0x78] sm:$0xff] %vm3891_vm2, %v3842_v48  ;;  %v2475_v48 = vadd.f32 %v5925_v5, %v6446_v39 }
 0x49e   : > { %v3615_v61 = vpop.f32.mrf.mxu1 }
 0x49f   : > { %v3775_v35 = vadd.f32 %v3615_v61, %v5703_v12 }
 0x4a1   : > { %v3843_v36 = vadd.f32 %v5965_v7, %v3775_v35  ;;  %4451 = vmatmul.msk.f32.gmra.mxu1 %vm2144_vm1, %v2451_v24  ;;  %v6447_v24 = vld [vmem:[#allocation28_spill] sm:$0xff] }
 0x4a2   : > { %v2478_v35 = vadd.f32 %v5925_v5, %v6447_v24 }
 0x4a3   : > { %3908 = vst.msk [vmem:[%s5974_s22 + $0x80] sm:$0xff] %vm3891_vm2, %v3843_v36 }
 0x4a6   : > { %v3618_v26 = vpop.f32.mrf.mxu1 }
 0x4a7   : > { %v3776_v31 = vadd.f32 %v3618_v26, %v5710_v41 }
 0x4a9   : > { %v3844_v54 = vadd.f32 %v5965_v7, %v3776_v31  ;;  %4452 = vmatmul.msk.f32.gmra.mxu1 %vm2144_vm1, %v2454_v34  ;;  %v2481_v34 = vadd.f32 %v5925_v5, %v6448_v9 }
 0x4ab   : > { %3909 = vst.msk [vmem:[%s5974_s22 + $0x88] sm:$0xff] %vm3891_vm2, %v3844_v54 }
 0x4ae   : > { %v3621_v12 = vpop.f32.mrf.mxu1 }
 0x4af   : > { %v3777_v11 = vadd.f32 %v3621_v12, %v5717_v51  ;;  %v6449_v12 = vld [vmem:[#allocation30_spill] sm:$0xff] }
 0x4b0   : > { %v2484_v8 = vadd.f32 %v5925_v5, %v6449_v12  ;;  %v2514_v12 = vadd.f32 %v5925_v5, %v5374_v20 }
 0x4b1   : > { %v3845_v47 = vadd.f32 %v5965_v7, %v3777_v11  ;;  %4453 = vmatmul.msk.f32.gmra.mxu1 %vm2144_vm1, %v2457_v40 }
 0x4b3   : > { %3910 = vst.msk [vmem:[%s5974_s22 + $0x90] sm:$0xff] %vm3891_vm2, %v3845_v47  ;;  %v6450_v47 = vld [vmem:[#allocation32_spill] sm:$0xff] }
 0x4b6   : > { %v3624_v41 = vpop.f32.mrf.mxu1 }
 0x4b7   : > { %v3778_v38 = vadd.f32 %v3624_v41, %v5724_v37  ;;  %v2487_v41 = vadd.f32 %v5925_v5, %v6450_v47  ;;  %v6459_v47 = vld [vmem:[#allocation44_spill] sm:$0xff] }
 0x4b9   : > { %v3846_v58 = vadd.f32 %v5965_v7, %v3778_v38  ;;  %4454 = vmatmul.msk.f32.gmra.mxu1 %vm2144_vm1, %v2460_v56  ;;  %v6451_v38 = vld [vmem:[#allocation34_spill] sm:$0xff] }
 0x4bb   : > { %3911 = vst.msk [vmem:[%s5974_s22 + $0x98] sm:$0xff] %vm3891_vm2, %v3846_v58  ;;  %v2490_v58 = vadd.f32 %v5925_v5, %v6451_v38  ;;  %v6460_v38 = vld [vmem:[#allocation45_spill] sm:$0xff] }
 0x4be   : > { %v3627_v51 = vpop.f32.mrf.mxu1 }
 0x4bf   : > { %v3779_v29 = vadd.f32 %v3627_v51, %v5739_v32 }
 0x4c1   : > { %v3847_v59 = vadd.f32 %v5965_v7, %v3779_v29  ;;  %4455 = vmatmul.msk.f32.gmra.mxu1 %vm2144_vm1, %v2463_v1  ;;  %v6452_v1 = vld [vmem:[#allocation36_spill] sm:$0xff] }
 0x4c2   : > { %v2493_v29 = vadd.f32 %v5925_v5, %v6452_v1 }
 0x4c3   : > { %3912 = vst.msk [vmem:[%s5974_s22 + $0xa0] sm:$0xff] %vm3891_vm2, %v3847_v59 }
 0x4c6   : > { %v3630_v37 = vpop.f32.mrf.mxu1 }
 0x4c7   : > { %v3780_v0 = vadd.f32 %v3630_v37, %v5746_v10 }
 0x4c9   : > { %v3848_v2 = vadd.f32 %v5965_v7, %v3780_v0  ;;  %4456 = vmatmul.msk.f32.gmra.mxu1 %vm2144_vm1, %v2466_v14  ;;  %v2496_v14 = vadd.f32 %v5925_v5, %v6453_v57 }
 0x4cb   : > { %3913 = vst.msk [vmem:[%s5974_s22 + $0xa8] sm:$0xff] %vm3891_vm2, %v3848_v2 }
 0x4ce   : > { %v3633_v32 = vpop.f32.mrf.mxu1 }
 0x4cf   : > { %v3781_v30 = vadd.f32 %v3633_v32, %v5753_v49  ;;  %v6454_v32 = vld [vmem:[#allocation39_spill] sm:$0xff] }
 0x4d0   : > { %v2499_v3 = vadd.f32 %v5925_v5, %v6454_v32 }
 0x4d1   : > { %v3849_v18 = vadd.f32 %v5965_v7, %v3781_v30  ;;  %4457 = vmatmul.msk.f32.gmra.mxu1 %vm2144_vm1, %v2469_v44 }
 0x4d3   : > { %3914 = vst.msk [vmem:[%s5974_s22 + $0xb0] sm:$0xff] %vm3891_vm2, %v3849_v18  ;;  %v6455_v18 = vld [vmem:[#allocation40_spill] sm:$0xff] }
 0x4d6   : > { %v3636_v10 = vpop.f32.mrf.mxu1 }
 0x4d7   : > { %v3782_v19 = vadd.f32 %v3636_v10, %v5760_v6  ;;  %v2502_v10 = vadd.f32 %v5925_v5, %v6455_v18  ;;  %v6463_v18 = vld [vmem:[#allocation48_spill] sm:$0xff] }
 0x4d9   : > { %v3850_v50 = vadd.f32 %v5965_v7, %v3782_v19  ;;  %4458 = vmatmul.msk.f32.gmra.mxu1 %vm2144_vm1, %v2472_v55  ;;  %v3284_v19 = vpop.f32.mrf.mxu0 }
 0x4db   : > { %3915 = vst.msk [vmem:[%s5974_s22 + $0xb8] sm:$0xff] %vm3891_vm2, %v3850_v50 }
 0x4de   : > { %v3639_v49 = vpop.f32.mrf.mxu1 }
 0x4df   : > { %v3783_v61 = vadd.f32 %v3639_v49, %v5767_v13  ;;  %v6456_v49 = vld [vmem:[#allocation41_spill] sm:$0xff] }
 0x4e0   : > { %v2505_v39 = vadd.f32 %v5925_v5, %v6456_v49 }
 0x4e1   : > { %v3851_v22 = vadd.f32 %v5965_v7, %v3783_v61  ;;  %4459 = vmatmul.msk.f32.gmra.mxu1 %vm2144_vm1, %v2475_v48 }
 0x4e3   : > { %3916 = vst.msk [vmem:[%s5974_s22 + $0xc0] sm:$0xff] %vm3891_vm2, %v3851_v22 }
 0x4e6   : > { %v3642_v6 = vpop.f32.mrf.mxu1 }
 0x4e7   : > { %v3784_v36 = vadd.f32 %v3642_v6, %v5774_v27  ;;  %v6457_v6 = vld [vmem:[#allocation42_spill] sm:$0xff] }
 0x4e8   : > { %v2508_v24 = vadd.f32 %v5925_v5, %v6457_v6 }
 0x4e9   : > { %v3852_v26 = vadd.f32 %v5965_v7, %v3784_v36  ;;  %4460 = vmatmul.msk.f32.gmra.mxu1 %vm2144_vm1, %v2478_v35  ;;  %v3287_v36 = vpop.f32.mrf.mxu0 }
 0x4eb   : > { %3917 = vst.msk [vmem:[%s5974_s22 + $0xc8] sm:$0xff] %vm3891_vm2, %v3852_v26 }
 0x4ee   : > { %v3645_v13 = vpop.f32.mrf.mxu1 }
 0x4ef   : > { %v3785_v31 = vadd.f32 %v3645_v13, %v5781_v43  ;;  %v6458_v13 = vld [vmem:[#allocation43_spill] sm:$0xff] }
 0x4f0   : > { %v2511_v9 = vadd.f32 %v5925_v5, %v6458_v13 }
 0x4f1   : > { %v3853_v54 = vadd.f32 %v5965_v7, %v3785_v31  ;;  %4461 = vmatmul.msk.f32.gmra.mxu1 %vm2144_vm1, %v2481_v34 }
 0x4f3   : > { %3918 = vst.msk [vmem:[%s5974_s22 + $0xd0] sm:$0xff] %vm3891_vm2, %v3853_v54 }
 0x4f6   : > { %v3648_v27 = vpop.f32.mrf.mxu1 }
 0x4f7   : > { %v3786_v40 = vadd.f32 %v3648_v27, %v5788_v42 }
 0x4f9   : > { %v3854_v11 = vadd.f32 %v5965_v7, %v3786_v40  ;;  %4462 = vmatmul.msk.f32.gmra.mxu1 %vm2144_vm1, %v2484_v8 }
 0x4fb   : > { %3919 = vst.msk [vmem:[%s5974_s22 + $0xd8] sm:$0xff] %vm3891_vm2, %v3854_v11 }
 0x4fe   : > { %v3651_v43 = vpop.f32.mrf.mxu1 }
 0x4ff   : > { %v3787_v17 = vadd.f32 %v3651_v43, %v5795_v15 }
 0x501   : > { %v3855_v56 = vadd.f32 %v5965_v7, %v3787_v17  ;;  %4463 = vmatmul.msk.f32.gmra.mxu1 %vm2144_vm1, %v2487_v41  ;;  %v2517_v41 = vadd.f32 %v5925_v5, %v6459_v47 }
 0x503   : > { %3920 = vst.msk [vmem:[%s5974_s22 + $0xe0] sm:$0xff] %vm3891_vm2, %v3855_v56 }
 0x506   : > { %v3654_v42 = vpop.f32.mrf.mxu1 }
 0x507   : > { %v3788_v51 = vadd.f32 %v3654_v42, %v5802_v28 }
 0x509   : > { %v3856_v52 = vadd.f32 %v5965_v7, %v3788_v51  ;;  %4464 = vmatmul.msk.f32.gmra.mxu1 %vm2144_vm1, %v2490_v58  ;;  %v2520_v58 = vadd.f32 %v5925_v5, %v6460_v38 }
 0x50b   : > { %3921 = vst.msk [vmem:[%s5974_s22 + $0xe8] sm:$0xff] %vm3891_vm2, %v3856_v52 }
 0x50e   : > { %v3657_v15 = vpop.f32.mrf.mxu1 }
 0x50f   : > { %v3789_v59 = vadd.f32 %v3657_v15, %v5809_v46 }
 0x511   : > { %v3857_v37 = vadd.f32 %v5965_v7, %v3789_v59  ;;  %4465 = vmatmul.msk.f32.gmra.mxu1 %vm2144_vm1, %v2493_v29  ;;  %v6461_v29 = vld [vmem:[#allocation46_spill] sm:$0xff] }
 0x512   : > { %v2523_v59 = vadd.f32 %v5925_v5, %v6461_v29 }
 0x513   : > { %3922 = vst.msk [vmem:[%s5974_s22 + $0xf0] sm:$0xff] %vm3891_vm2, %v3857_v37 }
 0x516   : > { %v3660_v28 = vpop.f32.mrf.mxu1 }
 0x517   : > { %v3790_v0 = vadd.f32 %v3660_v28, %v5817_v60 }
 0x519   : > { %v3858_v2 = vadd.f32 %v5965_v7, %v3790_v0  ;;  %4466 = vmatmul.msk.f32.gmra.mxu1 %vm2144_vm1, %v2496_v14  ;;  %v6462_v0 = vld [vmem:[#allocation47_spill] sm:$0xff] }
 0x51b   : > { %3923 = vst.msk [vmem:[%s5974_s22 + $0xf8] sm:$0xff] %vm3891_vm2, %v3858_v2  ;;  %v2526_v2 = vadd.f32 %v5925_v5, %v6462_v0 }
 0x51e   : > { %v3663_v46 = vpop.f32.mrf.mxu1 }
 0x51f   : > { %v3791_v44 = vadd.f32 %v3663_v46, %v5825_v16  ;;  %v2883_v16 = vpop.f32.mrf.mxu3 }
 0x521   : > { %v3859_v30 = vadd.f32 %v5965_v7, %v3791_v44  ;;  %4467 = vmatmul.msk.f32.gmra.mxu1 %vm2144_vm1, %v2499_v3 }
 0x523   : > { %3924 = vst.msk [vmem:[%s5974_s22 + $0x100] sm:$0xff] %vm3891_vm2, %v3859_v30 }
 0x526   : > { %v3666_v60 = vpop.f32.mrf.mxu1 }
 0x527   : > { %v3792_v33 = vadd.f32 %v3666_v60, %v5833_v53  ;;  %v2886_v53 = vpop.f32.mrf.mxu3 }
 0x529   : > { %v3860_v55 = vadd.f32 %v5965_v7, %v3792_v33  ;;  %4468 = vmatmul.msk.f32.gmra.mxu1 %vm2144_vm1, %v2502_v10  ;;  %v2529_v10 = vadd.f32 %v5925_v5, %v6463_v18 }
 0x52b   : > { %3925 = vst.msk [vmem:[%s5974_s22 + $0x108] sm:$0xff] %vm3891_vm2, %v3860_v55 }
 0x52e   : > { %v3669_v50 = vpop.f32.mrf.mxu1 }
 0x52f   : > { %v3793_v48 = vadd.f32 %v3669_v50, %v5841_v23  ;;  %v2889_v31 = vpop.f32.mrf.mxu3 }
 0x531   : > { %v3861_v61 = vadd.f32 %v5965_v7, %v3793_v48  ;;  %4469 = vmatmul.msk.f32.gmra.mxu1 %vm2144_vm1, %v2505_v39  ;;  %v2532_v39 = vadd.f32 %v5925_v5, %v5469_v63 }
 0x533   : > { %3926 = vst.msk [vmem:[%s5974_s22 + $0x110] sm:$0xff] %vm3891_vm2, %v3861_v61 }
 0x536   : > { %v3672_v22 = vpop.f32.mrf.mxu1 }
 0x537   : > { %v3794_v35 = vadd.f32 %v3672_v22, %v5849_v62  ;;  %v3290_v62 = vpop.f32.mrf.mxu0 }
 0x538   : > { %v3291_v30 = vadd.f32 %v3290_v62, %v2889_v31 }
 0x539   : > { %v3862_v26 = vadd.f32 %v5965_v7, %v3794_v35  ;;  %4470 = vmatmul.msk.f32.gmra.mxu1 %vm2144_vm1, %v2508_v24  ;;  %v6464_v35 = vld [vmem:[#allocation49_spill] sm:$0xff] }
 0x53b   : > { %3927 = vst.msk [vmem:[%s5974_s22 + $0x118] sm:$0xff] %vm3891_vm2, %v3862_v26 }
 0x53e   : > { %v3675_v23 = vpop.f32.mrf.mxu1 }
 0x53f   : > { %v3795_v34 = vadd.f32 %v3675_v23, %v5857_v45  ;;  %v2892_v45 = vpop.f32.mrf.mxu3  ;;  %v3293_v11 = vpop.f32.mrf.mxu0 }
 0x540   : > { %v3294_v50 = vadd.f32 %v3293_v11, %v2892_v45 }
 0x541   : > { %v3863_v54 = vadd.f32 %v5965_v7, %v3795_v34  ;;  %4471 = vmatmul.msk.f32.gmra.mxu1 %vm2144_vm1, %v2511_v9  ;;  %v6465_v34 = vld [vmem:[#allocation50_spill] sm:$0xff] }
 0x542   : > { %v2538_v31 = vadd.f32 %v5925_v5, %v6465_v34 }
 0x543   : > { %3928 = vst.msk [vmem:[%s5974_s22 + $0x120] sm:$0xff] %vm3891_vm2, %v3863_v54 }
 0x546   : > { %v3678_v27 = vpop.f32.mrf.mxu1 }
 0x547   : > { %v3796_v8 = vadd.f32 %v3678_v27, %v5865_v25  ;;  %v2895_v20 = vpop.f32.mrf.mxu3  ;;  %v3296_v25 = vpop.f32.mrf.mxu0 }
 0x548   : > { %v3297_v22 = vadd.f32 %v3296_v25, %v2895_v20  ;;  %v6467_v20 = vld [vmem:[#allocation52_spill] sm:$0xff] }
 0x549   : > { %v3864_v40 = vadd.f32 %v5965_v7, %v3796_v8  ;;  %4472 = vmatmul.msk.f32.gmra.mxu1 %vm2144_vm1, %v2514_v12  ;;  %v2544_v25 = vadd.f32 %v5925_v5, %v6467_v20 }
 0x54b   : > { %3929 = vst.msk [vmem:[%s5974_s22 + $0x128] sm:$0xff] %vm3891_vm2, %v3864_v40  ;;  %v6466_v40 = vld [vmem:[#allocation51_spill] sm:$0xff] }
 0x54c   : > { %v2541_v45 = vadd.f32 %v5925_v5, %v6466_v40 }
 0x54e   : > { %v3681_v43 = vpop.f32.mrf.mxu1 }
 0x54f   : > { %v3797_v17 = vadd.f32 %v3681_v43, %v5873_v21  ;;  %v3285_v21 = vadd.f32 %v3284_v19, %v2883_v16  ;;  %v2898_v15 = vpop.f32.mrf.mxu3  ;;  %v3299_v28 = vpop.f32.mrf.mxu0 }
 0x550   : > { %v3300_v63 = vadd.f32 %v3299_v28, %v2898_v15 }
 0x551   : > { %v3865_v56 = vadd.f32 %v5965_v7, %v3797_v17  ;;  %4473 = vmatmul.msk.f32.gmra.mxu1 %vm2144_vm1, %v2517_v41 }
 0x553   : > { %3930 = vst.msk [vmem:[%s5974_s22 + $0x130] sm:$0xff] %vm3891_vm2, %v3865_v56 }
 0x556   : > { %v3684_v42 = vpop.f32.mrf.mxu1 }
 0x557   : > { %v3798_v51 = vadd.f32 %v3684_v42, %v5881_v4  ;;  %v3288_v4 = vadd.f32 %v3287_v36, %v2886_v53  ;;  %v2901_v32 = vpop.f32.mrf.mxu3  ;;  %v3302_v44 = vpop.f32.mrf.mxu0  ;;  %v2535_v36 = vadd.f32 %v5925_v5, %v6464_v35 }
 0x558   : > { %v3303_v12 = vadd.f32 %v3302_v44, %v2901_v32 }
 0x559   : > { %v3866_v52 = vadd.f32 %v5965_v7, %v3798_v51  ;;  %4474 = vmatmul.msk.f32.gmra.mxu1 %vm2144_vm1, %v2520_v58 }
 0x55b   : > { %3931 = vst.msk [vmem:[%s5974_s22 + $0x138] sm:$0xff] %vm3891_vm2, %v3866_v52 }
 0x55e   : > { %v3687_v1 = vpop.f32.mrf.mxu1 }
 0x55f   : > { %v3799_v37 = vadd.f32 %v3687_v1, %v3285_v21  ;;  %v2904_v16 = vpop.f32.mrf.mxu3  ;;  %v3305_v19 = vpop.f32.mrf.mxu0 }
 0x560   : > { %v3306_v17 = vadd.f32 %v3305_v19, %v2904_v16 }
 0x561   : > { %v3867_v57 = vadd.f32 %v5965_v7, %v3799_v37  ;;  %4475 = vmatmul.msk.f32.gmra.mxu1 %vm2144_vm1, %v2523_v59 }
 0x563   : > { %3932 = vst.msk [vmem:[%s5974_s22 + $0x140] sm:$0xff] %vm3891_vm2, %v3867_v57 }
 0x566   : > { %v3690_v14 = vpop.f32.mrf.mxu1 }
 0x567   : > { %v3800_v46 = vadd.f32 %v3690_v14, %v3288_v4  ;;  %v2907_v53 = vpop.f32.mrf.mxu3  ;;  %v3308_v6 = vpop.f32.mrf.mxu0 }
 0x568   : > { %v3309_v52 = vadd.f32 %v3308_v6, %v2907_v53 }
 0x569   : > { %v3868_v3 = vadd.f32 %v5965_v7, %v3800_v46  ;;  %4476 = vmatmul.msk.f32.gmra.mxu1 %vm2144_vm1, %v2526_v2 }
 0x56b   : > { %3933 = vst.msk [vmem:[%s5974_s22 + $0x148] sm:$0xff] %vm3891_vm2, %v3868_v3 }
 0x56e   : > { %v3693_v60 = vpop.f32.mrf.mxu1 }
 0x56f   : > { %v3801_v33 = vadd.f32 %v3693_v60, %v3291_v30  ;;  %v2910_v13 = vpop.f32.mrf.mxu3  ;;  %v3311_v62 = vpop.f32.mrf.mxu0 }
 0x570   : > { %v3312_v5 = vadd.f32 %v3311_v62, %v2910_v13 }
 0x571   : > { %v3869_v55 = vadd.f32 %v5965_v7, %v3801_v33  ;;  %4477 = vmatmul.msk.f32.gmra.mxu1 %vm2144_vm1, %v2529_v10 }
 0x573   : > { %3934 = vst.msk [vmem:[%s5974_s22 + $0x150] sm:$0xff] %vm3891_vm2, %v3869_v55 }
 0x576   : > { %v3696_v49 = vpop.f32.mrf.mxu1 }
 0x577   : > { %v3802_v48 = vadd.f32 %v3696_v49, %v3294_v50  ;;  %v2913_v43 = vpop.f32.mrf.mxu3  ;;  %v3314_v41 = vpop.f32.mrf.mxu0 }
 0x578   : > { %v3315_v4 = vadd.f32 %v3314_v41, %v2913_v43 }
 0x579   : > { %v3870_v61 = vadd.f32 %v5965_v7, %v3802_v48  ;;  %4478 = vmatmul.msk.f32.gmra.mxu1 %vm2144_vm1, %v2532_v39 }
 0x57b   : > { %3935 = vst.msk [vmem:[%s5974_s22 + $0x158] sm:$0xff] %vm3891_vm2, %v3870_v61 }
 0x57e   : > { %v3699_v24 = vpop.f32.mrf.mxu1 }
 0x57f   : > { %v3803_v26 = vadd.f32 %v3699_v24, %v3297_v22  ;;  %v2916_v58 = vpop.f32.mrf.mxu3  ;;  %v3317_v51 = vpop.f32.mrf.mxu0 }
 0x580   : > { %v3318_v3 = vadd.f32 %v3317_v51, %v2916_v58 }
 0x581   : > { %v3871_v23 = vadd.f32 %v5965_v7, %v3803_v26  ;;  %4479 = vmatmul.msk.f32.gmra.mxu1 %vm2144_vm1, %v2535_v36 }
 0x583   : > { %3936 = vst.msk [vmem:[%s5974_s22 + $0x160] sm:$0xff] %vm3891_vm2, %v3871_v23 }
 0x586   : > { %v3702_v9 = vpop.f32.mrf.mxu1 }
 0x587   : > { %v3804_v54 = vadd.f32 %v3702_v9, %v3300_v63  ;;  %v2919_v29 = vpop.f32.mrf.mxu3  ;;  %v3320_v59 = vpop.f32.mrf.mxu0 }
 0x588   : > { %v3321_v33 = vadd.f32 %v3320_v59, %v2919_v29 }
 0x589   : > { %v3872_v27 = vadd.f32 %v5965_v7, %v3804_v54  ;;  %4480 = vmatmul.msk.f32.gmra.mxu1 %vm2144_vm1, %v2538_v31 }
 0x58b   : > { %3937 = vst.msk [vmem:[%s5974_s22 + $0x168] sm:$0xff] %vm3891_vm2, %v3872_v27 }
 0x58e   : > { %v3705_v8 = vpop.f32.mrf.mxu1 }
 0x58f   : > { %v3805_v11 = vadd.f32 %v3705_v8, %v3303_v12  ;;  %v2922_v14 = vpop.f32.mrf.mxu3  ;;  %v3323_v46 = vpop.f32.mrf.mxu0 }
 0x590   : > { %v3324_v39 = vadd.f32 %v3323_v46, %v2922_v14 }
 0x591   : > { %v3873_v47 = vadd.f32 %v5965_v7, %v3805_v11  ;;  %4481 = vmatmul.msk.f32.gmra.mxu1 %vm2144_vm1, %v2541_v45 }
 0x593   : > { %3938 = vst.msk [vmem:[%s5974_s22 + $0x170] sm:$0xff] %vm3891_vm2, %v3873_v47 }
 0x596   : > { %v3708_v56 = vpop.f32.mrf.mxu1 }
 0x597   : > { %v3806_v42 = vadd.f32 %v3708_v56, %v3306_v17  ;;  %v2925_v60 = vpop.f32.mrf.mxu3  ;;  %v3326_v10 = vpop.f32.mrf.mxu0 }
 0x598   : > { %v3327_v6 = vadd.f32 %v3326_v10, %v2925_v60 }
 0x599   : > { %v3874_v38 = vadd.f32 %v5965_v7, %v3806_v42  ;;  %4482 = vmatmul.msk.f32.gmra.mxu1 %vm2144_vm1, %v2544_v25 }
 0x59b   : > { %3939 = vst.msk [vmem:[%s5974_s22 + $0x178] sm:$0xff] %vm3891_vm2, %v3874_v38 }
 0x59e   : > { %v3711_v21 = vpop.f32.mrf.mxu1 }
 0x59f   : > { %v3807_v15 = vadd.f32 %v3711_v21, %v3309_v52  ;;  %v2928_v50 = vpop.f32.mrf.mxu3  ;;  %v3329_v49 = vpop.f32.mrf.mxu0 }
 0x5a0   : > { %v3330_v23 = vadd.f32 %v3329_v49, %v2928_v50 }
 0x5a1   : > { %v3875_v1 = vadd.f32 %v5965_v7, %v3807_v15 }
 0x5a3   : > { %3940 = vst.msk [vmem:[%s5974_s22 + $0x180] sm:$0xff] %vm3891_vm2, %v3875_v1 }
 0x5a6   : > { %v3714_v37 = vpop.f32.mrf.mxu1 }
 0x5a7   : > { %v3808_v28 = vadd.f32 %v3714_v37, %v3312_v5  ;;  %v2931_v22 = vpop.f32.mrf.mxu3  ;;  %v3332_v24 = vpop.f32.mrf.mxu0 }
 0x5a8   : > { %v3333_v54 = vadd.f32 %v3332_v24, %v2931_v22 }
 0x5a9   : > { %v3876_v57 = vadd.f32 %v5965_v7, %v3808_v28 }
 0x5ab   : > { %3941 = vst.msk [vmem:[%s5974_s22 + $0x188] sm:$0xff] %vm3891_vm2, %v3876_v57 }
 0x5ae   : > { %v3717_v0 = vpop.f32.mrf.mxu1 }
 0x5af   : > { %v3809_v2 = vadd.f32 %v3717_v0, %v3315_v4  ;;  %v2934_v63 = vpop.f32.mrf.mxu3  ;;  %v3335_v34 = vpop.f32.mrf.mxu0 }
 0x5b0   : > { %v3336_v45 = vadd.f32 %v3335_v34, %v2934_v63 }
 0x5b1   : > { %v3877_v32 = vadd.f32 %v5965_v7, %v3809_v2 }
 0x5b3   : > { %3942 = vst.msk [vmem:[%s5974_s22 + $0x190] sm:$0xff] %vm3891_vm2, %v3877_v32 }
 0x5b6   : > { %v3720_v44 = vpop.f32.mrf.mxu1 }
 0x5b7   : > { %v3810_v30 = vadd.f32 %v3720_v44, %v3318_v3  ;;  %v2937_v12 = vpop.f32.mrf.mxu3  ;;  %v3338_v40 = vpop.f32.mrf.mxu0 }
 0x5b8   : > { %v3339_v56 = vadd.f32 %v3338_v40, %v2937_v12 }
 0x5b9   : > { %v3878_v18 = vadd.f32 %v5965_v7, %v3810_v30 }
 0x5bb   : > { %3943 = vst.msk [vmem:[%s5974_s22 + $0x198] sm:$0xff] %vm3891_vm2, %v3878_v18 }
 0x5be   : > { %v3723_v55 = vpop.f32.mrf.mxu1 }
 0x5bf   : > { %v3811_v16 = vadd.f32 %v3723_v55, %v3321_v33  ;;  %v2940_v41 = vpop.f32.mrf.mxu3  ;;  %v3341_v17 = vpop.f32.mrf.mxu0 }
 0x5c0   : > { %v3342_v58 = vadd.f32 %v3341_v17, %v2940_v41 }
 0x5c1   : > { %v3879_v19 = vadd.f32 %v5965_v7, %v3811_v16 }
 0x5c3   : > { %3944 = vst.msk [vmem:[%s5974_s22 + $0x1a0] sm:$0xff] %vm3891_vm2, %v3879_v19 }
 0x5c6   : > { %v3726_v48 = vpop.f32.mrf.mxu1 }
 0x5c7   : > { %v3812_v61 = vadd.f32 %v3726_v48, %v3324_v39  ;;  %v2943_v38 = vpop.f32.mrf.mxu3  ;;  %v3344_v51 = vpop.f32.mrf.mxu0 }
 0x5c8   : > { %v3345_v1 = vadd.f32 %v3344_v51, %v2943_v38 }
 0x5c9   : > { %v3880_v53 = vadd.f32 %v5965_v7, %v3812_v61 }
 0x5cb   : > { %3945 = vst.msk [vmem:[%s5974_s22 + $0x1a8] sm:$0xff] %vm3891_vm2, %v3880_v53 }
 0x5ce   : > { %v3729_v35 = vpop.f32.mrf.mxu1 }
 0x5cf   : > { %v3813_v36 = vadd.f32 %v3729_v35, %v3327_v6  ;;  %v2946_v29 = vpop.f32.mrf.mxu3  ;;  %v3347_v37 = vpop.f32.mrf.mxu0 }
 0x5d0   : > { %v3348_v57 = vadd.f32 %v3347_v37, %v2946_v29 }
 0x5d1   : > { %v3881_v26 = vadd.f32 %v5965_v7, %v3813_v36 }
 0x5d3   : > { %3946 = vst.msk [vmem:[%s5974_s22 + $0x1b0] sm:$0xff] %vm3891_vm2, %v3881_v26 }
 0x5d6   : > { %v3732_v13 = vpop.f32.mrf.mxu1 }
 0x5d7   : > { %v3814_v9 = vadd.f32 %v3732_v13, %v3330_v23  ;;  %v2949_v0 = vpop.f32.mrf.mxu3  ;;  %v3350_v46 = vpop.f32.mrf.mxu0 }
 0x5d8   : > { %v3351_v32 = vadd.f32 %v3350_v46, %v2949_v0 }
 0x5d9   : > { %v3882_v31 = vadd.f32 %v5965_v7, %v3814_v9 }
 0x5db   : > { %3947 = vst.msk [vmem:[%s5974_s22 + $0x1b8] sm:$0xff] %vm3891_vm2, %v3882_v31 }
 0x5de   : > { %v3735_v62 = vpop.f32.mrf.mxu1 }
 0x5df   : > { %v3815_v27 = vadd.f32 %v3735_v62, %v3333_v54  ;;  %v2952_v60 = vpop.f32.mrf.mxu3  ;;  %v3353_v18 = vpop.f32.mrf.mxu0 }
 0x5e0   : > { %v3354_v10 = vadd.f32 %v3353_v18, %v2952_v60 }
 0x5e1   : > { %v3883_v8 = vadd.f32 %v5965_v7, %v3815_v27 }
 0x5e3   : > { %3948 = vst.msk [vmem:[%s5974_s22 + $0x1c0] sm:$0xff] %vm3891_vm2, %v3883_v8 }
 0x5e6   : > { %v3738_v11 = vpop.f32.mrf.mxu1 }
 0x5e7   : > { %v3816_v43 = vadd.f32 %v3738_v11, %v3336_v45 }
 0x5e9   : > { %v3884_v47 = vadd.f32 %v5965_v7, %v3816_v43 }
 0x5eb   : > { %3949 = vst.msk [vmem:[%s5974_s22 + $0x1c8] sm:$0xff] %vm3891_vm2, %v3884_v47 }
 0x5ee   : > { %v3741_v20 = vpop.f32.mrf.mxu1 }
 0x5ef   : > { %v3817_v25 = vadd.f32 %v3741_v20, %v3339_v56 }
 0x5f1   : > { %v3885_v42 = vadd.f32 %v5965_v7, %v3817_v25 }
 0x5f3   : > { %3950 = vst.msk [vmem:[%s5974_s22 + $0x1d0] sm:$0xff] %vm3891_vm2, %v3885_v42 }
 0x5f6   : > { %v3744_v52 = vpop.f32.mrf.mxu1 }
 0x5f7   : > { %v3818_v21 = vadd.f32 %v3744_v52, %v3342_v58 }
 0x5f9   : > { %v3886_v15 = vadd.f32 %v5965_v7, %v3818_v21 }
 0x5fb   : > { %3951 = vst.msk [vmem:[%s5974_s22 + $0x1d8] sm:$0xff] %vm3891_vm2, %v3886_v15 }
 0x5fe   : > { %v3747_v5 = vpop.f32.mrf.mxu1 }
 0x5ff   : > { %v3819_v59 = vadd.f32 %v3747_v5, %v3345_v1 }
 0x601   : > { %v3887_v28 = vadd.f32 %v5965_v7, %v3819_v59 }
 0x603   : > { %3952 = vst.msk [vmem:[%s5974_s22 + $0x1e0] sm:$0xff] %vm3891_vm2, %v3887_v28 }
 0x606   : > { %v3750_v4 = vpop.f32.mrf.mxu1 }
 0x607   : > { %v3820_v14 = vadd.f32 %v3750_v4, %v3348_v57 }
 0x609   : > { %v3888_v2 = vadd.f32 %v5965_v7, %v3820_v14 }
 0x60b   : > { %3953 = vst.msk [vmem:[%s5974_s22 + $0x1e8] sm:$0xff] %vm3891_vm2, %v3888_v2 }
 0x60e   : > { %v3753_v3 = vpop.f32.mrf.mxu1 }
 0x60f   : > { %v3821_v44 = vadd.f32 %v3753_v3, %v3351_v32 }
 0x611   : > { %v3889_v30 = vadd.f32 %v5965_v7, %v3821_v44 }
 0x613   : > { %3954 = vst.msk [vmem:[%s5974_s22 + $0x1f0] sm:$0xff] %vm3891_vm2, %v3889_v30 }
 0x616   : > { %v3756_v33 = vpop.f32.mrf.mxu1 }
 0x617   : > { %v3822_v55 = vadd.f32 %v3756_v33, %v3354_v10 }
 0x619   : > { %v3890_v16 = vadd.f32 %v5965_v7, %v3822_v55 }
 0x61b   : > { %3955 = vst.msk [vmem:[%s5974_s22 + $0x1f8] sm:$0xff] %vm3891_vm2, %v3890_v16 }
 0x61c PF: > { %s23_s25 = sadd.s32 1, %s4515_s25  }
 0x61d   : > { %p20_p4 = scmp.ge.s32.totalorder %s23_s25, 4  }
 0x61f   :  { %22 = sbr.rel (!%p20_p4) target bundleno = 1 (0x1), region = 105 }

</bundles_post_ra>
